<compile_context>
chip_gen: v5e
topology: v5e:2x2
jax: 0.10.0
libtpu: 0.0.40
codegen_flags: <defaults>
</compile_context>

<pallas_src>
import jax
import jax.numpy as jnp
from jax.experimental import pallas as pl
from jax.experimental.pallas import tpu as pltpu


def linear_sigmoid_kernel(w_ref, b_ref, x_ref, o_ref):
    # w_ref: SMEM f32[F_out*F_in]  (row-major over PyTorch's [out, in] weight)
    # b_ref: SMEM f32[F_out]
    # x_ref: VMEM f32[N, F_in]     (module-native layout, full-array block)
    # o_ref: VMEM f32[N, F_out]
    f_in = x_ref.shape[1]
    f_out = o_ref.shape[1]

    x = x_ref[...]                                  # load once
    cols = [x[:, k:k + 1] for k in range(f_in)]     # [N, 1] input columns

    for j in range(f_out):                          # fully unrolled: 9 VPU FMAs
        acc = cols[0] * w_ref[j * f_in + 0]
        for k in range(1, f_in):
            acc = acc + cols[k] * w_ref[j * f_in + k]
        # Direct per-column store (no concatenate / relayout temporary).
        o_ref[:, j:j + 1] = jax.nn.sigmoid(acc + b_ref[j]).astype(o_ref.dtype)


def linear_sigmoid(x, w, b):
    """x: [N, F_in] f32, w: [F_out, F_in] f32 (PyTorch layout), b: [F_out] f32.

    Returns sigmoid(x @ w.T + b), shape [N, F_out].  No wrapper-side layout ops.
    """
    n, f_in = x.shape
    f_out = w.shape[0]

    return pl.pallas_call(
        linear_sigmoid_kernel,
        out_shape=jax.ShapeDtypeStruct((n, f_out), x.dtype),
        in_specs=[
            pl.BlockSpec(memory_space=pltpu.SMEM),   # 9 weight scalars, 1-D SMEM
            pl.BlockSpec(memory_space=pltpu.SMEM),   # 3 bias scalars, 1-D SMEM
            pl.BlockSpec(memory_space=pltpu.VMEM),   # x, full [N, F_in] block
        ],
        out_specs=pl.BlockSpec(memory_space=pltpu.VMEM),
    )(w.reshape(-1), b, x)


def init_linear_params(key, in_features, out_features):
    # Mirror torch.nn.Linear init: uniform(-1/sqrt(in), 1/sqrt(in)).
    k_w, k_b = jax.random.split(key)
    bound = 1.0 / jnp.sqrt(jnp.float32(in_features))
    w = jax.random.uniform(k_w, (out_features, in_features), jnp.float32, -bound, bound)
    b = jax.random.uniform(k_b, (out_features,), jnp.float32, -bound, bound)
    return w, b


if __name__ == "__main__":
    key = jax.random.PRNGKey(0)
    k_x, k_p = jax.random.split(key)

    # Matches the spec's p1 = torch.randn(250, 3)
    x = jax.random.normal(k_x, (250, 3), dtype=jnp.float32)
    w, b = init_linear_params(k_p, in_features=3, out_features=3)

    out = linear_sigmoid(x, w, b)
    jax.block_until_ready(out)

    # Plain-JAX reference (also the XLA-fusion baseline to beat).
    ref = jax.nn.sigmoid(x @ w.T + b)
    assert out.shape == (250, 3)
    assert jnp.allclose(out, ref, atol=1e-6), "mismatch vs reference"

    print("KERNEL_OK")
</pallas_src>

<mosaic_0001>
module attributes {stable_mosaic.version = 11 : i64} {
  func.func @linear_sigmoid_kernel(%arg0: memref<9xf32, #tpu.memory_space<smem>>, %arg1: memref<3xf32, #tpu.memory_space<smem>>, %arg2: memref<250x3xf32, #tpu.memory_space<vmem>>, %arg3: memref<250x3xf32, #tpu.memory_space<vmem>>) attributes {dimension_semantics = [], scalar_prefetch = 0 : i64, scratch_operands = 0 : i64, tpu.core_type = #tpu.core_type<tc>} {
    %c0 = arith.constant 0 : index
    %c0_0 = arith.constant 0 : index
    %0 = vector.load %arg2[%c0, %c0_0] : memref<250x3xf32, #tpu.memory_space<vmem>>, vector<250x3xf32>
    %1 = vector.extract_strided_slice %0 {offsets = [0, 0], sizes = [250, 1], strides = [1, 1]} : vector<250x3xf32> to vector<250x1xf32>
    %2 = vector.extract_strided_slice %0 {offsets = [0, 1], sizes = [250, 1], strides = [1, 1]} : vector<250x3xf32> to vector<250x1xf32>
    %3 = vector.extract_strided_slice %0 {offsets = [0, 2], sizes = [250, 1], strides = [1, 1]} : vector<250x3xf32> to vector<250x1xf32>
    %c0_1 = arith.constant 0 : index
    %4 = memref.load %arg0[%c0_1] : memref<9xf32, #tpu.memory_space<smem>>
    %5 = vector.broadcast %4 : f32 to vector<250x1xf32>
    %6 = arith.mulf %1, %5 : vector<250x1xf32>
    %c1 = arith.constant 1 : index
    %7 = memref.load %arg0[%c1] : memref<9xf32, #tpu.memory_space<smem>>
    %8 = vector.broadcast %7 : f32 to vector<250x1xf32>
    %9 = arith.mulf %2, %8 : vector<250x1xf32>
    %10 = arith.addf %6, %9 : vector<250x1xf32>
    %c2 = arith.constant 2 : index
    %11 = memref.load %arg0[%c2] : memref<9xf32, #tpu.memory_space<smem>>
    %12 = vector.broadcast %11 : f32 to vector<250x1xf32>
    %13 = arith.mulf %3, %12 : vector<250x1xf32>
    %14 = arith.addf %10, %13 : vector<250x1xf32>
    %c0_2 = arith.constant 0 : index
    %15 = memref.load %arg1[%c0_2] : memref<3xf32, #tpu.memory_space<smem>>
    %16 = vector.broadcast %15 : f32 to vector<250x1xf32>
    %17 = arith.addf %14, %16 : vector<250x1xf32>
    %18 = arith.negf %17 : vector<250x1xf32>
    %19 = math.exp %18 : vector<250x1xf32>
    %cst = arith.constant 1.000000e+00 : f32
    %20 = vector.broadcast %cst : f32 to vector<250x1xf32>
    %21 = arith.addf %20, %19 : vector<250x1xf32>
    %22 = arith.divf %20, %21 : vector<250x1xf32>
    %c0_3 = arith.constant 0 : index
    %c0_4 = arith.constant 0 : index
    %23 = vector.load %arg3[%c0_3, %c0_4] : memref<250x3xf32, #tpu.memory_space<vmem>>, vector<250x1xf32>
    tpu.vector_store %arg3[%c0_3, %c0_4], %22 {strides = array<i32>} : memref<250x3xf32, #tpu.memory_space<vmem>>, vector<250x1xf32>,
    %c3 = arith.constant 3 : index
    %24 = memref.load %arg0[%c3] : memref<9xf32, #tpu.memory_space<smem>>
    %25 = vector.broadcast %24 : f32 to vector<250x1xf32>
    %26 = arith.mulf %1, %25 : vector<250x1xf32>
    %c4 = arith.constant 4 : index
    %27 = memref.load %arg0[%c4] : memref<9xf32, #tpu.memory_space<smem>>
    %28 = vector.broadcast %27 : f32 to vector<250x1xf32>
    %29 = arith.mulf %2, %28 : vector<250x1xf32>
    %30 = arith.addf %26, %29 : vector<250x1xf32>
    %c5 = arith.constant 5 : index
    %31 = memref.load %arg0[%c5] : memref<9xf32, #tpu.memory_space<smem>>
    %32 = vector.broadcast %31 : f32 to vector<250x1xf32>
    %33 = arith.mulf %3, %32 : vector<250x1xf32>
    %34 = arith.addf %30, %33 : vector<250x1xf32>
    %c1_5 = arith.constant 1 : index
    %35 = memref.load %arg1[%c1_5] : memref<3xf32, #tpu.memory_space<smem>>
    %36 = vector.broadcast %35 : f32 to vector<250x1xf32>
    %37 = arith.addf %34, %36 : vector<250x1xf32>
    %38 = arith.negf %37 : vector<250x1xf32>
    %39 = math.exp %38 : vector<250x1xf32>
    %cst_6 = arith.constant 1.000000e+00 : f32
    %40 = vector.broadcast %cst_6 : f32 to vector<250x1xf32>
    %41 = arith.addf %40, %39 : vector<250x1xf32>
    %42 = arith.divf %40, %41 : vector<250x1xf32>
    %c0_7 = arith.constant 0 : index
    %c1_8 = arith.constant 1 : index
    %43 = vector.load %arg3[%c0_7, %c1_8] : memref<250x3xf32, #tpu.memory_space<vmem>>, vector<250x1xf32>
    tpu.vector_store %arg3[%c0_7, %c1_8], %42 {strides = array<i32>} : memref<250x3xf32, #tpu.memory_space<vmem>>, vector<250x1xf32>,
    %c6 = arith.constant 6 : index
    %44 = memref.load %arg0[%c6] : memref<9xf32, #tpu.memory_space<smem>>
    %45 = vector.broadcast %44 : f32 to vector<250x1xf32>
    %46 = arith.mulf %1, %45 : vector<250x1xf32>
    %c7 = arith.constant 7 : index
    %47 = memref.load %arg0[%c7] : memref<9xf32, #tpu.memory_space<smem>>
    %48 = vector.broadcast %47 : f32 to vector<250x1xf32>
    %49 = arith.mulf %2, %48 : vector<250x1xf32>
    %50 = arith.addf %46, %49 : vector<250x1xf32>
    %c8 = arith.constant 8 : index
    %51 = memref.load %arg0[%c8] : memref<9xf32, #tpu.memory_space<smem>>
    %52 = vector.broadcast %51 : f32 to vector<250x1xf32>
    %53 = arith.mulf %3, %52 : vector<250x1xf32>
    %54 = arith.addf %50, %53 : vector<250x1xf32>
    %c2_9 = arith.constant 2 : index
    %55 = memref.load %arg1[%c2_9] : memref<3xf32, #tpu.memory_space<smem>>
    %56 = vector.broadcast %55 : f32 to vector<250x1xf32>
    %57 = arith.addf %54, %56 : vector<250x1xf32>
    %58 = arith.negf %57 : vector<250x1xf32>
    %59 = math.exp %58 : vector<250x1xf32>
    %cst_10 = arith.constant 1.000000e+00 : f32
    %60 = vector.broadcast %cst_10 : f32 to vector<250x1xf32>
    %61 = arith.addf %60, %59 : vector<250x1xf32>
    %62 = arith.divf %60, %61 : vector<250x1xf32>
    %c0_11 = arith.constant 0 : index
    %c2_12 = arith.constant 2 : index
    %63 = vector.load %arg3[%c0_11, %c2_12] : memref<250x3xf32, #tpu.memory_space<vmem>>, vector<250x1xf32>
    tpu.vector_store %arg3[%c0_11, %c2_12], %62 {strides = array<i32>} : memref<250x3xf32, #tpu.memory_space<vmem>>, vector<250x1xf32>,
    return
  }
}

</mosaic_0001>

<bundles_post_ra>
// kernel: tpu_custom_call.1
= control target key start
LH: loop header
LB: loop body
LE: loop exit
PB: predicated region body
PF: predicated region fallthrough
CT: control target
= control target key end

     0   :  { %8 = vsyncpa [#allocation3], 0  ;;  %s8544_s0 = inlined_call_operand.vmem [shape: f32[9], index: 0, kind: input, shape index: {}]   ;;  %s8545_s1 = inlined_call_operand.vmem [shape: f32[3], index: 1, kind: input, shape index: {}]   ;;  %s8546_s2 = inlined_call_operand.vmem [shape: f32[250,3], index: 2, kind: input, shape index: {}]   ;;  %s8547_s3 = inlined_call_operand.vmem [shape: f32[250,3], index: 3, kind: output, shape index: {}]  }
   0x1   :  { %s15_s14 = sshll.u32 %s8544_s0, 4  ;;  %s16_s14 = int_to_ptr.vmem [resolvable:$true] %s15_s14 }
   0x2   :  { %9 = vsyncpa [#allocation5], 0  ;;  %s24_s17 = sshll.u32 %s8545_s1, 4  ;;  %s4214_s18 = smov [#allocation2]   ;;  %s25_s17 = int_to_ptr.vmem [resolvable:$true] %s24_s17 }
   0x3   :  { %18 = dma.vmem_to_smem %s16_s14, 16, %s4214_s18, [#allocation3]  }
   0x4   :  { %s4215_s19 = smov [#allocation4]  }
   0x5   :  { %27 = dma.vmem_to_smem %s25_s17, 16, %s4215_s19, [#allocation5]  }
   0x6   :  { %4210 = dma.done.wait [#allocation3], 16  }
   0x7   :  { %4211 = vsyncadd [#allocation3], 4294967280 }
   0x8   :  { %4212 = dma.done.wait [#allocation5], 16  }
   0x9   :  { %4213 = vsyncadd [#allocation5], 4294967280 }
   0xa   :  { %38 = sfence }
   0xb   :  { %s3627_s20 = sld [smem:[#allocation2 + $0x1]]  ;;  %v4249_v0 = vld [vmem:[%s8546_s2 + $0x20] sm:$0xff]  ;;  %v4254_v1 = vld [vmem:[%s8546_s2 + $0x10] sm:$0xff]  ;;  %s4216_s25 = smov 127   ;;  %v4275_v7 = vld [vmem:[%s8546_s2 + $0x28] sm:$0xff]  ;;  %vm1135_vm3 = vcmask 7168  }
   0xc   :  { %8608 = vst [vmem:[#allocation8_spill] sm:$0xff] %v4254_v1  ;;  %v4259_v2 = vld [vmem:[%s8546_s2] sm:$0xff]  ;;  %v4280_v8 = vld [vmem:[%s8546_s2 + $0x18] sm:$0xff]  ;;  %v4285_v9 = vld [vmem:[%s8546_s2 + $0x8] sm:$0xff]  ;;  %s3628_s0 = sld [smem:[#allocation2 + $0x2]]  ;;  %s4217_s29 = smov 126  }
   0xd   :  { %8609 = vst [vmem:[#allocation9_spill] sm:$0xff] %v4259_v2  ;;  %v4299_v13 = vld [vmem:[%s8546_s2 + $0x40] sm:$0xff]  ;;  %v4304_v14 = vld [vmem:[%s8546_s2 + $0x38] sm:$0xff]  ;;  %v4309_v15 = vld [vmem:[%s8546_s2 + $0x30] sm:$0xff]  ;;  %s3662_s30 = sld [smem:[#allocation2 + $0x4]]  ;;  %s4218_s21 = smov 1  }
   0xe   :  { %8610 = vst [vmem:[#allocation10_spill] sm:$0xff] %v4275_v7  ;;  %v4323_v19 = vld [vmem:[%s8546_s2 + $0x58] sm:$0xff]  ;;  %v4328_v20 = vld [vmem:[%s8546_s2 + $0x50] sm:$0xff]  ;;  %v4333_v21 = vld [vmem:[%s8546_s2 + $0x48] sm:$0xff]  ;;  %s71_s4 = sld [smem:[#allocation2]] }
   0xf   :  { %8611 = vst [vmem:[#allocation11_spill] sm:$0xff] %v4285_v9  ;;  %v4347_v25 = vld [vmem:[%s8546_s2 + $0x70] sm:$0xff]  ;;  %v4352_v26 = vld [vmem:[%s8546_s2 + $0x68] sm:$0xff]  ;;  %v4357_v27 = vld [vmem:[%s8546_s2 + $0x60] sm:$0xff]  ;;  %s493_s5 = sld [smem:[#allocation4]] }
  0x10   :  { %v4371_v31 = vld [vmem:[%s8546_s2 + $0x88] sm:$0xff]  ;;  %v4376_v32 = vld [vmem:[%s8546_s2 + $0x80] sm:$0xff]  ;;  %v4381_v33 = vld [vmem:[%s8546_s2 + $0x78] sm:$0xff]  ;;  %s4964_s6 = sld [smem:[#allocation2 + $0x5]] }
  0x11   :  { %v4261_v3 = vstv %s3627_s20  ;;  %v4395_v37 = vld [vmem:[%s8546_s2 + $0xa0] sm:$0xff]  ;;  %v4400_v38 = vld [vmem:[%s8546_s2 + $0x98] sm:$0xff]  ;;  %v4405_v39 = vld [vmem:[%s8546_s2 + $0x90] sm:$0xff]  ;;  %s4982_s9 = sld [smem:[#allocation2 + $0x3]] }
  0x12   :  { %v111_v4 = vmul.f32 %v4261_v3, %v4249_v0  ;;  %v109_v5 = vmul.f32 %v4261_v3, %v4254_v1  ;;  %v107_v6 = vmul.f32 %v4261_v3, %v4259_v2  ;;  %v112_v10 = vmul.f32 %v4261_v3, %v4275_v7  ;;  %v4419_v43 = vld [vmem:[%s8546_s2 + $0xb8] sm:$0xff]  ;;  %v4424_v44 = vld [vmem:[%s8546_s2 + $0xb0] sm:$0xff]  ;;  %v4429_v45 = vld [vmem:[%s8546_s2 + $0xa8] sm:$0xff]  ;;  %s5881_s13 = sld [smem:[#allocation4 + $0x1]] }
  0x13   :  { %v110_v11 = vmul.f32 %v4261_v3, %v4280_v8  ;;  %v108_v12 = vmul.f32 %v4261_v3, %v4285_v9  ;;  %v115_v16 = vmul.f32 %v4261_v3, %v4299_v13  ;;  %v114_v17 = vmul.f32 %v4261_v3, %v4304_v14  ;;  %v4443_v49 = vld [vmem:[%s8546_s2 + $0xd0] sm:$0xff]  ;;  %v4448_v50 = vld [vmem:[%s8546_s2 + $0xc8] sm:$0xff]  ;;  %v4453_v51 = vld [vmem:[%s8546_s2 + $0xc0] sm:$0xff]  ;;  %s6862_s23 = sld [smem:[#allocation2 + $0x7]] }
  0x14   :  { %179 = vrot.lane.b32.xlu2 %v111_v4, %s4216_s25  ;;  %175 = vrot.lane.b32.xlu1 %v109_v5, %s4216_s25  ;;  %v113_v18 = vmul.f32 %v4261_v3, %v4309_v15  ;;  %v118_v22 = vmul.f32 %v4261_v3, %v4323_v19  ;;  %v117_v23 = vmul.f32 %v4261_v3, %v4328_v20  ;;  %v4467_v55 = vld [vmem:[%s8546_s2 + $0xe8] sm:$0xff]  ;;  %v4472_v56 = vld [vmem:[%s8546_s2 + $0xe0] sm:$0xff]  ;;  %s3697_s22 = sld [smem:[#allocation2 + $0x6]] }
  0x15   :  { %171 = vrot.lane.b32.xlu0 %v107_v6, %s4216_s25  ;;  %v116_v24 = vmul.f32 %v4261_v3, %v4333_v21  ;;  %v121_v28 = vmul.f32 %v4261_v3, %v4347_v25  ;;  %v120_v29 = vmul.f32 %v4261_v3, %v4352_v26  ;;  %v119_v30 = vmul.f32 %v4261_v3, %v4357_v27  ;;  %v4477_v57 = vld [vmem:[%s8546_s2 + $0xd8] sm:$0xff]  ;;  %v4498_v63 = vld [vmem:[%s8546_s2 + $0xf0] sm:$0xff] }
  0x16   :  { %v124_v34 = vmul.f32 %v4261_v3, %v4371_v31  ;;  %v123_v35 = vmul.f32 %v4261_v3, %v4376_v32  ;;  %v122_v36 = vmul.f32 %v4261_v3, %v4381_v33  ;;  %v127_v40 = vmul.f32 %v4261_v3, %v4395_v37  ;;  %v4491_v61 = vld [vmem:[%s8546_s2 + $0xf8] sm:$0x3]  ;;  %8613 = vst [vmem:[#allocation13_spill] sm:$0xff] %v4498_v63 }
  0x17   :  { %v126_v41 = vmul.f32 %v4261_v3, %v4400_v38  ;;  %v125_v42 = vmul.f32 %v4261_v3, %v4405_v39  ;;  %v130_v46 = vmul.f32 %v4261_v3, %v4419_v43  ;;  %v129_v47 = vmul.f32 %v4261_v3, %v4424_v44  ;;  %8612 = vst [vmem:[#allocation12_spill] sm:$0xff] %v4491_v61 }
  0x18   :  { %v128_v48 = vmul.f32 %v4261_v3, %v4429_v45  ;;  %v133_v52 = vmul.f32 %v4261_v3, %v4443_v49  ;;  %v132_v53 = vmul.f32 %v4261_v3, %v4448_v50  ;;  %v131_v54 = vmul.f32 %v4261_v3, %v4453_v51 }
  0x19   :  { %v136_v58 = vmul.f32 %v4261_v3, %v4467_v55  ;;  %v135_v59 = vmul.f32 %v4261_v3, %v4472_v56  ;;  %v134_v60 = vmul.f32 %v4261_v3, %v4477_v57  ;;  %v4493_v62 = vstv %s3628_s0  ;;  %s3700_s0 = sld [smem:[#allocation4 + $0x2]] }
  0x1a   :  { %v138_v4 = vmul.f32 %v4261_v3, %v4491_v61  ;;  %v301_v5 = vmul.f32 %v4493_v62, %v4259_v2  ;;  %v137_v6 = vmul.f32 %v4261_v3, %v4498_v63 }
  0x1c   :  { %181 = vrot.lane.b32.xlu2 %v112_v10, %s4216_s25  ;;  %177 = vrot.lane.b32.xlu1 %v110_v11, %s4216_s25  ;;  %v303_v10 = vmul.f32 %v4493_v62, %v4254_v1  ;;  %v304_v11 = vmul.f32 %v4493_v62, %v4280_v8 }
  0x1d   :  { %173 = vrot.lane.b32.xlu0 %v108_v12, %s4216_s25  ;;  %v302_v12 = vmul.f32 %v4493_v62, %v4285_v9 }
  0x24   :  { %187 = vrot.lane.b32.xlu2 %v115_v16, %s4216_s25  ;;  %185 = vrot.lane.b32.xlu1 %v114_v17, %s4216_s25  ;;  %v306_v16 = vmul.f32 %v4493_v62, %v4275_v7  ;;  %v307_v17 = vmul.f32 %v4493_v62, %v4309_v15 }
  0x25   :  { %183 = vrot.lane.b32.xlu0 %v113_v18, %s4216_s25  ;;  %v305_v18 = vmul.f32 %v4493_v62, %v4249_v0 }
  0x2c   :  { %193 = vrot.lane.b32.xlu2 %v118_v22, %s4216_s25  ;;  %191 = vrot.lane.b32.xlu1 %v117_v23, %s4216_s25  ;;  %v309_v23 = vmul.f32 %v4493_v62, %v4299_v13 }
  0x2d   :  { %189 = vrot.lane.b32.xlu0 %v116_v24, %s4216_s25  ;;  %v310_v24 = vmul.f32 %v4493_v62, %v4333_v21 }
  0x34   :  { %199 = vrot.lane.b32.xlu2 %v121_v28, %s4216_s25  ;;  %197 = vrot.lane.b32.xlu1 %v120_v29, %s4216_s25  ;;  %v308_v28 = vmul.f32 %v4493_v62, %v4304_v14 }
  0x35   :  { %195 = vrot.lane.b32.xlu0 %v119_v30, %s4216_s25  ;;  %v312_v30 = vmul.f32 %v4493_v62, %v4323_v19 }
  0x3c   :  { %205 = vrot.lane.b32.xlu2 %v124_v34, %s4216_s25  ;;  %203 = vrot.lane.b32.xlu1 %v123_v35, %s4216_s25  ;;  %v313_v34 = vmul.f32 %v4493_v62, %v4357_v27  ;;  %v311_v35 = vmul.f32 %v4493_v62, %v4328_v20 }
  0x3d   :  { %201 = vrot.lane.b32.xlu0 %v122_v36, %s4216_s25 }
  0x44   :  { %211 = vrot.lane.b32.xlu2 %v127_v40, %s4216_s25  ;;  %209 = vrot.lane.b32.xlu1 %v126_v41, %s4216_s25 }
  0x45   :  { %207 = vrot.lane.b32.xlu0 %v125_v42, %s4216_s25  ;;  %v315_v42 = vmul.f32 %v4493_v62, %v4347_v25 }
  0x4c   :  { %217 = vrot.lane.b32.xlu2 %v130_v46, %s4216_s25  ;;  %215 = vrot.lane.b32.xlu1 %v129_v47, %s4216_s25  ;;  %v316_v46 = vmul.f32 %v4493_v62, %v4381_v33  ;;  %v314_v47 = vmul.f32 %v4493_v62, %v4352_v26 }
  0x4d   :  { %213 = vrot.lane.b32.xlu0 %v128_v48, %s4216_s25 }
  0x54   :  { %223 = vrot.lane.b32.xlu2 %v133_v52, %s4216_s25  ;;  %221 = vrot.lane.b32.xlu1 %v132_v53, %s4216_s25 }
  0x55   :  { %219 = vrot.lane.b32.xlu0 %v131_v54, %s4216_s25  ;;  %v318_v54 = vmul.f32 %v4493_v62, %v4371_v31 }
  0x5c   :  { %229 = vrot.lane.b32.xlu2 %v136_v58, %s4216_s25  ;;  %227 = vrot.lane.b32.xlu1 %v135_v59, %s4216_s25  ;;  %v319_v58 = vmul.f32 %v4493_v62, %v4405_v39  ;;  %v317_v59 = vmul.f32 %v4493_v62, %v4376_v32 }
  0x5d   :  { %225 = vrot.lane.b32.xlu0 %v134_v60, %s4216_s25 }
  0x64   :  { %233 = vrot.lane.b32.xlu1 %v138_v4, %s4216_s25  ;;  %365 = vrot.lane.b32.xlu2 %v301_v5, %s4217_s29 }
  0x65   :  { %231 = vrot.lane.b32.xlu0 %v137_v6, %s4216_s25  ;;  %v321_v6 = vmul.f32 %v4493_v62, %v4395_v37 }
  0x6c   :  { %369 = vrot.lane.b32.xlu1 %v303_v10, %s4217_s29  ;;  %371 = vrot.lane.b32.xlu2 %v304_v11, %s4217_s29  ;;  %v322_v10 = vmul.f32 %v4493_v62, %v4429_v45  ;;  %v320_v11 = vmul.f32 %v4493_v62, %v4400_v38 }
  0x6d   :  { %367 = vrot.lane.b32.xlu0 %v302_v12, %s4217_s29 }
  0x6e   :  { %v4518_v3 = vpop.permute.xlu2 %179 }
  0x74   :  { %375 = vrot.lane.b32.xlu1 %v306_v16, %s4217_s29  ;;  %377 = vrot.lane.b32.xlu2 %v307_v17, %s4217_s29 }
  0x75   :  { %373 = vrot.lane.b32.xlu0 %v305_v18, %s4217_s29  ;;  %v324_v18 = vmul.f32 %v4493_v62, %v4419_v43 }
  0x76   :  { %v4529_v22 = vpop.permute.xlu2 %181 }
  0x7c   :  { %381 = vrot.lane.b32.xlu1 %v309_v23, %s4217_s29  ;;  %383 = vrot.lane.b32.xlu2 %v310_v24, %s4217_s29  ;;  %v325_v23 = vmul.f32 %v4493_v62, %v4453_v51  ;;  %v323_v24 = vmul.f32 %v4493_v62, %v4424_v44 }
  0x7d   :  { %379 = vrot.lane.b32.xlu0 %v308_v28, %s4217_s29 }
  0x7e   :  { %v4540_v29 = vpop.permute.xlu2 %187 }
  0x84   :  { %387 = vrot.lane.b32.xlu1 %v312_v30, %s4217_s29  ;;  %389 = vrot.lane.b32.xlu2 %v313_v34, %s4217_s29 }
  0x85   :  { %385 = vrot.lane.b32.xlu0 %v311_v35, %s4217_s29  ;;  %v327_v35 = vmul.f32 %v4493_v62, %v4443_v49 }
  0x86   :  { %v4551_v36 = vpop.permute.xlu2 %193  ;;  %v4553_v40 = vpop.permute.xlu1 %175 }
  0x87   :  { %v4555_v41 = vpop.permute.xlu0 %171 }
  0x8c   :  { %393 = vrot.lane.b32.xlu1 %v315_v42, %s4217_s29  ;;  %395 = vrot.lane.b32.xlu2 %v316_v46, %s4217_s29  ;;  %v328_v42 = vmul.f32 %v4493_v62, %v4477_v57  ;;  %v326_v46 = vmul.f32 %v4493_v62, %v4448_v50 }
  0x8d   :  { %391 = vrot.lane.b32.xlu0 %v314_v47, %s4217_s29 }
  0x8e   :  { %v4566_v48 = vpop.permute.xlu2 %199  ;;  %v4568_v52 = vpop.permute.xlu1 %177 }
  0x8f   :  { %v4570_v53 = vpop.permute.xlu0 %173 }
  0x94   :  { %399 = vrot.lane.b32.xlu1 %v318_v54, %s4217_s29  ;;  %401 = vrot.lane.b32.xlu2 %v319_v58, %s4217_s29 }
  0x95   :  { %397 = vrot.lane.b32.xlu0 %v317_v59, %s4217_s29  ;;  %v330_v59 = vmul.f32 %v4493_v62, %v4467_v55 }
  0x96   :  { %v4581_v60 = vpop.permute.xlu2 %205  ;;  %v4583_v4 = vpop.permute.xlu1 %185 }
  0x97   :  { %v4585_v5 = vpop.permute.xlu0 %183 }
  0x9c   :  { %405 = vrot.lane.b32.xlu1 %v321_v6, %s4217_s29  ;;  %407 = vrot.lane.b32.xlu2 %v322_v10, %s4217_s29  ;;  %v331_v6 = vmul.f32 %v4493_v62, %v4498_v63  ;;  %v329_v10 = vmul.f32 %v4493_v62, %v4472_v56 }
  0x9d   :  { %403 = vrot.lane.b32.xlu0 %v320_v11, %s4217_s29  ;;  %v4641_v11 = vstv %s3662_s30 }
  0x9e   :  { %v4596_v12 = vpop.permute.xlu2 %211  ;;  %v4598_v16 = vpop.permute.xlu1 %191 }
  0x9f   :  { %v4600_v17 = vpop.permute.xlu0 %189 }
  0xa4   :  { %411 = vrot.lane.b32.xlu1 %v324_v18, %s4217_s29  ;;  %413 = vrot.lane.b32.xlu2 %v325_v23, %s4217_s29 }
  0xa5   :  { %409 = vrot.lane.b32.xlu0 %v323_v24, %s4217_s29 }
  0xa6   :  { %v4611_v28 = vpop.permute.xlu2 %217  ;;  %v4613_v30 = vpop.permute.xlu1 %197 }
  0xa7   :  { %v4615_v34 = vpop.permute.xlu0 %195 }
  0xac   :  { %417 = vrot.lane.b32.xlu1 %v327_v35, %s4217_s29  ;;  %419 = vrot.lane.b32.xlu2 %v328_v42, %s4217_s29  ;;  %v1205_v35 = vmul.f32 %v4641_v11, %v4259_v2  ;;  %v1206_v42 = vmul.f32 %v4641_v11, %v4285_v9 }
  0xad   :  { %415 = vrot.lane.b32.xlu0 %v326_v46, %s4217_s29  ;;  %v332_v46 = vmul.f32 %v4493_v62, %v4491_v61  ;;  %v1209_v62 = vmul.f32 %v4641_v11, %v4249_v0  ;;  %v4680_v61 = vstv %s493_s5 }
  0xae   :  { %v4626_v47 = vpop.permute.xlu2 %223  ;;  %v4628_v54 = vpop.permute.xlu1 %203 }
  0xaf   :  { %v4630_v58 = vpop.permute.xlu0 %201 }
  0xb0   :  { %8614 = vst [vmem:[#allocation14_spill] sm:$0xff] %v4630_v58 }
  0xb4   :  { %423 = vrot.lane.b32.xlu1 %v330_v59, %s4217_s29  ;;  %425 = vrot.lane.b32.xlu2 %v331_v6, %s4217_s29 }
  0xb5   :  { %421 = vrot.lane.b32.xlu0 %v329_v10, %s4217_s29 }
  0xb6   :  { %v4643_v18 = vpop.permute.xlu2 %229  ;;  %v4645_v23 = vpop.permute.xlu1 %209 }
  0xb7   :  { %8615 = vst [vmem:[#allocation15_spill] sm:$0xff] %v4643_v18  ;;  %v4647_v24 = vpop.permute.xlu0 %207 }
  0xb8   :  { %8616 = vst [vmem:[#allocation16_spill] sm:$0xff] %v4645_v23  ;;  %v1208_v23 = vmul.f32 %v4641_v11, %v4280_v8 }
  0xb9   :  { %8617 = vst [vmem:[#allocation17_spill] sm:$0xff] %v4647_v24  ;;  %v4662_v24 = vstv %s71_s4 }
  0xbc   :  { %1269 = vrot.lane.b32.xlu1 %v1205_v35, %s4216_s25  ;;  %1271 = vrot.lane.b32.xlu2 %v1206_v42, %s4216_s25  ;;  %v73_v35 = vmul.f32 %v4662_v24, %v4259_v2  ;;  %v1207_v42 = vmul.f32 %v4641_v11, %v4254_v1  ;;  %v1211_v2 = vmul.f32 %v4641_v11, %v4309_v15 }
  0xbd   :  { %427 = vrot.lane.b32.xlu0 %v332_v46, %s4217_s29 }
  0xbe   :  { %v4658_v59 = vpop.permute.xlu1 %215  ;;  %v366_v6 = vpop.permute.xlu2 %365  ;;  %v267_v46 = vadd.f32 %v4555_v41, %v73_v35  ;;  %v1210_v41 = vmul.f32 %v4641_v11, %v4275_v7 }
  0xbf   :  { %8618 = vst [vmem:[#allocation18_spill] sm:$0xff] %v4658_v59  ;;  %v4660_v10 = vpop.permute.xlu0 %213 }
  0xc0   :  { %8619 = vst [vmem:[#allocation19_spill] sm:$0xff] %v4660_v10  ;;  %v461_v63 = vadd.f32 %v366_v6, %v267_v46 }
  0xc2   :  { %v495_v35 = vadd.f32 %v4680_v61, %v461_v63  ;;  %v1214_v63 = vmul.f32 %v4641_v11, %v4333_v21 }
  0xc4   :  { %1275 = vrot.lane.b32.xlu1 %v1208_v23, %s4216_s25  ;;  %1277 = vrot.lane.b32.xlu2 %v1209_v62, %s4216_s25  ;;  %v1212_v23 = vmul.f32 %v4641_v11, %v4304_v14  ;;  %v76_v62 = vmul.f32 %v4662_v24, %v4280_v8  ;;  %v3629_v8 = vmul.f32 -1.442695, %v495_v35  ;;  %v82_v35 = vmul.f32 %v4662_v24, %v4333_v21 }
  0xc5   :  { %1273 = vrot.lane.b32.xlu0 %v1207_v42, %s4216_s25  ;;  %v79_v42 = vmul.f32 %v4662_v24, %v4309_v15  ;;  %v78_v15 = vmul.f32 %v4662_v24, %v4275_v7  ;;  %v75_v7 = vmul.f32 %v4662_v24, %v4254_v1  ;;  %v1217_v1 = vmul.f32 %v4641_v11, %v4357_v27 }
  0xc6   :  { %v4676_v10 = vpop.permute.xlu1 %221  ;;  %v372_v59 = vpop.permute.xlu2 %371  ;;  %v270_v6 = vadd.f32 %v4568_v52, %v76_v62  ;;  %v77_v52 = vmul.f32 %v4662_v24, %v4249_v0  ;;  %v1213_v62 = vmul.f32 %v4641_v11, %v4299_v13  ;;  %3739 = vpow2.f32 %v3629_v8 }
  0xc7   :  { %8620 = vst [vmem:[#allocation20_spill] sm:$0xff] %v4676_v10  ;;  %v4678_v18 = vpop.permute.xlu0 %219  ;;  %v4731_v21 = vadd.f32 %v4529_v22, %v78_v15  ;;  %v96_v22 = vmul.f32 %v4662_v24, %v4419_v43  ;;  %v276_v15 = vadd.f32 %v4600_v17, %v82_v35  ;;  %v1218_v17 = vmul.f32 %v4641_v11, %v4352_v26 }
  0xc8   :  { %8621 = vst [vmem:[#allocation21_spill] sm:$0xff] %v4678_v18  ;;  %v464_v10 = vadd.f32 %v372_v59, %v270_v6  ;;  %v81_v59 = vmul.f32 %v4662_v24, %v4299_v13  ;;  %v4728_v13 = vadd.f32 %v4518_v3, %v77_v52  ;;  %v83_v3 = vmul.f32 %v4662_v24, %v4328_v20 }
  0xca   :  { %v498_v0 = vadd.f32 %v4680_v61, %v464_v10  ;;  %v80_v10 = vmul.f32 %v4662_v24, %v4304_v14  ;;  %v4739_v8 = vadd.f32 %v4540_v29, %v81_v59  ;;  %v86_v14 = vmul.f32 %v4662_v24, %v4352_v26 }
  0xcb   :  { %v88_v26 = vmul.f32 %v4662_v24, %v4381_v33 }
  0xcc   :  { %1281 = vrot.lane.b32.xlu1 %v1211_v2, %s4216_s25  ;;  %1283 = vrot.lane.b32.xlu2 %v1212_v23, %s4216_s25  ;;  %v1215_v2 = vmul.f32 %v4641_v11, %v4328_v20  ;;  %v273_v23 = vadd.f32 %v4585_v5, %v79_v42  ;;  %v87_v5 = vmul.f32 %v4662_v24, %v4347_v25  ;;  %v3740_v35 = vpop.eup %3739 }
  0xcd   :  { %1279 = vrot.lane.b32.xlu0 %v1210_v41, %s4216_s25  ;;  %v84_v41 = vmul.f32 %v4662_v24, %v4323_v19  ;;  %v74_v42 = vmul.f32 %v4662_v24, %v4285_v9  ;;  %v85_v20 = vmul.f32 %v4662_v24, %v4357_v27  ;;  %v269_v9 = vadd.f32 %v4553_v40, %v75_v7 }
  0xce   :  { %v4697_v46 = vpop.permute.xlu1 %227  ;;  %v378_v18 = vpop.permute.xlu2 %377  ;;  %v89_v27 = vmul.f32 %v4662_v24, %v4376_v32  ;;  %v102_v7 = vmul.f32 %v4662_v24, %v4467_v55  ;;  %v92_v40 = vmul.f32 %v4662_v24, %v4400_v38 }
  0xcf   :  { %v4699_v58 = vpop.permute.xlu0 %225  ;;  %v467_v6 = vadd.f32 %v378_v18, %v273_v23  ;;  %v90_v18 = vmul.f32 %v4662_v24, %v4371_v31  ;;  %v3632_v23 = vmul.f32 -1.442695, %v498_v0  ;;  %v4756_v59 = vadd.f32 %v4551_v36, %v84_v41 }
  0xd0   :  { %v99_v0 = vmul.f32 %v4662_v24, %v4443_v49  ;;  %v1216_v36 = vmul.f32 %v4641_v11, %v4323_v19  ;;  %v4770_v41 = vadd.f32 %v4566_v48, %v87_v5  ;;  %v4785_v48 = vadd.f32 %v4583_v4, %v80_v10 }
  0xd1   :  { %v501_v29 = vadd.f32 %v4680_v61, %v467_v6  ;;  %8622 = vst [vmem:[#allocation22_spill] sm:$0xff] %v4756_v59  ;;  %v268_v59 = vadd.f32 %v4570_v53, %v74_v42  ;;  %3741 = vpow2.f32 %v3632_v23  ;;  %v4782_v19 = vadd.f32 %v4581_v60, %v90_v18 }
  0xd2   :  { %v91_v53 = vmul.f32 %v4662_v24, %v4405_v39  ;;  %v4789_v5 = vadd.f32 1.0, %v3740_v35  ;;  %v94_v60 = vmul.f32 %v4662_v24, %v4429_v45  ;;  %v4803_v18 = vadd.f32 %v4598_v16, %v83_v3 }
  0xd3   :  { %8623 = vst [vmem:[#allocation23_spill] sm:$0xff] %v4782_v19  ;;  %v97_v10 = vmul.f32 %v4662_v24, %v4453_v51  ;;  %v1220_v3 = vmul.f32 %v4641_v11, %v4381_v33  ;;  %v8630_v19 = vld [vmem:[#allocation13_spill] sm:$0xff] }
  0xd4   :  { %1287 = vrot.lane.b32.xlu1 %v1214_v63, %s4216_s25  ;;  %1289 = vrot.lane.b32.xlu2 %v1215_v2, %s4216_s25  ;;  %v93_v63 = vmul.f32 %v4662_v24, %v4395_v37  ;;  %vm660_vm0 = vweird.f32 %v4789_v5 }
  0xd5   :  { %1285 = vrot.lane.b32.xlu0 %v1213_v62, %s4216_s25 }
  0xd6   :  { %v4747_v2 = vpop.permute.xlu1 %233  ;;  %v384_v52 = vpop.permute.xlu2 %383  ;;  %v4794_v42 = vadd.f32 %v4596_v12, %v93_v63  ;;  %v98_v12 = vmul.f32 %v4662_v24, %v4448_v50 }
  0xd7   :  { %v4753_v62 = vpop.permute.xlu0 %231  ;;  %v470_v6 = vadd.f32 %v384_v52, %v276_v15  ;;  %v3635_v52 = vmul.f32 -1.442695, %v501_v29  ;;  %v95_v15 = vmul.f32 %v4662_v24, %v4424_v44  ;;  %v4813_v29 = vadd.f32 %v4613_v30, %v86_v14 }
  0xd8   :  { %8624 = vst [vmem:[#allocation24_spill] sm:$0xff] %v4794_v42  ;;  %v100_v30 = vmul.f32 %v4662_v24, %v4477_v57 }
  0xd9   :  { %v504_v4 = vadd.f32 %v4680_v61, %v470_v6  ;;  %3743 = vpow2.f32 %v3635_v52  ;;  %v3742_v6 = vpop.eup %3741  ;;  %v8627_v52 = vld [vmem:[#allocation14_spill] sm:$0xff] }
  0xda   :  { %3745 = vrcp.f32 %v4789_v5  ;;  %v282_v33 = vadd.f32 %v8627_v52, %v88_v26  ;;  %v4849_v26 = vadd.f32 1.0, %v3742_v6 }
  0xdb   :  { %v3638_v14 = vmul.f32 -1.442695, %v504_v4  ;;  %v103_v4 = vmul.f32 %v4662_v24, %v8630_v19 }
  0xdc   :  { %1293 = vrot.lane.b32.xlu1 %v1217_v1, %s4216_s25  ;;  %1295 = vrot.lane.b32.xlu2 %v1218_v17, %s4216_s25  ;;  %v4806_v1 = vadd.f32 %v4611_v28, %v96_v22  ;;  %v279_v17 = vadd.f32 %v4615_v34, %v85_v20  ;;  %v101_v28 = vmul.f32 %v4662_v24, %v4472_v56  ;;  %vm705_vm5 = vweird.f32 %v4849_v26 }
  0xdd   :  { %1291 = vrot.lane.b32.xlu0 %v1216_v36, %s4216_s25  ;;  %v1221_v22 = vmul.f32 %v4641_v11, %v4376_v32  ;;  %v4828_v20 = vadd.f32 %v4626_v47, %v99_v0  ;;  %v4831_v36 = vadd.f32 %v4628_v54, %v89_v27  ;;  %v8632_v0 = vld [vmem:[#allocation17_spill] sm:$0xff]  ;;  %v8633_v27 = vld [vmem:[#allocation18_spill] sm:$0xff]  ;;  %3747 = vpow2.f32 %v3638_v14 }
  0xde   :  { %8625 = vst [vmem:[#allocation25_spill] sm:$0xff] %v4806_v1  ;;  %v370_v63 = vpop.permute.xlu1 %369  ;;  %v390_v23 = vpop.permute.xlu2 %389  ;;  %v8629_v1 = vld [vmem:[#allocation15_spill] sm:$0xff]  ;;  %v285_v54 = vadd.f32 %v8632_v0, %v91_v53  ;;  %v4874_v14 = vadd.f32 %v4699_v58, %v100_v30  ;;  %3749 = vrcp.f32 %v4849_v26 }
  0xdf   :  { %v463_v35 = vadd.f32 %v370_v63, %v269_v9  ;;  %v368_v16 = vpop.permute.xlu0 %367  ;;  %v473_v34 = vadd.f32 %v390_v23, %v279_v17  ;;  %v1219_v9 = vmul.f32 %v4641_v11, %v4347_v25  ;;  %8626 = vst [vmem:[#allocation26_spill] sm:$0xff] %v4828_v20  ;;  %v8628_v63 = vld [vmem:[#allocation12_spill] sm:$0xff]  ;;  %v4837_v42 = vadd.f32 %v8629_v1, %v102_v7  ;;  %v3744_v7 = vpop.eup %3743  ;;  %v8634_v1 = vld [vmem:[#allocation19_spill] sm:$0xff] }
  0xe0   :  { %v104_v32 = vmul.f32 %v4662_v24, %v8628_v63  ;;  %v462_v25 = vadd.f32 %v368_v16, %v268_v59  ;;  %v8631_v17 = vld [vmem:[#allocation16_spill] sm:$0xff]  ;;  %v4847_v20 = vadd.f32 %v8633_v27, %v95_v15  ;;  %v4854_v24 = vadd.f32 %v8634_v1, %v94_v60  ;;  %v4861_v53 = vpop.eup %3745  ;;  %v8636_v15 = vld [vmem:[#allocation21_spill] sm:$0xff] }
  0xe1   :  { %v497_v23 = vadd.f32 %v4680_v61, %v463_v35  ;;  %v4843_v47 = vadd.f32 %v8631_v17, %v92_v40  ;;  %v8635_v35 = vld [vmem:[#allocation20_spill] sm:$0xff]  ;;  %v507_v40 = vadd.f32 %v4680_v61, %v473_v34  ;;  %v4864_v16 = vadd.f32 %v8636_v15, %v97_v10 }
  0xe2   :  { %v4857_v59 = vadd.f32 %v8635_v35, %v98_v12  ;;  %v1223_v60 = vmul.f32 %v4641_v11, %v4405_v39  ;;  %v1224_v12 = vmul.f32 %v4641_v11, %v4400_v38  ;;  %v1222_v39 = vmul.f32 %v4641_v11, %v4371_v31 }
  0xe3   :  { %v3631_v34 = vmul.f32 -1.442695, %v497_v23  ;;  %v3641_v38 = vmul.f32 -1.442695, %v507_v40  ;;  %v656_v23 = vmul.f32 %v4861_v53, %v4789_v5  ;;  %v1226_v17 = vmul.f32 %v4641_v11, %v4429_v45 }
  0xe4   :  { %1299 = vrot.lane.b32.xlu1 %v1220_v3, %s4216_s25  ;;  %1301 = vrot.lane.b32.xlu2 %v1221_v22, %s4216_s25  ;;  %v4867_v3 = vadd.f32 %v4697_v46, %v101_v28  ;;  %v4879_v46 = vadd.f32 1.0, %v3744_v7  ;;  %v4882_v28 = vadd.f32 %v4747_v2, %v104_v32  ;;  %v1227_v2 = vmul.f32 %v4641_v11, %v4424_v44  ;;  %v3748_v32 = vpop.eup %3747 }
  0xe5   :  { %1297 = vrot.lane.b32.xlu0 %v1219_v9, %s4216_s25  ;;  %v496_v9 = vadd.f32 %v4680_v61, %v462_v25  ;;  %3751 = vpow2.f32 %v3631_v34  ;;  %v657_v0 = vsub.f32 1.0, %v656_v23  ;;  %v664_v45 = vand.u32 2147483647, %v4789_v5  ;;  %v4914_v27 = vpop.eup %3749 }
  0xe6   :  { %v376_v22 = vpop.permute.xlu1 %375  ;;  %v396_v6 = vpop.permute.xlu2 %395  ;;  %3753 = vrcp.f32 %v4879_v46  ;;  %v666_v44 = vand.u32 2147483648, %v4789_v5  ;;  %v4916_v7 = vadd.f32 1.0, %v3748_v32  ;;  %v4921_v40 = vmul.f32 %v4641_v11, %v4419_v43 }
  0xe7   :  { %v466_v10 = vadd.f32 %v376_v22, %v4731_v21  ;;  %v374_v52 = vpop.permute.xlu0 %373  ;;  %v476_v30 = vadd.f32 %v396_v6, %v282_v33  ;;  %v4890_v21 = vadd.f32 %v4753_v62, %v103_v4  ;;  %v3630_v31 = vmul.f32 -1.442695, %v496_v9 }
  0xe8   :  { %v465_v25 = vadd.f32 %v374_v52, %v4728_v13  ;;  %v1225_v33 = vmul.f32 %v4641_v11, %v4395_v37  ;;  %v4904_v13 = vmul.f32 %v4641_v11, %v4453_v51  ;;  %3755 = vpow2.f32 %v3641_v38 }
  0xe9   :  { %v500_v58 = vadd.f32 %v4680_v61, %v466_v10  ;;  %v510_v4 = vadd.f32 %v4680_v61, %v476_v30  ;;  %v4912_v37 = vmul.f32 %v4641_v11, %v4448_v50  ;;  %v658_v15 = vmul.f32 %v4861_v53, %v657_v0 }
  0xea   :  { %v499_v51 = vadd.f32 %v4680_v61, %v465_v25  ;;  %3757 = vpow2.f32 %v3630_v31  ;;  %vm661_vm1 = vweird.f32 %v4861_v53  ;;  %vm4928_vm2 = vcmp.eq.f32.partialorder %v664_v45, 8.507059e+37 }
  0xeb   :  { %v3634_v62 = vmul.f32 -1.442695, %v500_v58  ;;  %v667_v34 = vor.u32 1.1754944e-38, %v666_v44  ;;  %v3752_v43 = vpop.eup %3751  ;;  %v3644_v9 = vmul.f32 -1.442695, %v510_v4  ;;  %vm662_vm4 = vmor %vm660_vm0, %vm661_vm1  ;;  %v701_v23 = vmul.f32 %v4914_v27, %v4849_v26  ;;  %v8639_v4 = vld [vmem:[#allocation22_spill] sm:$0xff] }
  0xec   :  { %1305 = vrot.lane.b32.xlu1 %v1223_v60, %s4216_s25  ;;  %1307 = vrot.lane.b32.xlu2 %v1224_v12, %s4216_s25  ;;  %v3633_v52 = vmul.f32 -1.442695, %v499_v51  ;;  %v4949_v25 = vadd.f32 1.0, %v3752_v43  ;;  %v711_v31 = vand.u32 2147483648, %v4849_v26  ;;  %v4962_v45 = vmul.f32 %v4641_v11, %v4443_v49 }
  0xed   :  { %1303 = vrot.lane.b32.xlu0 %v1222_v39, %s4216_s25  ;;  %3759 = vpow2.f32 %v3634_v62  ;;  %v659_v39 = vadd.f32 %v4861_v53, %v658_v15  ;;  %v709_v44 = vand.u32 2147483647, %v4849_v26  ;;  %vm706_vm7 = vweird.f32 %v4914_v27 }
  0xee   :  { %v382_v1 = vpop.permute.xlu1 %381  ;;  %v402_v35 = vpop.permute.xlu2 %401  ;;  %3761 = vrcp.f32 %v4916_v7  ;;  %vm5038_vm8 = vmor %vm705_vm5, %vm706_vm7  ;;  %vm750_vm9 = vweird.f32 %v4879_v46  ;;  %vm690_vm13 = vweird.f32 %v4949_v25 }
  0xef   :  { %v469_v22 = vadd.f32 %v382_v1, %v4739_v8  ;;  %v479_v6 = vadd.f32 %v402_v35, %v285_v54  ;;  %v380_v50 = vpop.permute.xlu0 %379  ;;  %v4934_v54 = vpop.eup %3753  ;;  %v663_v32 = vsel %vm662_vm4, %v4861_v53, %v659_v39  ;;  %3763 = vpow2.f32 %v3644_v9 }
  0xf0   :  { %v468_v60 = vadd.f32 %v380_v50, %v4785_v48  ;;  %v4939_v48 = vmul.f32 %v4641_v11, %v4477_v57  ;;  %v3756_v38 = vpop.eup %3755  ;;  %v4955_v57 = vmul.f32 %v4641_v11, %v4472_v56  ;;  %3765 = vpow2.f32 %v3633_v52 }
  0xf1   :  { %v503_v10 = vadd.f32 %v4680_v61, %v469_v22  ;;  %v513_v8 = vadd.f32 %v4680_v61, %v479_v6  ;;  %v3758_v0 = vpop.eup %3757  ;;  %v4968_v56 = vadd.f32 1.0, %v3756_v38  ;;  %v712_v6 = vor.u32 1.1754944e-38, %v711_v31 }
  0xf2   :  { %v502_v30 = vadd.f32 %v4680_v61, %v468_v60  ;;  %v4980_v22 = vadd.f32 1.0, %v3758_v0  ;;  %vm4992_vm6 = vcmp.eq.f32.partialorder %v709_v44, 8.507059e+37  ;;  %v746_v9 = vmul.f32 %v4934_v54, %v4879_v46 }
  0xf3   :  { %v3637_v58 = vmul.f32 -1.442695, %v503_v10  ;;  %v3647_v5 = vmul.f32 -1.442695, %v513_v8  ;;  %v3760_v49 = vpop.eup %3759  ;;  %v5004_v52 = vmul.f32 %v4641_v11, %v8628_v63  ;;  %v5013_v38 = vmul.f32 %v4641_v11, %v4467_v55 }
  0xf4   :  { %1311 = vrot.lane.b32.xlu1 %v1226_v17, %s4216_s25  ;;  %1313 = vrot.lane.b32.xlu2 %v1227_v2, %s4216_s25  ;;  %v668_v17 = vsel %vm4928_vm2, %v667_v34, %v663_v32  ;;  %v3636_v62 = vmul.f32 -1.442695, %v502_v30  ;;  %v4977_v15 = vpop.eup %3761  ;;  %v747_v31 = vsub.f32 1.0, %v746_v9  ;;  %v756_v0 = vand.u32 2147483648, %v4879_v46 }
  0xf5   :  { %1309 = vrot.lane.b32.xlu0 %v1225_v33, %s4216_s25  ;;  %1136 = vst.msk [vmem:[%s8547_s3] sm:$0xff] %vm1135_vm3, %v668_v17  ;;  %v702_v33 = vsub.f32 1.0, %v701_v23  ;;  %3767 = vpow2.f32 %v3637_v58  ;;  %v3764_v10 = vpop.eup %3763  ;;  %v5021_v23 = vstv %s4964_s6  ;;  %vm751_vm10 = vweird.f32 %v4934_v54 }
  0xf6   :  { %v388_v53 = vpop.permute.xlu1 %387  ;;  %v408_v2 = vpop.permute.xlu2 %407  ;;  %3769 = vrcp.f32 %v4949_v25  ;;  %v5027_v55 = vadd.f32 1.0, %v3764_v10  ;;  %v8647_v10 = vld [vmem:[#allocation9_spill] sm:$0xff]  ;;  %vm5131_vm12 = vmor %vm750_vm9, %vm751_vm10 }
  0xf7   :  { %v472_v51 = vadd.f32 %v388_v53, %v8639_v4  ;;  %v482_v1 = vadd.f32 %v408_v2, %v4854_v24  ;;  %v386_v35 = vpop.permute.xlu0 %385  ;;  %3771 = vpow2.f32 %v3647_v5  ;;  %v4989_v24 = vadd.f32 1.0, %v3760_v49  ;;  %v3766_v39 = vpop.eup %3765 }
  0xf8   :  { %v471_v12 = vadd.f32 %v386_v35, %v4803_v18  ;;  %3773 = vrcp.f32 %v4968_v56  ;;  %v703_v34 = vmul.f32 %v4914_v27, %v702_v33  ;;  %v5000_v18 = vmul.f32 %v4641_v11, %v8630_v19 }
  0xf9   :  { %v506_v50 = vadd.f32 %v4680_v61, %v472_v51  ;;  %v516_v60 = vadd.f32 %v4680_v61, %v482_v1  ;;  %3775 = vpow2.f32 %v3636_v62  ;;  %v5030_v17 = vadd.f32 1.0, %v3766_v39  ;;  %v8644_v62 = vld [vmem:[#allocation11_spill] sm:$0xff] }
  0xfa   :  { %3777 = vrcp.f32 %v4980_v22  ;;  %v704_v19 = vadd.f32 %v4914_v27, %v703_v34  ;;  %v505_v30 = vadd.f32 %v4680_v61, %v471_v12  ;;  %v5048_v4 = vmul.f32 %v5021_v23, %v8644_v62  ;;  %v8646_v12 = vld [vmem:[#allocation8_spill] sm:$0xff] }
  0xfb   :  { %v3640_v8 = vmul.f32 -1.442695, %v506_v50  ;;  %v3768_v58 = vpop.eup %3767  ;;  %v3650_v63 = vmul.f32 -1.442695, %v516_v60  ;;  %3779 = vrcp.f32 %v4989_v24  ;;  %v5066_v34 = vmul.f32 %v5021_v23, %v8646_v12 }
  0xfc   :  { %1317 = vrot.lane.b32.xlu1 %v4904_v13, %s4216_s25  ;;  %1319 = vrot.lane.b32.xlu2 %v4912_v37, %s4216_s25  ;;  %v754_v13 = vand.u32 2147483647, %v4879_v46  ;;  %v5024_v37 = vpop.eup %3769  ;;  %v5044_v49 = vadd.f32 1.0, %v3768_v58  ;;  %v3639_v51 = vmul.f32 -1.442695, %v505_v30  ;;  %vm735_vm1 = vweird.f32 %v4989_v24 }
  0xfd   :  { %1315 = vrot.lane.b32.xlu0 %v4921_v40, %s4216_s25  ;;  %v3772_v5 = vpop.eup %3771  ;;  %3781 = vpow2.f32 %v3640_v8  ;;  %v5073_v8 = vmul.f32 %v5021_v23, %v8647_v10  ;;  %vm691_vm15 = vweird.f32 %v5024_v37 }
  0xfe   :  { %v394_v11 = vpop.permute.xlu1 %393  ;;  %v414_v32 = vpop.permute.xlu2 %413  ;;  %3783 = vpow2.f32 %v3650_v63  ;;  %v5062_v60 = vadd.f32 1.0, %v3772_v5  ;;  %vm5098_vm11 = vcmp.eq.f32.partialorder %v754_v13, 8.507059e+37  ;;  %v757_v5 = vor.u32 1.1754944e-38, %v756_v0  ;;  %v8651_v13 = vld [vmem:[#allocation23_spill] sm:$0xff]  ;;  %vm692_vm0 = vmor %vm690_vm13, %vm691_vm15 }
  0xff   :  { %v475_v40 = vadd.f32 %v394_v11, %v4770_v41  ;;  %v485_v53 = vadd.f32 %v414_v32, %v4864_v16  ;;  %v392_v2 = vpop.permute.xlu0 %391  ;;  %v5042_v44 = vpop.eup %3773  ;;  %v5051_v41 = vstv %s4982_s9  ;;  %v708_v16 = vsel %vm5038_vm8, %v4914_v27, %v704_v19  ;;  %v4123_v11 = vld [vmem:[%s8546_s2 + $0x20] sm:$0xff] }
 0x100   :  { %v3776_v26 = vpop.eup %3775  ;;  %v474_v35 = vadd.f32 %v392_v2, %v4813_v29  ;;  %3785 = vrcp.f32 %v5027_v55  ;;  %8645 = vst [vmem:[#allocation14_spill] sm:$0xff] %v5062_v60  ;;  %v748_v27 = vmul.f32 %v4934_v54, %v747_v31  ;;  %v713_v29 = vsel %vm4992_vm6, %v712_v6, %v708_v16 }
 0x101   :  { %v509_v1 = vadd.f32 %v4680_v61, %v475_v40  ;;  %v5059_v50 = vpop.eup %3777  ;;  %3787 = vrcp.f32 %v5030_v17  ;;  %v519_v9 = vadd.f32 %v4680_v61, %v485_v53  ;;  %v5080_v19 = vadd.f32 1.0, %v3776_v26  ;;  %1139 = vst.msk [vmem:[%s8547_s3 + $0x18] sm:$0xff] %vm1135_vm3, %v713_v29 }
 0x102   :  { %v5077_v39 = vpop.eup %3779  ;;  %3789 = vrcp.f32 %v5044_v49  ;;  %v5088_v58 = vmul.f32 %v5051_v41, %v8644_v62  ;;  %v508_v63 = vadd.f32 %v4680_v61, %v474_v35  ;;  %v5107_v32 = vmul.f32 %v4123_v11, %v5021_v23  ;;  %v8652_v62 = vld [vmem:[#allocation10_spill] sm:$0xff] }
 0x103   :  { %8648 = vst [vmem:[#allocation12_spill] sm:$0xff] %v5080_v19  ;;  %v3782_v6 = vpop.eup %3781  ;;  %3791 = vpow2.f32 %v3639_v51  ;;  %v3643_v43 = vmul.f32 -1.442695, %v509_v1  ;;  %v749_v31 = vadd.f32 %v4934_v54, %v748_v27  ;;  %v5114_v16 = vmul.f32 %v5021_v23, %v8652_v62 }
 0x104   :  { %1323 = vrot.lane.b32.xlu1 %v4939_v48, %s4216_s25  ;;  %1325 = vrot.lane.b32.xlu2 %v4955_v57, %s4216_s25  ;;  %3793 = vrcp.f32 %v5062_v60  ;;  %v3784_v40 = vpop.eup %3783  ;;  %v5119_v51 = vadd.f32 1.0, %v3782_v6  ;;  %v694_v0 = vand.u32 2147483647, %v4949_v25  ;;  %v3642_v12 = vmul.f32 -1.442695, %v508_v63 }
 0x105   :  { %1321 = vrot.lane.b32.xlu0 %v4962_v45, %s4216_s25  ;;  %v3653_v45 = vmul.f32 -1.442695, %v519_v9  ;;  %3795 = vrcp.f32 %v5080_v19  ;;  %v686_v29 = vmul.f32 %v5024_v37, %v4949_v25  ;;  %v696_v6 = vand.u32 2147483648, %v4949_v25 }
 0x106   :  { %v400_v57 = vpop.permute.xlu1 %399  ;;  %v420_v30 = vpop.permute.xlu2 %419  ;;  %3797 = vpow2.f32 %v3643_v43  ;;  %v753_v43 = vsel %vm5131_vm12, %v4934_v54, %v749_v31  ;;  %vm5168_vm14 = vcmp.eq.f32.partialorder %v694_v0, 8.507059e+37  ;;  %v8662_v0 = vld [vmem:[#allocation24_spill] sm:$0xff]  ;;  %vm736_vm4 = vweird.f32 %v5077_v39 }
 0x107   :  { %v478_v53 = vadd.f32 %v400_v57, %v8651_v13  ;;  %v488_v2 = vadd.f32 %v420_v30, %v4874_v14  ;;  %v398_v33 = vpop.permute.xlu0 %397  ;;  %v5116_v26 = vpop.eup %3785  ;;  %3799 = vpow2.f32 %v3653_v45  ;;  %v5148_v57 = vld [vmem:[%s8546_s2 + $0x18] sm:$0xff]  ;;  %v687_v31 = vsub.f32 1.0, %v686_v29  ;;  %vm5322_vm5 = vmor %vm735_vm1, %vm736_vm4 }
 0x108   :  { %8653 = vst [vmem:[#allocation15_spill] sm:$0xff] %v5116_v26  ;;  %v477_v1 = vadd.f32 %v398_v33, %v4831_v36  ;;  %v5123_v35 = vpop.eup %3787  ;;  %v5137_v36 = vadd.f32 1.0, %v3784_v40  ;;  %v5152_v30 = vmul.f32 %v5148_v57, %v5021_v23  ;;  %v5155_v40 = vmul.f32 %v4123_v11, %v5051_v41 }
 0x109   :  { %v512_v14 = vadd.f32 %v4680_v61, %v478_v53  ;;  %v522_v27 = vadd.f32 %v4680_v61, %v488_v2  ;;  %v5135_v10 = vpop.eup %3789  ;;  %3801 = vrcp.f32 %v5119_v51  ;;  %v758_v53 = vsel %vm5098_vm11, %v757_v5, %v753_v43 }
 0x10a   :  { %8656 = vst [vmem:[#allocation13_spill] sm:$0xff] %v5137_v36  ;;  %v3792_v63 = vpop.eup %3791  ;;  %v511_v54 = vadd.f32 %v4680_v61, %v477_v1  ;;  %3803 = vpow2.f32 %v3642_v12  ;;  %v697_v48 = vor.u32 1.1754944e-38, %v696_v6  ;;  %v688_v9 = vmul.f32 %v5024_v37, %v687_v31  ;;  %v5200_v6 = vld [vmem:[%s8546_s2 + $0x40] sm:$0xff] }
 0x10b   :  { %v3646_v46 = vmul.f32 -1.442695, %v512_v14  ;;  %v5157_v13 = vpop.eup %3793  ;;  %v3656_v45 = vmul.f32 -1.442695, %v522_v27  ;;  %3805 = vrcp.f32 %v5137_v36  ;;  %v5181_v2 = vadd.f32 1.0, %v3792_v63  ;;  %1142 = vst.msk [vmem:[%s8547_s3 + $0x30] sm:$0xff] %vm1135_vm3, %v758_v53 }
 0x10c   :  { %8657 = vst [vmem:[#allocation16_spill] sm:$0xff] %v5157_v13  ;;  %1329 = vrot.lane.b32.xlu1 %v5000_v18, %s4216_s25  ;;  %1331 = vrot.lane.b32.xlu2 %v5004_v52, %s4216_s25  ;;  %v5176_v18 = vmul.f32 %v4977_v15, %v4916_v7  ;;  %v5178_v52 = vpop.eup %3795  ;;  %v3645_v29 = vmul.f32 -1.442695, %v511_v54  ;;  %v5204_v63 = vmul.f32 %v5200_v6, %v5021_v23  ;;  %vm780_vm6 = vweird.f32 %v5044_v49 }
 0x10d   :  { %1327 = vrot.lane.b32.xlu0 %v5013_v38, %s4216_s25  ;;  %8660 = vst [vmem:[#allocation17_spill] sm:$0xff] %v5178_v52  ;;  %v4125_v38 = vld [vmem:[%s8546_s2 + $0x38] sm:$0xff]  ;;  %v3798_v5 = vpop.eup %3797  ;;  %3807 = vpow2.f32 %v3646_v46  ;;  %v5209_v46 = vld [vmem:[%s8546_s2 + $0x30] sm:$0xff]  ;;  %vm781_vm7 = vweird.f32 %v5135_v10  ;;  %vm825_vm9 = vweird.f32 %v5119_v51  ;;  %vm795_vm11 = vweird.f32 %v4916_v7 }
 0x10e   :  { %8661 = vst [vmem:[#allocation18_spill] sm:$0xff] %v5181_v2  ;;  %v406_v33 = vpop.permute.xlu1 %405  ;;  %v426_v62 = vpop.permute.xlu2 %425  ;;  %v5187_v1 = vmul.f32 %v4125_v38, %v5021_v23  ;;  %3809 = vpow2.f32 %v3656_v45  ;;  %vm782_vm10 = vmor %vm780_vm6, %vm781_vm7  ;;  %vm675_vm4 = vweird.f32 %v4980_v22  ;;  %vm841_vm7 = vweird.f32 %v5042_v44 }
 0x10f   :  { %v481_v12 = vadd.f32 %v406_v33, %v8662_v0  ;;  %v491_v14 = vadd.f32 %v426_v62, %v4890_v21  ;;  %v404_v27 = vpop.permute.xlu0 %403  ;;  %v5213_v21 = vmul.f32 %v5209_v46, %v5021_v23  ;;  %v3800_v54 = vpop.eup %3799  ;;  %3811 = vrcp.f32 %v5181_v2 }
 0x110   :  { %v480_v43 = vadd.f32 %v404_v27, %v4843_v47  ;;  %v5218_v53 = vpop.eup %3801  ;;  %v5221_v33 = vadd.f32 1.0, %v3798_v5  ;;  %v5224_v62 = vmul.f32 %v4125_v38, %v5051_v41  ;;  %v739_v0 = vand.u32 2147483647, %v4989_v24 }
 0x111   :  { %v515_v47 = vadd.f32 %v4680_v61, %v481_v12  ;;  %v525_v31 = vadd.f32 %v4680_v61, %v491_v14  ;;  %v3804_v27 = vpop.eup %3803  ;;  %v689_v12 = vadd.f32 %v5024_v37, %v688_v9  ;;  %v731_v14 = vmul.f32 %v5077_v39, %v4989_v24 }
 0x112   :  { %v514_v45 = vadd.f32 %v4680_v61, %v480_v43  ;;  %v5231_v13 = vpop.eup %3805  ;;  %v5233_v60 = vadd.f32 1.0, %v3800_v54  ;;  %3813 = vpow2.f32 %v3645_v29  ;;  %v741_v38 = vand.u32 2147483648, %v4989_v24 }
 0x113   :  { %v3649_v36 = vmul.f32 -1.442695, %v515_v47  ;;  %8663 = vst [vmem:[#allocation19_spill] sm:$0xff] %v5231_v13  ;;  %v3808_v5 = vpop.eup %3807  ;;  %v3659_v9 = vmul.f32 -1.442695, %v525_v31  ;;  %v693_v29 = vsel %vm692_vm0, %v5024_v37, %v689_v12  ;;  %3815 = vrcp.f32 %v5221_v33  ;;  %v8668_v37 = vld [vmem:[#allocation25_spill] sm:$0xff] }
 0x114   :  { %8664 = vst [vmem:[#allocation20_spill] sm:$0xff] %v5233_v60  ;;  %1465 = vrot.lane.b32.xlu1 %v5048_v4, %s4217_s29  ;;  %1467 = vrot.lane.b32.xlu2 %v5066_v34, %s4217_s29  ;;  %v732_v4 = vsub.f32 1.0, %v731_v14  ;;  %v5250_v34 = vadd.f32 1.0, %v3804_v27  ;;  %v698_v47 = vsel %vm5168_vm14, %v697_v48, %v693_v29  ;;  %vm5254_vm2 = vcmp.eq.f32.partialorder %v739_v0, 8.507059e+37  ;;  %v3810_v31 = vpop.eup %3809  ;;  %v4128_v27 = vld [vmem:[%s8546_s2 + $0x50] sm:$0xff]  ;;  %v5278_v0 = vld [vmem:[%s8546_s2 + $0x58] sm:$0xff] }
 0x115   :  { %1463 = vrot.lane.b32.xlu0 %v5073_v8, %s4217_s29  ;;  %3817 = vpow2.f32 %v3649_v36  ;;  %v3648_v8 = vmul.f32 -1.442695, %v514_v45  ;;  %v5263_v43 = vmul.f32 %v4128_v27, %v5021_v23  ;;  %1138 = vst.msk [vmem:[%s8547_s3 + $0x10] sm:$0xff] %vm1135_vm3, %v698_v47  ;;  %v5269_v11 = vpop.eup %3811  ;;  %v5272_v36 = vadd.f32 1.0, %v3808_v5 }
 0x116   :  { %8665 = vst [vmem:[#allocation21_spill] sm:$0xff] %v5250_v34  ;;  %v412_v25 = vpop.permute.xlu1 %411  ;;  %v1272_v54 = vpop.permute.xlu2 %1271  ;;  %3819 = vrcp.f32 %v5233_v60  ;;  %v5282_v45 = vmul.f32 %v5278_v0, %v5021_v23  ;;  %vm826_vm12 = vweird.f32 %v5218_v53  ;;  %vm796_vm14 = vweird.f32 %v4977_v15 }
 0x117   :  { %v484_v12 = vadd.f32 %v412_v25, %v8668_v37  ;;  %v410_v14 = vpop.permute.xlu0 %409  ;;  %8669 = vst [vmem:[#allocation22_spill] sm:$0xff] %v5269_v11  ;;  %3821 = vpow2.f32 %v3659_v9  ;;  %v733_v25 = vmul.f32 %v5077_v39, %v732_v4  ;;  %v5294_v37 = vld [vmem:[%s8546_s2 + $0x48] sm:$0xff]  ;;  %vm5534_vm13 = vmor %vm825_vm9, %vm826_vm12  ;;  %vm840_vm9 = vweird.f32 %v4968_v56 }
 0x118   :  { %8670 = vst [vmem:[#allocation11_spill] sm:$0xff] %v5272_v36  ;;  %v483_v48 = vadd.f32 %v410_v14, %v4847_v20  ;;  %v3814_v5 = vpop.eup %3813  ;;  %3823 = vrcp.f32 %v5250_v34  ;;  %v5288_v20 = vadd.f32 1.0, %v3810_v31  ;;  %v5298_v9 = vmul.f32 %v5294_v37, %v5021_v23  ;;  %vm5559_vm0 = vmor %vm795_vm11, %vm796_vm14 }
 0x119   :  { %v518_v29 = vadd.f32 %v4680_v61, %v484_v12  ;;  %3825 = vpow2.f32 %v3648_v8  ;;  %v734_v12 = vadd.f32 %v5077_v39, %v733_v25  ;;  %v776_v14 = vmul.f32 %v5135_v10, %v5044_v49  ;;  %v5303_v31 = vpop.eup %3815  ;;  %v8677_v25 = vld [vmem:[#allocation26_spill] sm:$0xff]  ;;  %vm842_vm11 = vmor %vm840_vm9, %vm841_vm7 }
 0x11a   :  { %8671 = vst [vmem:[#allocation8_spill] sm:$0xff] %v5288_v20  ;;  %v517_v47 = vadd.f32 %v4680_v61, %v483_v48  ;;  %v4131_v48 = vld [vmem:[%s8546_s2] sm:$0xff]  ;;  %3827 = vrcp.f32 %v5272_v36  ;;  %vm871_vm14 = vweird.f32 %v5303_v31 }
 0x11b   :  { %v3652_v4 = vmul.f32 -1.442695, %v518_v29  ;;  %v5313_v8 = vmul.f32 %v4131_v48, %v5051_v41  ;;  %v5316_v29 = vmul.f32 %v4128_v27, %v5051_v41  ;;  %v738_v27 = vsel %vm5322_vm5, %v5077_v39, %v734_v12 }
 0x11c   :  { %v3651_v60 = vmul.f32 -1.442695, %v517_v47  ;;  %1471 = vrot.lane.b32.xlu1 %v5107_v32, %s4217_s29  ;;  %1473 = vrot.lane.b32.xlu2 %v5114_v16, %s4217_s29  ;;  %v742_v32 = vor.u32 1.1754944e-38, %v741_v38  ;;  %v3818_v16 = vpop.eup %3817  ;;  %v5327_v47 = vadd.f32 1.0, %v3814_v5  ;;  %v784_v48 = vand.u32 2147483647, %v5044_v49 }
 0x11d   :  { %1469 = vrot.lane.b32.xlu0 %v5152_v30, %s4217_s29  ;;  %v5335_v24 = vpop.eup %3819  ;;  %3829 = vrcp.f32 %v5288_v20  ;;  %v5339_v38 = vadd.f32 %v1272_v54, %v5088_v58  ;;  %v4132_v5 = vld [vmem:[%s8546_s2 + $0x68] sm:$0xff]  ;;  %v5353_v58 = vld [vmem:[%s8546_s2 + $0x70] sm:$0xff]  ;;  %v777_v13 = vsub.f32 1.0, %v776_v14 }
 0x11e   :  { %8674 = vst [vmem:[#allocation9_spill] sm:$0xff] %v5327_v47  ;;  %v418_v34 = vpop.permute.xlu1 %417  ;;  %v1278_v11 = vpop.permute.xlu2 %1277  ;;  %v5345_v30 = vmul.f32 %v4132_v5, %v5021_v23  ;;  %v743_v39 = vsel %vm5254_vm2, %v742_v32, %v738_v27  ;;  %3831 = vpow2.f32 %v3652_v4  ;;  %v5357_v54 = vmul.f32 %v5353_v58, %v5021_v23  ;;  %v5372_v27 = vld [vmem:[%s8546_s2 + $0x60] sm:$0xff] }
 0x11f   :  { %8675 = vst [vmem:[#allocation23_spill] sm:$0xff] %v5335_v24  ;;  %v3822_v12 = vpop.eup %3821  ;;  %v487_v24 = vadd.f32 %v418_v34, %v8677_v25  ;;  %v416_v20 = vpop.permute.xlu0 %415  ;;  %v5366_v34 = vadd.f32 1.0, %v3818_v16  ;;  %3833 = vpow2.f32 %v3651_v60  ;;  %v5376_v25 = vmul.f32 %v5372_v27, %v5021_v23 }
 0x120   :  { %8676 = vst [vmem:[#allocation10_spill] sm:$0xff] %v5339_v38  ;;  %v5364_v4 = vpop.eup %3823  ;;  %v486_v32 = vadd.f32 %v416_v20, %v4857_v59  ;;  %3835 = vrcp.f32 %v5327_v47  ;;  %v5382_v16 = vmul.f32 %v5148_v57, %v5051_v41  ;;  %v5385_v59 = vmul.f32 %v4132_v5, %v5051_v41  ;;  %v4135_v20 = vld [vmem:[%s8546_s2 + $0x10] sm:$0xff] }
 0x121   :  { %1141 = vst.msk [vmem:[%s8547_s3 + $0x28] sm:$0xff] %vm1135_vm3, %v743_v39  ;;  %v3826_v39 = vpop.eup %3825  ;;  %v521_v14 = vadd.f32 %v4680_v61, %v487_v24  ;;  %v5387_v60 = vadd.f32 1.0, %v3822_v12  ;;  %v5393_v38 = vmul.f32 %v4135_v20, %v5051_v41  ;;  %vm5396_vm8 = vcmp.eq.f32.partialorder %v784_v48, 8.507059e+37  ;;  %v4140_v24 = vld [vmem:[%s8546_s2 + $0x98] sm:$0xff] }
 0x122   :  { %8678 = vst [vmem:[#allocation24_spill] sm:$0xff] %v5364_v4  ;;  %v5400_v57 = vpop.eup %3827  ;;  %v520_v5 = vadd.f32 %v4680_v61, %v486_v32  ;;  %v778_v12 = vmul.f32 %v5135_v10, %v777_v13  ;;  %v821_v4 = vmul.f32 %v5218_v53, %v5119_v51  ;;  %3837 = vrcp.f32 %v5366_v34 }
 0x123   :  { %8679 = vst [vmem:[#allocation25_spill] sm:$0xff] %v5366_v34  ;;  %v3655_v47 = vmul.f32 -1.442695, %v521_v14  ;;  %v5406_v2 = vpop.eup %3829  ;;  %v5409_v20 = vadd.f32 1.0, %v3826_v39  ;;  %v786_v48 = vand.u32 2147483648, %v5044_v49  ;;  %v5418_v32 = vadd.f32 %v1278_v11, %v5155_v40  ;;  %v4136_v39 = vld [vmem:[%s8546_s2 + $0x80] sm:$0xff] }
 0x124   :  { %8680 = vst [vmem:[#allocation26_spill] sm:$0xff] %v5387_v60  ;;  %1477 = vrot.lane.b32.xlu1 %v5187_v1, %s4217_s29  ;;  %1479 = vrot.lane.b32.xlu2 %v5204_v63, %s4217_s29  ;;  %v3832_v13 = vpop.eup %3831  ;;  %v5426_v1 = vmul.f32 %v4136_v39, %v5021_v23  ;;  %v779_v63 = vadd.f32 %v5135_v10, %v778_v12  ;;  %v822_v14 = vsub.f32 1.0, %v821_v4  ;;  %3839 = vrcp.f32 %v5387_v60  ;;  %v5433_v40 = vld [vmem:[%s8546_s2 + $0x88] sm:$0xff]  ;;  %v5442_v11 = vld [vmem:[%s8546_s2 + $0x78] sm:$0xff] }
 0x125   :  { %8683 = vst [vmem:[#allocation27_spill] sm:$0xff] %v5400_v57  ;;  %1475 = vrot.lane.b32.xlu0 %v5213_v21, %s4217_s29  ;;  %v5437_v21 = vmul.f32 %v5433_v40, %v5021_v23  ;;  %v5446_v4 = vmul.f32 %v5442_v11, %v5021_v23  ;;  %v5450_v12 = vmul.f32 %v5209_v46, %v5051_v41  ;;  %3841 = vpow2.f32 %v3655_v47 }
 0x126   :  { %8684 = vst [vmem:[#allocation28_spill] sm:$0xff] %v5406_v2  ;;  %v3834_v2 = vpop.eup %3833  ;;  %v424_v34 = vpop.permute.xlu1 %423  ;;  %v3654_v60 = vmul.f32 -1.442695, %v520_v5  ;;  %v5456_v36 = vmul.f32 %v4136_v39, %v5051_v41  ;;  %3843 = vrcp.f32 %v5409_v20  ;;  %v787_v46 = vor.u32 1.1754944e-38, %v786_v48 }
 0x127   :  { %8685 = vst [vmem:[#allocation29_spill] sm:$0xff] %v5409_v20  ;;  %v1284_v52 = vpop.permute.xlu2 %1283  ;;  %v490_v19 = vadd.f32 %v424_v34, %v4837_v42  ;;  %v422_v57 = vpop.permute.xlu0 %421  ;;  %v5467_v47 = vadd.f32 1.0, %v3834_v2  ;;  %v783_v34 = vsel %vm782_vm10, %v5135_v10, %v779_v63  ;;  %v823_v5 = vmul.f32 %v5218_v53, %v822_v14 }
 0x128   :  { %8686 = vst [vmem:[#allocation30_spill] sm:$0xff] %v5418_v32  ;;  %v5452_v32 = vpop.eup %3835  ;;  %v489_v26 = vadd.f32 %v422_v57, %v4867_v3  ;;  %v788_v57 = vsel %vm5396_vm8, %v787_v46, %v783_v34  ;;  %v8690_v49 = vsub.f32 1.0, %v5176_v18  ;;  %3845 = vpow2.f32 %v3654_v60  ;;  %v4139_v18 = vld [vmem:[%s8546_s2 + $0x28] sm:$0xff] }
 0x129   :  { %8687 = vst [vmem:[#allocation31_spill] sm:$0xff] %v5433_v40  ;;  %v5459_v40 = vadd.f32 1.0, %v3832_v13  ;;  %v524_v42 = vadd.f32 %v4680_v61, %v490_v19  ;;  %v5472_v13 = vpop.eup %3837  ;;  %v824_v19 = vadd.f32 %v5218_v53, %v823_v5  ;;  %v5497_v60 = vmul.f32 %v4139_v18, %v5051_v41 }
 0x12a   :  { %8688 = vst [vmem:[#allocation32_spill] sm:$0xff] %v5452_v32  ;;  %v523_v3 = vadd.f32 %v4680_v61, %v489_v26  ;;  %v793_v2 = vmul.f32 %v4977_v15, %v8690_v49  ;;  %v831_v26 = vand.u32 2147483648, %v5119_v51  ;;  %v5487_v10 = vpop.eup %3839  ;;  %v5503_v39 = vmul.f32 %v4140_v24, %v5021_v23 }
 0x12b   :  { %8689 = vst [vmem:[#allocation33_spill] sm:$0xff] %v5467_v47  ;;  %v3658_v48 = vmul.f32 -1.442695, %v524_v42  ;;  %v829_v63 = vand.u32 2147483647, %v5119_v51  ;;  %v3842_v14 = vpop.eup %3841  ;;  %v5520_v42 = vld [vmem:[%s8546_s2 + $0x90] sm:$0xff]  ;;  %v5528_v5 = vmul.f32 %v5294_v37, %v5051_v41  ;;  %v5548_v51 = vadd.f32 %v1284_v52, %v5224_v62 }
 0x12c   :  { %1144 = vst.msk [vmem:[%s8547_s3 + $0x40] sm:$0xff] %vm1135_vm3, %v788_v57  ;;  %1483 = vrot.lane.b32.xlu1 %v5263_v43, %s4217_s29  ;;  %1485 = vrot.lane.b32.xlu2 %v5282_v45, %s4217_s29  ;;  %v5508_v43 = vld [vmem:[%s8546_s2 + $0xa0] sm:$0xff]  ;;  %v3657_v46 = vmul.f32 -1.442695, %v523_v3  ;;  %v5524_v34 = vmul.f32 %v5520_v42, %v5021_v23  ;;  %v794_v37 = vadd.f32 %v4977_v15, %v793_v2  ;;  %v5553_v20 = vadd.f32 1.0, %v3842_v14 }
 0x12d   :  { %8691 = vst [vmem:[#allocation34_spill] sm:$0xff] %v5487_v10  ;;  %v5512_v45 = vmul.f32 %v5508_v43, %v5021_v23  ;;  %3847 = vpow2.f32 %v3658_v48  ;;  %1481 = vrot.lane.b32.xlu0 %v5298_v9, %s4217_s29  ;;  %v5538_v9 = vpop.eup %3843  ;;  %v828_v48 = vsel %vm5534_vm13, %v5218_v53, %v824_v19  ;;  %v5551_v10 = vmul.f32 %v4140_v24, %v5051_v41  ;;  %v4143_v24 = vld [vmem:[%s8546_s2 + $0xb0] sm:$0xff]  ;;  %v5579_v14 = vld [vmem:[%s8546_s2 + $0xb8] sm:$0xff] }
 0x12e   :  { %8694 = vst [vmem:[#allocation35_spill] sm:$0xff] %v5538_v9  ;;  %3849 = vrcp.f32 %v5459_v40  ;;  %v1270_v57 = vpop.permute.xlu1 %1269  ;;  %v832_v9 = vor.u32 1.1754944e-38, %v831_v26  ;;  %vm830_vm15 = vcmp.eq.f32.partialorder %v829_v63, 8.507059e+37  ;;  %v799_v53 = vand.u32 2147483647, %v4916_v7  ;;  %v3846_v2 = vpop.eup %3845 }
 0x12f   :  { %v1290_v49 = vpop.permute.xlu2 %1289  ;;  %3851 = vrcp.f32 %v5467_v47  ;;  %8695 = vst [vmem:[#allocation36_spill] sm:$0xff] %v5548_v51  ;;  %v428_v18 = vpop.permute.xlu0 %427  ;;  %v801_v62 = vand.u32 2147483648, %v4916_v7  ;;  %v671_v26 = vmul.f32 %v5059_v50, %v4980_v22  ;;  %v5574_v63 = vmul.f32 %v4143_v24, %v5021_v23 }
 0x130   :  { %v492_v32 = vadd.f32 %v428_v18, %v4882_v28  ;;  %3853 = vpow2.f32 %v3657_v46  ;;  %v833_v19 = vsel %vm830_vm15, %v832_v9, %v828_v48  ;;  %v5568_v28 = vmul.f32 %v5200_v6, %v5051_v41 }
 0x131   :  { %v5583_v7 = vmul.f32 %v5579_v14, %v5021_v23  ;;  %1147 = vst.msk [vmem:[%s8547_s3 + $0x58] sm:$0xff] %vm1135_vm3, %v833_v19  ;;  %v798_v6 = vsel %vm5559_vm0, %v4977_v15, %v794_v37  ;;  %v802_v9 = vor.u32 1.1754944e-38, %v801_v62  ;;  %v672_v48 = vsub.f32 1.0, %v671_v26  ;;  %v5606_v15 = vld [vmem:[%s8546_s2 + $0xa8] sm:$0xff] }
 0x132   :  { %v526_v3 = vadd.f32 %v4680_v61, %v492_v32  ;;  %v836_v18 = vmul.f32 %v5042_v44, %v4968_v56  ;;  %v5597_v47 = vadd.f32 1.0, %v3846_v2  ;;  %v5610_v61 = vmul.f32 %v5606_v15, %v5021_v23 }
 0x133   :  { %v3848_v46 = vpop.eup %3847  ;;  %v5614_v32 = vmul.f32 %v5372_v27, %v5051_v41  ;;  %vm800_vm1 = vcmp.eq.f32.partialorder %v799_v53, 8.507059e+37  ;;  %3855 = vrcp.f32 %v5553_v20  ;;  %v673_v2 = vmul.f32 %v5059_v50, %v672_v48 }
 0x134   :  { %v5595_v51 = vpop.eup %3849  ;;  %8698 = vst [vmem:[#allocation37_spill] sm:$0xff] %v5597_v47  ;;  %1489 = vrot.lane.b32.xlu1 %v5345_v30, %s4217_s29  ;;  %1491 = vrot.lane.b32.xlu2 %v5357_v54, %s4217_s29  ;;  %v5620_v30 = vadd.f32 %v1270_v57, %v5313_v8  ;;  %v803_v54 = vsel %vm800_vm1, %v802_v9, %v798_v6  ;;  %v5625_v19 = vadd.f32 1.0, %v3848_v46  ;;  %v681_v8 = vand.u32 2147483648, %v4980_v22  ;;  %v4146_v46 = vld [vmem:[%s8546_s2 + $0xc8] sm:$0xff] }
 0x135   :  { %v5616_v37 = vpop.eup %3851  ;;  %1487 = vrot.lane.b32.xlu0 %v5376_v25, %s4217_s29  ;;  %v5628_v52 = vadd.f32 %v1290_v49, %v5316_v29  ;;  %1145 = vst.msk [vmem:[%s8547_s3 + $0x48] sm:$0xff] %vm1135_vm3, %v803_v54  ;;  %v837_v57 = vsub.f32 1.0, %v836_v18  ;;  %v3660_v25 = vmul.f32 -1.442695, %v526_v3  ;;  %v5636_v6 = vmul.f32 %v4143_v24, %v5051_v41  ;;  %v5655_v24 = vld [vmem:[%s8546_s2 + $0xd0] sm:$0xff] }
 0x136   :  { %8699 = vst [vmem:[#allocation38_spill] sm:$0xff] %v5616_v37  ;;  %v1276_v27 = vpop.permute.xlu1 %1275  ;;  %v3854_v62 = vpop.eup %3853  ;;  %vm676_vm2 = vweird.f32 %v5059_v50  ;;  %v679_v29 = vand.u32 2147483647, %v4980_v22  ;;  %3857 = vrcp.f32 %v5597_v47  ;;  %v5643_v49 = vmul.f32 %v5278_v0, %v5051_v41  ;;  %v5664_v0 = vld [vmem:[%s8546_s2 + $0xc0] sm:$0xff] }
 0x137   :  { %8700 = vst [vmem:[#allocation39_spill] sm:$0xff] %v5620_v30  ;;  %v1296_v53 = vpop.permute.xlu2 %1295  ;;  %v1274_v26 = vpop.permute.xlu0 %1273  ;;  %v5649_v3 = vmul.f32 %v4146_v46, %v5021_v23  ;;  %v5659_v9 = vmul.f32 %v5655_v24, %v5021_v23  ;;  %v5668_v48 = vmul.f32 %v5664_v0, %v5021_v23  ;;  %v5672_v22 = vmul.f32 %v5442_v11, %v5051_v41  ;;  %vm677_vm5 = vmor %vm675_vm4, %vm676_vm2 }
 0x138   :  { %8701 = vst [vmem:[#allocation40_spill] sm:$0xff] %v5628_v52  ;;  %v674_v18 = vadd.f32 %v5059_v50, %v673_v2  ;;  %3859 = vrcp.f32 %v5625_v19  ;;  %v5676_v54 = vadd.f32 1.0, %v3854_v62  ;;  %v682_v52 = vor.u32 1.1754944e-38, %v681_v8 }
 0x139   :  { %v838_v30 = vmul.f32 %v5042_v44, %v837_v57  ;;  %v5681_v47 = vpop.eup %3855  ;;  %3861 = vpow2.f32 %v3660_v25  ;;  %v5684_v37 = vadd.f32 %v1276_v27, %v5382_v16  ;;  %vm680_vm6 = vcmp.eq.f32.partialorder %v679_v29, 8.507059e+37 }
 0x13a   :  { %8702 = vst [vmem:[#allocation41_spill] sm:$0xff] %v5676_v54  ;;  %v678_v11 = vsel %vm677_vm5, %v5059_v50, %v674_v18  ;;  %v874_v8 = vand.u32 2147483647, %v5221_v33  ;;  %v876_v57 = vand.u32 2147483648, %v5221_v33  ;;  %v846_v62 = vand.u32 2147483648, %v4968_v56 }
 0x13b   :  { %8703 = vst [vmem:[#allocation42_spill] sm:$0xff] %v5684_v37  ;;  %v683_v2 = vsel %vm680_vm6, %v682_v52, %v678_v11  ;;  %v839_v50 = vadd.f32 %v5042_v44, %v838_v30  ;;  %v844_v16 = vand.u32 2147483647, %v4968_v56  ;;  %3863 = vrcp.f32 %v5676_v54  ;;  %v4149_v11 = vld [vmem:[%s8546_s2 + $0xe0] sm:$0xff]  ;;  %v5744_v56 = vld [vmem:[%s8546_s2 + $0xe8] sm:$0xff] }
 0x13c   :  { %1495 = vrot.lane.b32.xlu1 %v5426_v1, %s4217_s29  ;;  %1497 = vrot.lane.b32.xlu2 %v5437_v21, %s4217_s29  ;;  %1137 = vst.msk [vmem:[%s8547_s3 + $0x8] sm:$0xff] %vm1135_vm3, %v683_v2  ;;  %v716_v1 = vmul.f32 %v5123_v35, %v5030_v17  ;;  %v5705_v21 = vpop.eup %3857  ;;  %v5712_v52 = vadd.f32 %v1274_v26, %v5393_v38  ;;  %vm870_vm8 = vweird.f32 %v5221_v33  ;;  %vm5733_vm10 = vcmp.eq.f32.partialorder %v874_v8, 8.507059e+37 }
 0x13d   :  { %1493 = vrot.lane.b32.xlu0 %v5446_v4, %s4217_s29  ;;  %8704 = vst [vmem:[#allocation43_spill] sm:$0xff] %v5705_v21  ;;  %v5709_v4 = vadd.f32 %v1296_v53, %v5385_v59  ;;  %v5715_v30 = vmul.f32 %v4146_v46, %v5051_v41  ;;  %v5719_v18 = vmul.f32 %v5353_v58, %v5051_v41  ;;  %v877_v58 = vor.u32 1.1754944e-38, %v876_v57  ;;  %v5754_v57 = vld [vmem:[%s8546_s2 + $0xd8] sm:$0xff]  ;;  %vm872_vm1 = vmor %vm870_vm8, %vm871_vm14 }
 0x13e   :  { %v1282_v27 = vpop.permute.xlu1 %1281  ;;  %v5725_v59 = vmul.f32 %v4149_v11, %v5021_v23  ;;  %v5729_v38 = vpop.eup %3859  ;;  %v866_v53 = vmul.f32 %v5303_v31, %v5221_v33  ;;  %v847_v46 = vor.u32 1.1754944e-38, %v846_v62  ;;  %8710 = vst [vmem:[#allocation47_spill] sm:$0xff] %v5744_v56  ;;  %v5748_v54 = vmul.f32 %v5744_v56, %v5021_v23  ;;  %v8711_v21 = vld [vmem:[#allocation15_spill] sm:$0xff] }
 0x13f   :  { %8705 = vst [vmem:[#allocation44_spill] sm:$0xff] %v5709_v4  ;;  %v1302_v25 = vpop.permute.xlu2 %1301  ;;  %v1280_v29 = vpop.permute.xlu0 %1279  ;;  %v843_v8 = vsel %vm842_vm11, %v5042_v44, %v839_v50  ;;  %vm845_vm12 = vcmp.eq.f32.partialorder %v844_v16, 8.507059e+37  ;;  %v717_v4 = vsub.f32 1.0, %v716_v1  ;;  %v5758_v62 = vmul.f32 %v5754_v57, %v5021_v23  ;;  %v8716_v33 = vld [vmem:[#allocation11_spill] sm:$0xff] }
 0x140   :  { %8706 = vst [vmem:[#allocation45_spill] sm:$0xff] %v5729_v38  ;;  %v5739_v2 = vpop.eup %3861  ;;  %v848_v37 = vsel %vm845_vm12, %v847_v46, %v843_v8  ;;  %v881_v38 = vmul.f32 %v8711_v21, %v5027_v55  ;;  %v5764_v56 = vmul.f32 %v5520_v42, %v5051_v41  ;;  %vm721_vm13 = vweird.f32 %v5123_v35 }
 0x141   :  { %8709 = vst [vmem:[#allocation46_spill] sm:$0xff] %v5739_v2  ;;  %v867_v2 = vsub.f32 1.0, %v866_v53  ;;  %v718_v44 = vmul.f32 %v5123_v35, %v717_v4  ;;  %v726_v50 = vand.u32 2147483648, %v5030_v17  ;;  %v5773_v16 = vpop.eup %3863  ;;  %v5783_v4 = vadd.f32 %v1282_v27, %v5450_v12  ;;  %v4152_v27 = vld [vmem:[%s8546_s2 + $0xf8] sm:$0x3] }
 0x142   :  { %1148 = vst.msk [vmem:[%s8547_s3 + $0x60] sm:$0xff] %vm1135_vm3, %v848_v37  ;;  %v724_v37 = vand.u32 2147483647, %v5030_v17  ;;  %v882_v1 = vsub.f32 1.0, %v881_v38  ;;  %v5786_v53 = vadd.f32 %v1302_v25, %v5456_v36  ;;  %vm720_vm15 = vweird.f32 %v5030_v17  ;;  %v8715_v38 = vld [vmem:[#allocation31_spill] sm:$0xff] }
 0x143   :  { %8712 = vst [vmem:[#allocation15_spill] sm:$0xff] %v5773_v16  ;;  %v868_v42 = vmul.f32 %v5303_v31, %v867_v2  ;;  %v5793_v2 = vmul.f32 %v4149_v11, %v5051_v41  ;;  %v5797_v8 = vmul.f32 %v8715_v38, %v5051_v41  ;;  %vm722_vm0 = vmor %vm720_vm15, %vm721_vm13  ;;  %v5812_v25 = vmul.f32 %v4152_v27, %v5021_v23 }
 0x144   :  { %1501 = vrot.lane.b32.xlu1 %v5503_v39, %s4217_s29  ;;  %1503 = vrot.lane.b32.xlu2 %v5512_v45, %s4217_s29  ;;  %8713 = vst [vmem:[#allocation48_spill] sm:$0xff] %v5783_v4  ;;  %v719_v39 = vadd.f32 %v5123_v35, %v718_v44  ;;  %v883_v36 = vmul.f32 %v8711_v21, %v882_v1  ;;  %v727_v11 = vor.u32 1.1754944e-38, %v726_v50  ;;  %vm886_vm2 = vweird.f32 %v8711_v21 }
 0x145   :  { %8714 = vst [vmem:[#allocation49_spill] sm:$0xff] %v5786_v53  ;;  %1499 = vrot.lane.b32.xlu0 %v5524_v34, %s4217_s29  ;;  %v869_v12 = vadd.f32 %v5303_v31, %v868_v42  ;;  %v5804_v34 = vadd.f32 %v1280_v29, %v5497_v60  ;;  %vm725_vm4 = vcmp.eq.f32.partialorder %v724_v37, 8.507059e+37  ;;  %vm885_vm5 = vweird.f32 %v5027_v55  ;;  %v8721_v37 = vld [vmem:[#allocation17_spill] sm:$0xff] }
 0x146   :  { %v1288_v45 = vpop.permute.xlu1 %1287  ;;  %v723_v29 = vsel %vm722_vm0, %v5123_v35, %v719_v39  ;;  %v884_v1 = vadd.f32 %v8711_v21, %v883_v36  ;;  %v889_v38 = vand.u32 2147483647, %v5027_v55  ;;  %vm915_vm6 = vweird.f32 %v8716_v33  ;;  %vm5833_vm7 = vmor %vm885_vm5, %vm886_vm2 }
 0x147   :  { %v1308_v46 = vpop.permute.xlu2 %1307  ;;  %v5806_v17 = vpop.permute.xlu0 %1285  ;;  %v873_v60 = vsel %vm872_vm1, %v5303_v31, %v869_v12  ;;  %v728_v42 = vsel %vm725_vm4, %v727_v11, %v723_v29  ;;  %v8717_v31 = vld [vmem:[#allocation27_spill] sm:$0xff]  ;;  %v891_v26 = vand.u32 2147483648, %v5027_v55  ;;  %v5843_v12 = vld [vmem:[%s8546_s2 + $0xf0] sm:$0xff]  ;;  %v919_v11 = vand.u32 2147483647, %v8716_v33 }
 0x148   :  { %v878_v44 = vsel %vm5733_vm10, %v877_v58, %v873_v60  ;;  %v911_v50 = vmul.f32 %v8717_v31, %v8716_v33  ;;  %v8720_v58 = vld [vmem:[#allocation12_spill] sm:$0xff]  ;;  %v5847_v36 = vmul.f32 %v5843_v12, %v5021_v23  ;;  %1140 = vst.msk [vmem:[%s8547_s3 + $0x20] sm:$0xff] %vm1135_vm3, %v728_v42  ;;  %v921_v55 = vand.u32 2147483648, %v8716_v33 }
 0x149   :  { %1150 = vst.msk [vmem:[%s8547_s3 + $0x70] sm:$0xff] %vm1135_vm3, %v878_v44  ;;  %v761_v39 = vmul.f32 %v8721_v37, %v8720_v58  ;;  %v888_v60 = vsel %vm5833_vm7, %v8711_v21, %v884_v1  ;;  %vm916_vm8 = vweird.f32 %v8717_v31  ;;  %v892_v29 = vor.u32 1.1754944e-38, %v891_v26  ;;  %v8722_v21 = vld [vmem:[#allocation14_spill] sm:$0xff]  ;;  %v8723_v1 = vld [vmem:[#allocation16_spill] sm:$0xff] }
 0x14a   :  { %v912_v23 = vsub.f32 1.0, %v911_v50  ;;  %vm890_vm9 = vcmp.eq.f32.partialorder %v889_v38, 8.507059e+37  ;;  %vm766_vm10 = vweird.f32 %v8721_v37  ;;  %v771_v42 = vand.u32 2147483648, %v8720_v58  ;;  %vm917_vm12 = vmor %vm915_vm6, %vm916_vm8 }
 0x14b   :  { %v762_v44 = vsub.f32 1.0, %v761_v39  ;;  %v926_v35 = vmul.f32 %v8723_v1, %v8722_v21  ;;  %v893_v50 = vsel %vm890_vm9, %v892_v29, %v888_v60  ;;  %v769_v26 = vand.u32 2147483647, %v8720_v58  ;;  %v8726_v29 = vld [vmem:[#allocation18_spill] sm:$0xff] }
 0x14c   :  { %1507 = vrot.lane.b32.xlu1 %v5574_v63, %s4217_s29  ;;  %1509 = vrot.lane.b32.xlu2 %v5583_v7, %s4217_s29  ;;  %v913_v7 = vmul.f32 %v8717_v31, %v912_v23  ;;  %v5873_v39 = vadd.f32 %v1288_v45, %v5528_v5  ;;  %v5879_v38 = vmul.f32 %v5606_v15, %v5051_v41  ;;  %vm5883_vm11 = vcmp.eq.f32.partialorder %v919_v11, 8.507059e+37 }
 0x14d   :  { %1505 = vrot.lane.b32.xlu0 %v5610_v61, %s4217_s29  ;;  %v763_v53 = vmul.f32 %v8721_v37, %v762_v44  ;;  %v922_v60 = vor.u32 1.1754944e-38, %v921_v55  ;;  %1151 = vst.msk [vmem:[%s8547_s3 + $0x78] sm:$0xff] %vm1135_vm3, %v893_v50  ;;  %vm765_vm13 = vweird.f32 %v8720_v58  ;;  %v927_v45 = vsub.f32 1.0, %v926_v35  ;;  %v8727_v44 = vld [vmem:[#allocation22_spill] sm:$0xff]  ;;  %v8728_v35 = vld [vmem:[#allocation13_spill] sm:$0xff]  ;;  %v8729_v50 = vld [vmem:[#allocation19_spill] sm:$0xff] }
 0x14e   :  { %v1294_v63 = vpop.permute.xlu1 %1293  ;;  %v914_v5 = vadd.f32 %v8717_v31, %v913_v7  ;;  %v5899_v11 = vadd.f32 %v1308_v46, %v5551_v10  ;;  %v5902_v55 = vmul.f32 %v4152_v27, %v5051_v41  ;;  %vm767_vm14 = vmor %vm765_vm13, %vm766_vm10  ;;  %v772_v23 = vor.u32 1.1754944e-38, %v771_v42 }
 0x14f   :  { %v1314_v16 = vpop.permute.xlu2 %1313  ;;  %v5875_v61 = vpop.permute.xlu0 %1291  ;;  %v764_v15 = vadd.f32 %v8721_v37, %v763_v53  ;;  %v806_v7 = vmul.f32 %v8727_v44, %v8726_v29  ;;  %v5910_v33 = vmul.f32 %v5508_v43, %v5051_v41  ;;  %vm770_vm15 = vcmp.eq.f32.partialorder %v769_v26, 8.507059e+37 }
 0x150   :  { %v918_v53 = vsel %vm917_vm12, %v8717_v31, %v914_v5  ;;  %v5916_v10 = vadd.f32 %v5806_v17, %v5568_v28  ;;  %v936_v42 = vand.u32 2147483648, %v8722_v21  ;;  %v928_v43 = vmul.f32 %v8723_v1, %v927_v45 }
 0x151   :  { %v768_v58 = vsel %vm767_vm14, %v8721_v37, %v764_v15  ;;  %v923_v46 = vsel %vm5883_vm11, %v922_v60, %v918_v53  ;;  %vm931_vm0 = vweird.f32 %v8723_v1  ;;  %v934_v28 = vand.u32 2147483647, %v8722_v21  ;;  %v8730_v53 = vld [vmem:[#allocation25_spill] sm:$0xff] }
 0x152   :  { %v773_v27 = vsel %vm770_vm15, %v772_v23, %v768_v58  ;;  %1153 = vst.msk [vmem:[%s8547_s3 + $0x88] sm:$0xff] %vm1135_vm3, %v923_v46  ;;  %v807_v4 = vsub.f32 1.0, %v806_v7  ;;  %vm930_vm1 = vweird.f32 %v8722_v21  ;;  %vm811_vm2 = vweird.f32 %v8727_v44 }
 0x153   :  { %1143 = vst.msk [vmem:[%s8547_s3 + $0x38] sm:$0xff] %vm1135_vm3, %v773_v27  ;;  %v929_v37 = vadd.f32 %v8723_v1, %v928_v43  ;;  %v971_v26 = vmul.f32 %v8729_v50, %v8728_v35  ;;  %v5951_v60 = vadd.f32 %v1294_v63, %v5614_v32  ;;  %v5954_v21 = vadd.f32 %v1314_v16, %v5636_v6  ;;  %vm932_vm4 = vmor %vm930_vm1, %vm931_vm0 }
 0x154   :  { %1513 = vrot.lane.b32.xlu1 %v5649_v3, %s4217_s29  ;;  %1515 = vrot.lane.b32.xlu2 %v5659_v9, %s4217_s29  ;;  %v5936_v3 = vmul.f32 %v5664_v0, %v5051_v41  ;;  %v814_v9 = vand.u32 2147483647, %v8726_v29  ;;  %v816_v0 = vand.u32 2147483648, %v8726_v29  ;;  %v5957_v15 = vstv %s5881_s13 }
 0x155   :  { %1511 = vrot.lane.b32.xlu0 %v5668_v48, %s4217_s29  ;;  %v808_v48 = vmul.f32 %v8727_v44, %v807_v4  ;;  %v937_v45 = vor.u32 1.1754944e-38, %v936_v42  ;;  %v933_v23 = vsel %vm932_vm4, %v8723_v1, %v929_v37  ;;  %vm935_vm5 = vcmp.eq.f32.partialorder %v934_v28, 8.507059e+37 }
 0x156   :  { %v1300_v17 = vpop.permute.xlu1 %1299  ;;  %vm810_vm6 = vweird.f32 %v8726_v29  ;;  %v956_v32 = vmul.f32 %v5472_v13, %v8730_v53  ;;  %v817_v6 = vor.u32 1.1754944e-38, %v816_v0  ;;  %v972_v16 = vsub.f32 1.0, %v971_v26 }
 0x157   :  { %v1320_v31 = vpop.permute.xlu2 %1319  ;;  %v1298_v5 = vpop.permute.xlu0 %1297  ;;  %v809_v7 = vadd.f32 %v8727_v44, %v808_v48  ;;  %v938_v63 = vsel %vm935_vm5, %v937_v45, %v933_v23  ;;  %vm812_vm7 = vmor %vm810_vm6, %vm811_vm2  ;;  %v964_v58 = vand.u32 2147483647, %v8730_v53  ;;  %v966_v46 = vand.u32 2147483648, %v8730_v53 }
 0x158   :  { %1154 = vst.msk [vmem:[%s8547_s3 + $0x90] sm:$0xff] %vm1135_vm3, %v938_v63  ;;  %vm815_vm8 = vcmp.eq.f32.partialorder %v814_v9, 8.507059e+37  ;;  %v5977_v29 = vadd.f32 %v5875_v61, %v5643_v49  ;;  %v5981_v27 = vmul.f32 %v5579_v14, %v5051_v41  ;;  %v957_v42 = vsub.f32 1.0, %v956_v32 }
 0x159   :  { %v813_v1 = vsel %vm812_vm7, %v8727_v44, %v809_v7  ;;  %v973_v49 = vmul.f32 %v8729_v50, %v972_v16  ;;  %vm976_vm9 = vweird.f32 %v8729_v50  ;;  %v979_v14 = vand.u32 2147483647, %v8728_v35  ;;  %v8732_v44 = vld [vmem:[#allocation24_spill] sm:$0xff] }
 0x15a   :  { %v818_v43 = vsel %vm815_vm8, %v817_v6, %v813_v1  ;;  %v981_v61 = vand.u32 2147483648, %v8728_v35  ;;  %vm960_vm10 = vweird.f32 %v8730_v53  ;;  %vm961_vm11 = vweird.f32 %v5472_v13  ;;  %v8735_v16 = vld [vmem:[#allocation20_spill] sm:$0xff] }
 0x15b   :  { %1146 = vst.msk [vmem:[%s8547_s3 + $0x50] sm:$0xff] %vm1135_vm3, %v818_v43  ;;  %vm6002_vm12 = vcmp.eq.f32.partialorder %v964_v58, 8.507059e+37  ;;  %v967_v48 = vor.u32 1.1754944e-38, %v966_v46  ;;  %v974_v0 = vadd.f32 %v8729_v50, %v973_v49  ;;  %vm975_vm13 = vweird.f32 %v8728_v35  ;;  %vm962_vm15 = vmor %vm960_vm10, %vm961_vm11  ;;  %v8736_v58 = vld [vmem:[#allocation23_spill] sm:$0xff] }
 0x15c   :  { %1519 = vrot.lane.b32.xlu1 %v5725_v59, %s4217_s29  ;;  %1521 = vrot.lane.b32.xlu2 %v5748_v54, %s4217_s29  ;;  %v958_v59 = vmul.f32 %v5472_v13, %v957_v42  ;;  %v8731_v54 = vld [vmem:[#allocation21_spill] sm:$0xff]  ;;  %vm977_vm14 = vmor %vm975_vm13, %vm976_vm9  ;;  %v982_v23 = vor.u32 1.1754944e-38, %v981_v61  ;;  %v6015_v32 = vadd.f32 %v1320_v31, %v5715_v30  ;;  %v6018_v63 = vadd.f32 %v1298_v5, %v5719_v18 }
 0x15d   :  { %1517 = vrot.lane.b32.xlu0 %v5758_v62, %s4217_s29  ;;  %v851_v28 = vmul.f32 %v8732_v44, %v8731_v54  ;;  %v6009_v62 = vadd.f32 %v1300_v17, %v5672_v22  ;;  %v978_v22 = vsel %vm977_vm14, %v8729_v50, %v974_v0  ;;  %vm980_vm0 = vcmp.eq.f32.partialorder %v979_v14, 8.507059e+37 }
 0x15e   :  { %v1306_v4 = vpop.permute.xlu1 %1305  ;;  %v959_v45 = vadd.f32 %v5472_v13, %v958_v59  ;;  %v1001_v35 = vmul.f32 %v5595_v51, %v5459_v40  ;;  %v1009_v6 = vand.u32 2147483647, %v5459_v40  ;;  %v983_v30 = vsel %vm980_vm0, %v982_v23, %v978_v22  ;;  %v8739_v23 = vld [vmem:[#allocation9_spill] sm:$0xff] }
 0x15f   :  { %v1326_v9 = vpop.permute.xlu2 %1325  ;;  %v1304_v26 = vpop.permute.xlu0 %1303  ;;  %v852_v7 = vsub.f32 1.0, %v851_v28  ;;  %1157 = vst.msk [vmem:[%s8547_s3 + $0xa8] sm:$0xff] %vm1135_vm3, %v983_v30  ;;  %vm856_vm1 = vweird.f32 %v8732_v44  ;;  %v1011_v5 = vand.u32 2147483648, %v5459_v40  ;;  %v861_v53 = vand.u32 2147483648, %v8731_v54 }
 0x160   :  { %v963_v17 = vsel %vm962_vm15, %v5472_v13, %v959_v45  ;;  %v859_v13 = vand.u32 2147483647, %v8731_v54  ;;  %v1002_v50 = vsub.f32 1.0, %v1001_v35  ;;  %v1016_v46 = vmul.f32 %v8736_v58, %v8735_v16 }
 0x161   :  { %v968_v18 = vsel %vm6002_vm12, %v967_v48, %v963_v17  ;;  %v853_v31 = vmul.f32 %v8732_v44, %v852_v7  ;;  %v6050_v1 = vmul.f32 %v5754_v57, %v5051_v41  ;;  %v6054_v42 = vmul.f32 %v5655_v24, %v5051_v41  ;;  %v8740_v7 = vld [vmem:[#allocation32_spill] sm:$0xff] }
 0x162   :  { %1156 = vst.msk [vmem:[%s8547_s3 + $0xa0] sm:$0xff] %vm1135_vm3, %v968_v18  ;;  %vm855_vm2 = vweird.f32 %v8731_v54  ;;  %v1003_v49 = vmul.f32 %v5595_v51, %v1002_v50  ;;  %vm1006_vm4 = vweird.f32 %v5595_v51  ;;  %v862_v57 = vor.u32 1.1754944e-38, %v861_v53  ;;  %v8741_v18 = vld [vmem:[#allocation8_spill] sm:$0xff] }
 0x163   :  { %v854_v43 = vadd.f32 %v8732_v44, %v853_v31  ;;  %vm857_vm5 = vmor %vm855_vm2, %vm856_vm1  ;;  %vm1005_vm6 = vweird.f32 %v5459_v40  ;;  %vm6069_vm7 = vcmp.eq.f32.partialorder %v1009_v6, 8.507059e+37  ;;  %vm860_vm8 = vcmp.eq.f32.partialorder %v859_v13, 8.507059e+37  ;;  %v8742_v31 = vld [vmem:[#allocation28_spill] sm:$0xff] }
 0x164   :  { %1525 = vrot.lane.b32.xlu1 %v5812_v25, %s4217_s29  ;;  %v1017_v25 = vsub.f32 1.0, %v1016_v46  ;;  %v6075_v59 = vadd.f32 %v1306_v4, %v5764_v56  ;;  %v1004_v28 = vadd.f32 %v5595_v51, %v1003_v49  ;;  %v1012_v37 = vor.u32 1.1754944e-38, %v1011_v5  ;;  %vm1007_vm9 = vmor %vm1005_vm6, %vm1006_vm4 }
 0x165   :  { %1523 = vrot.lane.b32.xlu0 %v5847_v36, %s4217_s29  ;;  %v858_v36 = vsel %vm857_vm5, %v8732_v44, %v854_v43  ;;  %vm1021_vm10 = vweird.f32 %v8736_v58  ;;  %v1024_v56 = vand.u32 2147483647, %v8735_v16  ;;  %v1026_v44 = vand.u32 2147483648, %v8735_v16 }
 0x166   :  { %v6064_v14 = vpop.permute.xlu1 %1311  ;;  %v863_v48 = vsel %vm860_vm8, %v862_v57, %v858_v36  ;;  %v1018_v40 = vmul.f32 %v8736_v58, %v1017_v25  ;;  %v6091_v4 = vadd.f32 %v1326_v9, %v5793_v2  ;;  %v6094_v0 = vadd.f32 %v1304_v26, %v5797_v8 }
 0x167   :  { %v6066_v24 = vpop.permute.xlu2 %1331  ;;  %v6077_v54 = vpop.permute.xlu0 %1309  ;;  %1149 = vst.msk [vmem:[%s8547_s3 + $0x68] sm:$0xff] %vm1135_vm3, %v863_v48  ;;  %v1008_v45 = vsel %vm1007_vm9, %v5595_v51, %v1004_v28  ;;  %v896_v22 = vmul.f32 %v8740_v7, %v8739_v23  ;;  %v1054_v35 = vand.u32 2147483647, %v5553_v20  ;;  %vm1020_vm11 = vweird.f32 %v8735_v16 }
 0x168   :  { %v1013_v17 = vsel %vm6069_vm7, %v1012_v37, %v1008_v45  ;;  %v1019_v6 = vadd.f32 %v8736_v58, %v1018_v40  ;;  %v1046_v51 = vmul.f32 %v5681_v47, %v5553_v20  ;;  %vm1022_vm12 = vmor %vm1020_vm11, %vm1021_vm10  ;;  %vm1025_vm13 = vcmp.eq.f32.partialorder %v1024_v56, 8.507059e+37 }
 0x169   :  { %1159 = vst.msk [vmem:[%s8547_s3 + $0xb8] sm:$0xff] %vm1135_vm3, %v1013_v17  ;;  %v1027_v2 = vor.u32 1.1754944e-38, %v1026_v44  ;;  %v897_v8 = vsub.f32 1.0, %v896_v22  ;;  %v904_v26 = vand.u32 2147483647, %v8739_v23  ;;  %v906_v30 = vand.u32 2147483648, %v8739_v23 }
 0x16a   :  { %v1023_v9 = vsel %vm1022_vm12, %v8736_v58, %v1019_v6  ;;  %v1061_v13 = vmul.f32 %v8742_v31, %v8741_v18  ;;  %v1047_v50 = vsub.f32 1.0, %v1046_v51  ;;  %vm901_vm14 = vweird.f32 %v8740_v7  ;;  %v8747_v6 = vld [vmem:[#allocation29_spill] sm:$0xff]  ;;  %v8748_v51 = vld [vmem:[#allocation35_spill] sm:$0xff] }
 0x16b   :  { %v1028_v5 = vsel %vm1025_vm13, %v1027_v2, %v1023_v9  ;;  %v898_v53 = vmul.f32 %v8740_v7, %v897_v8  ;;  %vm1050_vm15 = vweird.f32 %v5553_v20  ;;  %v1056_v58 = vand.u32 2147483648, %v5553_v20 }
 0x16c   :  { %1160 = vst.msk [vmem:[%s8547_s3 + $0xc0] sm:$0xff] %vm1135_vm3, %v1028_v5  ;;  %vm900_vm0 = vweird.f32 %v8739_v23  ;;  %v1062_v43 = vsub.f32 1.0, %v1061_v13  ;;  %v1048_v25 = vmul.f32 %v5681_v47, %v1047_v50  ;;  %vm1051_vm1 = vweird.f32 %v5681_v47 }
 0x16d   :  { %v899_v61 = vadd.f32 %v8740_v7, %v898_v53  ;;  %vm6132_vm2 = vcmp.eq.f32.partialorder %v1054_v35, 8.507059e+37  ;;  %vm902_vm4 = vmor %vm900_vm0, %vm901_vm14  ;;  %vm905_vm5 = vcmp.eq.f32.partialorder %v904_v26, 8.507059e+37  ;;  %v907_v28 = vor.u32 1.1754944e-38, %v906_v30  ;;  %v8749_v53 = vld [vmem:[#allocation26_spill] sm:$0xff] }
 0x16e   :  { %v6117_v16 = vpop.permute.xlu1 %1317  ;;  %vm1066_vm6 = vweird.f32 %v8742_v31  ;;  %v1063_v40 = vmul.f32 %v8742_v31, %v1062_v43  ;;  %vm1052_vm7 = vmor %vm1050_vm15, %vm1051_vm1  ;;  %v1057_v56 = vor.u32 1.1754944e-38, %v1056_v58  ;;  %vm1065_vm8 = vweird.f32 %v8741_v18 }
 0x16f   :  { %v1468_v46 = vpop.permute.xlu2 %1467  ;;  %v6127_v57 = vpop.permute.xlu0 %1315  ;;  %v903_v48 = vsel %vm902_vm4, %v8740_v7, %v899_v61  ;;  %v1069_v45 = vand.u32 2147483647, %v8741_v18  ;;  %v1071_v17 = vand.u32 2147483648, %v8741_v18  ;;  %vm1095_vm9 = vweird.f32 %v5625_v19  ;;  %vm6158_vm10 = vmor %vm1065_vm8, %vm1066_vm6 }
 0x170   :  { %v1561_v49 = vadd.f32 %v1468_v46, %v5712_v52  ;;  %v1049_v52 = vadd.f32 %v5681_v47, %v1048_v25  ;;  %v908_v44 = vsel %vm905_vm5, %v907_v28, %v903_v48  ;;  %v1064_v7 = vadd.f32 %v8742_v31, %v1063_v40  ;;  %v8750_v46 = vld [vmem:[#allocation34_spill] sm:$0xff]  ;;  %v8751_v25 = vld [vmem:[#allocation45_spill] sm:$0xff] }
 0x171   :  { %1152 = vst.msk [vmem:[%s8547_s3 + $0x80] sm:$0xff] %vm1135_vm3, %v908_v44  ;;  %v1099_v35 = vand.u32 2147483647, %v5625_v19  ;;  %v941_v2 = vmul.f32 %v8748_v51, %v8747_v6  ;;  %v1101_v8 = vand.u32 2147483648, %v5625_v19  ;;  %v1072_v26 = vor.u32 1.1754944e-38, %v1071_v17 }
 0x172   :  { %v1595_v37 = vadd.f32 %v5957_v15, %v1561_v49  ;;  %v1053_v22 = vsel %vm1052_vm7, %v5681_v47, %v1049_v52  ;;  %v1068_v9 = vsel %vm6158_vm10, %v8742_v31, %v1064_v7  ;;  %v949_v50 = vand.u32 2147483647, %v8747_v6  ;;  %v8754_v47 = vld [vmem:[#allocation33_spill] sm:$0xff] }
 0x173   :  { %v1058_v20 = vsel %vm6132_vm2, %v1057_v56, %v1053_v22  ;;  %v942_v13 = vsub.f32 1.0, %v941_v2  ;;  %v951_v5 = vand.u32 2147483648, %v8747_v6  ;;  %v1106_v58 = vmul.f32 %v8750_v46, %v8749_v53  ;;  %v8755_v2 = vld [vmem:[#allocation38_spill] sm:$0xff] }
 0x174   :  { %v3667_v23 = vmul.f32 -1.442695, %v1595_v37  ;;  %1162 = vst.msk [vmem:[%s8547_s3 + $0xd0] sm:$0xff] %vm1135_vm3, %v1058_v20  ;;  %v1091_v61 = vmul.f32 %v8751_v25, %v5625_v19  ;;  %vm1070_vm11 = vcmp.eq.f32.partialorder %v1069_v45, 8.507059e+37  ;;  %vm945_vm12 = vweird.f32 %v8747_v6 }
 0x175   :  { %v1073_v31 = vsel %vm1070_vm11, %v1072_v26, %v1068_v9  ;;  %v943_v36 = vmul.f32 %v8748_v51, %v942_v13  ;;  %vm946_vm13 = vweird.f32 %v8748_v51  ;;  %vm1110_vm14 = vweird.f32 %v8749_v53 }
 0x176   :  { %3865 = vpow2.f32 %v3667_v23  ;;  %v6172_v30 = vpop.permute.xlu1 %1323  ;;  %v1092_v37 = vsub.f32 1.0, %v1091_v61  ;;  %vm1096_vm15 = vweird.f32 %v8751_v25  ;;  %1163 = vst.msk [vmem:[%s8547_s3 + $0xd8] sm:$0xff] %vm1135_vm3, %v1073_v31  ;;  %vm6194_vm0 = vcmp.eq.f32.partialorder %v949_v50, 8.507059e+37  ;;  %vm947_vm2 = vmor %vm945_vm12, %vm946_vm13  ;;  %v8758_v31 = vld [vmem:[#allocation47_spill] sm:$0xff] }
 0x177   :  { %v1474_v18 = vpop.permute.xlu2 %1473  ;;  %v6179_v49 = vpop.permute.xlu0 %1321  ;;  %v944_v52 = vadd.f32 %v8748_v51, %v943_v36  ;;  %v952_v40 = vor.u32 1.1754944e-38, %v951_v5  ;;  %vm1111_vm1 = vweird.f32 %v8750_v46  ;;  %v1116_v22 = vand.u32 2147483648, %v8749_v53  ;;  %vm6215_vm4 = vmor %vm1095_vm9, %vm1096_vm15 }
 0x178   :  { %v1564_v43 = vadd.f32 %v1474_v18, %v5804_v34  ;;  %v1107_v34 = vsub.f32 1.0, %v1106_v58  ;;  %v1093_v45 = vmul.f32 %v8751_v25, %v1092_v37  ;;  %v1114_v20 = vand.u32 2147483647, %v8749_v53  ;;  %vm1112_vm6 = vmor %vm1110_vm14, %vm1111_vm1 }
 0x179   :  { %v948_v17 = vsel %vm947_vm2, %v8748_v51, %v944_v52  ;;  %v986_v9 = vmul.f32 %v8755_v2, %v8754_v47  ;;  %v6225_v13 = vmul.f32 %v5843_v12, %v5051_v41  ;;  %vm1100_vm5 = vcmp.eq.f32.partialorder %v1099_v35, 8.507059e+37 }
 0x17a   :  { %v1598_v28 = vadd.f32 %v5957_v15, %v1564_v43  ;;  %v1108_v23 = vmul.f32 %v8750_v46, %v1107_v34  ;;  %v1094_v26 = vadd.f32 %v8751_v25, %v1093_v45  ;;  %v953_v18 = vsel %vm6194_vm0, %v952_v40, %v948_v17 }
 0x17b   :  { %v1102_v19 = vor.u32 1.1754944e-38, %v1101_v8  ;;  %1155 = vst.msk [vmem:[%s8547_s3 + $0x98] sm:$0xff] %vm1135_vm3, %v953_v18  ;;  %v1117_v8 = vor.u32 1.1754944e-38, %v1116_v22  ;;  %v6246_v61 = vadd.f32 %v6064_v14, %v5879_v38  ;;  %v6250_v36 = vmul.f32 %v8758_v31, %v5051_v41 }
 0x17c   :  { %v3866_v56 = vpop.eup %3865  ;;  %v3670_v44 = vmul.f32 -1.442695, %v1598_v28  ;;  %v1109_v51 = vadd.f32 %v8750_v46, %v1108_v23  ;;  %v1098_v12 = vsel %vm6215_vm4, %v8751_v25, %v1094_v26  ;;  %vm1115_vm7 = vcmp.eq.f32.partialorder %v1114_v20, 8.507059e+37  ;;  %v8760_v25 = vld [vmem:[#allocation43_spill] sm:$0xff]  ;;  %v8761_v20 = vld [vmem:[#allocation10_spill] sm:$0xff] }
 0x17d   :  { %v6204_v7 = vadd.f32 1.0, %v3866_v56  ;;  %v1103_v53 = vsel %vm1100_vm5, %v1102_v19, %v1098_v12  ;;  %v987_v38 = vsub.f32 1.0, %v986_v9  ;;  %v6263_v14 = vadd.f32 %v6077_v54, %v5910_v33 }
 0x17e   :  { %3867 = vpow2.f32 %v3670_v44  ;;  %v6227_v50 = vpop.permute.xlu1 %1329  ;;  %v1113_v35 = vsel %vm1112_vm6, %v8750_v46, %v1109_v51  ;;  %1165 = vst.msk [vmem:[%s8547_s3 + $0xe8] sm:$0xff] %vm1135_vm3, %v1103_v53  ;;  %v994_v41 = vand.u32 2147483647, %v8754_v47  ;;  %v6275_v52 = vadd.f32 %v6127_v57, %v5981_v27  ;;  %v8762_v51 = vld [vmem:[#allocation39_spill] sm:$0xff] }
 0x17f   :  { %3869 = vrcp.f32 %v6204_v7  ;;  %v1480_v5 = vpop.permute.xlu2 %1479  ;;  %v6238_v43 = vpop.permute.xlu0 %1327  ;;  %v1118_v46 = vsel %vm1115_vm7, %v1117_v8, %v1113_v35  ;;  %v988_v33 = vmul.f32 %v8755_v2, %v987_v38  ;;  %vm991_vm8 = vweird.f32 %v8755_v2 }
 0x180   :  { %v1567_v58 = vadd.f32 %v1480_v5, %v5916_v10  ;;  %v6254_v10 = vadd.f32 %v6066_v24, %v5902_v55  ;;  %1166 = vst.msk [vmem:[%s8547_s3 + $0xf0] sm:$0xff] %vm1135_vm3, %v1118_v46  ;;  %v996_v55 = vand.u32 2147483648, %v8754_v47  ;;  %v8759_v24 = vld [vmem:[#allocation37_spill] sm:$0xff]  ;;  %vm1788_vm9 = vweird.f32 %v6204_v7 }
 0x181   :  { %v1031_v37 = vmul.f32 %v8760_v25, %v8759_v24  ;;  %v1792_v56 = vand.u32 2147483647, %v6204_v7  ;;  %vm990_vm10 = vweird.f32 %v8754_v47  ;;  %v989_v27 = vadd.f32 %v8755_v2, %v988_v33 }
 0x182   :  { %v1601_v28 = vadd.f32 %v5957_v15, %v1567_v58  ;;  %v1794_v22 = vand.u32 2147483648, %v6204_v7  ;;  %vm992_vm11 = vmor %vm990_vm10, %vm991_vm8  ;;  %vm995_vm12 = vcmp.eq.f32.partialorder %v994_v41, 8.507059e+37  ;;  %v997_v17 = vor.u32 1.1754944e-38, %v996_v55 }
 0x183   :  { %v1032_v57 = vsub.f32 1.0, %v1031_v37  ;;  %v993_v18 = vsel %vm992_vm11, %v8755_v2, %v989_v27  ;;  %vm6292_vm14 = vcmp.eq.f32.partialorder %v1792_v56, 8.507059e+37  ;;  %vm1035_vm15 = vweird.f32 %v8759_v24 }
 0x184   :  { %v3868_v34 = vpop.eup %3867  ;;  %v3673_v48 = vmul.f32 -1.442695, %v1601_v28  ;;  %v998_v58 = vsel %vm995_vm12, %v997_v17, %v993_v18  ;;  %v1795_v31 = vor.u32 1.1754944e-38, %v1794_v22  ;;  %v1039_v53 = vand.u32 2147483647, %v8759_v24  ;;  %v8767_v17 = vld [vmem:[#allocation30_spill] sm:$0xff] }
 0x185   :  { %v3870_v54 = vpop.eup %3869  ;;  %v6279_v40 = vadd.f32 1.0, %v3868_v34  ;;  %1158 = vst.msk [vmem:[%s8547_s3 + $0xb0] sm:$0xff] %vm1135_vm3, %v998_v58  ;;  %vm1036_vm0 = vweird.f32 %v8760_v25  ;;  %v1041_v33 = vand.u32 2147483648, %v8759_v24  ;;  %v6337_v58 = vadd.f32 %v6179_v49, %v6054_v42 }
 0x186   :  { %3871 = vpow2.f32 %v3673_v48  ;;  %v1784_v44 = vmul.f32 %v3870_v54, %v6204_v7  ;;  %v1466_v45 = vpop.permute.xlu1 %1465  ;;  %vm1789_vm13 = vweird.f32 %v3870_v54  ;;  %vm6320_vm2 = vcmp.eq.f32.partialorder %v1039_v53, 8.507059e+37  ;;  %vm1037_vm5 = vmor %vm1035_vm15, %vm1036_vm0 }
 0x187   :  { %3873 = vrcp.f32 %v6279_v40  ;;  %v1486_v23 = vpop.permute.xlu2 %1485  ;;  %v1560_v9 = vadd.f32 %v1466_v45, %v8761_v20  ;;  %v1464_v47 = vpop.permute.xlu0 %1463  ;;  %vm1790_vm1 = vmor %vm1788_vm9, %vm1789_vm13  ;;  %v1837_v48 = vand.u32 2147483647, %v6279_v40  ;;  %v1839_v7 = vand.u32 2147483648, %v6279_v40 }
 0x188   :  { %v1570_v26 = vadd.f32 %v1486_v23, %v5977_v29  ;;  %v1785_v6 = vsub.f32 1.0, %v1784_v44  ;;  %v1559_v5 = vadd.f32 %v1464_v47, %v8762_v51  ;;  %v1033_v29 = vmul.f32 %v8760_v25, %v1032_v57  ;;  %v8768_v47 = vld [vmem:[#allocation42_spill] sm:$0xff] }
 0x189   :  { %v1594_v12 = vadd.f32 %v5957_v15, %v1560_v9  ;;  %v1042_v18 = vor.u32 1.1754944e-38, %v1041_v33  ;;  %vm1833_vm6 = vweird.f32 %v6279_v40  ;;  %vm1838_vm8 = vcmp.eq.f32.partialorder %v1837_v48, 8.507059e+37 }
 0x18a   :  { %v1604_v35 = vadd.f32 %v5957_v15, %v1570_v26  ;;  %v1786_v8 = vmul.f32 %v3870_v54, %v1785_v6  ;;  %v1593_v2 = vadd.f32 %v5957_v15, %v1559_v5  ;;  %v1034_v27 = vadd.f32 %v8760_v25, %v1033_v29 }
 0x18b   :  { %v3666_v46 = vmul.f32 -1.442695, %v1594_v12  ;;  %v6341_v12 = vadd.f32 %v6238_v43, %v6250_v36  ;;  %v1840_v36 = vor.u32 1.1754944e-38, %v1839_v7 }
 0x18c   :  { %v3872_v28 = vpop.eup %3871  ;;  %v3676_v38 = vmul.f32 -1.442695, %v1604_v35  ;;  %v1787_v41 = vadd.f32 %v3870_v54, %v1786_v8  ;;  %v3665_v34 = vmul.f32 -1.442695, %v1593_v2  ;;  %v1038_v19 = vsel %vm1037_vm5, %v8760_v25, %v1034_v27 }
 0x18d   :  { %v3874_v55 = vpop.eup %3873  ;;  %v6307_v37 = vadd.f32 1.0, %v3872_v28  ;;  %3875 = vpow2.f32 %v3666_v46  ;;  %v1043_v24 = vsel %vm6320_vm2, %v1042_v18, %v1038_v19 }
 0x18e   :  { %v1791_v56 = vsel %vm1790_vm1, %v3870_v54, %v1787_v41  ;;  %v1829_v44 = vmul.f32 %v3874_v55, %v6279_v40  ;;  %v1472_v57 = vpop.permute.xlu1 %1471  ;;  %vm1834_vm4 = vweird.f32 %v3874_v55  ;;  %1161 = vst.msk [vmem:[%s8547_s3 + $0xc8] sm:$0xff] %vm1135_vm3, %v1043_v24 }
 0x18f   :  { %3877 = vrcp.f32 %v6307_v37  ;;  %v1492_v45 = vpop.permute.xlu2 %1491  ;;  %v1796_v23 = vsel %vm6292_vm14, %v1795_v31, %v1791_v56  ;;  %v1563_v54 = vadd.f32 %v1472_v57, %v8767_v17  ;;  %v1470_v9 = vpop.permute.xlu0 %1469  ;;  %vm6356_vm7 = vmor %vm1833_vm6, %vm1834_vm4  ;;  %vm1878_vm9 = vweird.f32 %v6307_v37  ;;  %v8771_v56 = vld [vmem:[#allocation36_spill] sm:$0xff] }
 0x190   :  { %3879 = vpow2.f32 %v3676_v38  ;;  %v1573_v20 = vadd.f32 %v1492_v45, %v6018_v63  ;;  %2269 = vrot.lane.b32.xlu1 %v1796_v23, %s4218_s21  ;;  %v1830_v26 = vsub.f32 1.0, %v1829_v44  ;;  %v1562_v6 = vadd.f32 %v1470_v9, %v8768_v47  ;;  %v8772_v23 = vld [vmem:[#allocation48_spill] sm:$0xff] }
 0x191   :  { %3881 = vpow2.f32 %v3665_v34  ;;  %v1597_v51 = vadd.f32 %v5957_v15, %v1563_v54  ;;  %v1882_v28 = vand.u32 2147483647, %v6307_v37  ;;  %v1884_v57 = vand.u32 2147483648, %v6307_v37 }
 0x192   :  { %v1607_v5 = vadd.f32 %v5957_v15, %v1573_v20  ;;  %v1831_v63 = vmul.f32 %v3874_v55, %v1830_v26  ;;  %v1596_v35 = vadd.f32 %v5957_v15, %v1562_v6 }
 0x193   :  { %v3876_v8 = vpop.eup %3875  ;;  %v3669_v29 = vmul.f32 -1.442695, %v1597_v51  ;;  %vm6384_vm11 = vcmp.eq.f32.partialorder %v1882_v28, 8.507059e+37 }
 0x194   :  { %v3679_v2 = vmul.f32 -1.442695, %v1607_v5  ;;  %v1832_v31 = vadd.f32 %v3874_v55, %v1831_v63  ;;  %v6353_v49 = vadd.f32 1.0, %v3876_v8  ;;  %v3668_v41 = vmul.f32 -1.442695, %v1596_v35 }
 0x195   :  { %v6351_v42 = vpop.eup %3877  ;;  %3883 = vpow2.f32 %v3669_v29  ;;  %v1885_v5 = vor.u32 1.1754944e-38, %v1884_v57 }
 0x196   :  { %v3880_v25 = vpop.eup %3879  ;;  %v1836_v40 = vsel %vm6356_vm7, %v3874_v55, %v1832_v31  ;;  %v1874_v53 = vmul.f32 %v6351_v42, %v6307_v37  ;;  %3885 = vrcp.f32 %v6353_v49  ;;  %v1478_v34 = vpop.permute.xlu1 %1477  ;;  %vm1879_vm10 = vweird.f32 %v6351_v42 }
 0x197   :  { %v3882_v46 = vpop.eup %3881  ;;  %v6367_v38 = vadd.f32 1.0, %v3880_v25  ;;  %v1498_v48 = vpop.permute.xlu2 %1497  ;;  %v1841_v33 = vsel %vm1838_vm8, %v1840_v36, %v1836_v40  ;;  %3887 = vpow2.f32 %v3679_v2  ;;  %v1566_v44 = vadd.f32 %v1478_v34, %v8771_v56  ;;  %vm6401_vm13 = vmor %vm1878_vm9, %vm1879_vm10 }
 0x198   :  { %v1576_v27 = vadd.f32 %v1498_v48, %v6094_v0  ;;  %v1476_v55 = vpop.permute.xlu0 %1475  ;;  %2275 = vrot.lane.b32.xlu1 %v1841_v33, %s4218_s21  ;;  %v6374_v45 = vadd.f32 1.0, %v3882_v46  ;;  %v1875_v22 = vsub.f32 1.0, %v1874_v53  ;;  %v1779_v0 = vand.u32 2147483648, %v6353_v49 }
 0x199   :  { %3889 = vrcp.f32 %v6367_v38  ;;  %v1565_v7 = vadd.f32 %v1476_v55, %v8772_v23  ;;  %v1600_v17 = vadd.f32 %v5957_v15, %v1566_v44  ;;  %v1777_v26 = vand.u32 2147483647, %v6353_v49 }
 0x19a   :  { %v1610_v54 = vadd.f32 %v5957_v15, %v1576_v27  ;;  %3891 = vpow2.f32 %v3668_v41  ;;  %v1876_v9 = vmul.f32 %v6351_v42, %v1875_v22  ;;  %vm1773_vm12 = vweird.f32 %v6353_v49  ;;  %v8779_v41 = vld [vmem:[#allocation40_spill] sm:$0xff] }
 0x19b   :  { %v1599_v20 = vadd.f32 %v5957_v15, %v1565_v7  ;;  %v3884_v47 = vpop.eup %3883  ;;  %v3672_v6 = vmul.f32 -1.442695, %v1600_v17  ;;  %3893 = vrcp.f32 %v6374_v45  ;;  %v6395_v24 = vor.u32 1.1754944e-38, %v1779_v0 }
 0x19c   :  { %v3682_v18 = vmul.f32 -1.442695, %v1610_v54  ;;  %v6388_v63 = vpop.eup %3885  ;;  %v6391_v19 = vadd.f32 1.0, %v3884_v47  ;;  %v1877_v35 = vadd.f32 %v6351_v42, %v1876_v9  ;;  %v1927_v43 = vand.u32 2147483647, %v6367_v38 }
 0x19d   :  { %v3888_v8 = vpop.eup %3887  ;;  %3895 = vpow2.f32 %v3672_v6  ;;  %v3671_v29 = vmul.f32 -1.442695, %v1599_v20  ;;  %v1769_v31 = vmul.f32 %v6388_v63, %v6353_v49  ;;  %vm1774_vm14 = vweird.f32 %v6388_v63 }
 0x19e   :  { %v6410_v25 = vadd.f32 1.0, %v3888_v8  ;;  %v1484_v40 = vpop.permute.xlu1 %1483  ;;  %v1881_v28 = vsel %vm6401_vm13, %v6351_v42, %v1877_v35  ;;  %vm6416_vm15 = vcmp.eq.f32.partialorder %v1777_v26, 8.507059e+37  ;;  %vm1923_vm0 = vweird.f32 %v6367_v38  ;;  %vm6454_vm4 = vmor %vm1773_vm12, %vm1774_vm14 }
 0x19f   :  { %v6408_v36 = vpop.eup %3889  ;;  %v1504_v53 = vpop.permute.xlu2 %1503  ;;  %v1929_v46 = vand.u32 2147483648, %v6367_v38  ;;  %3897 = vpow2.f32 %v3682_v18  ;;  %v1569_v34 = vadd.f32 %v1484_v40, %v8779_v41  ;;  %v1886_v56 = vsel %vm6384_vm11, %v1885_v5, %v1881_v28  ;;  %v8784_v28 = vld [vmem:[#allocation44_spill] sm:$0xff] }
 0x1a0   :  { %v1579_v48 = vadd.f32 %v1504_v53, %v6263_v14  ;;  %v1482_v33 = vpop.permute.xlu0 %1481  ;;  %v3892_v42 = vpop.eup %3891  ;;  %3899 = vrcp.f32 %v6391_v19  ;;  %2281 = vrot.lane.b32.xlu1 %v1886_v56, %s4218_s21  ;;  %v1770_v27 = vsub.f32 1.0, %v1769_v31  ;;  %v1919_v55 = vmul.f32 %v6408_v36, %v6367_v38 }
 0x1a1   :  { %v1568_v44 = vadd.f32 %v1482_v33, %v5873_v39  ;;  %v6431_v57 = vadd.f32 1.0, %v3892_v42  ;;  %3901 = vpow2.f32 %v3671_v29  ;;  %v1603_v14 = vadd.f32 %v5957_v15, %v1569_v34  ;;  %v6435_v7 = vpop.eup %3893 }
 0x1a2   :  { %v1613_v23 = vadd.f32 %v5957_v15, %v1579_v48  ;;  %v1771_v17 = vmul.f32 %v6388_v63, %v1770_v27  ;;  %v1920_v39 = vsub.f32 1.0, %v1919_v55  ;;  %vm6439_vm1 = vcmp.eq.f32.partialorder %v1927_v43, 8.507059e+37 }
 0x1a3   :  { %v1602_v22 = vadd.f32 %v5957_v15, %v1568_v44  ;;  %v3896_v0 = vpop.eup %3895  ;;  %3903 = vrcp.f32 %v6410_v25  ;;  %v3675_v20 = vmul.f32 -1.442695, %v1603_v14  ;;  %vm1924_vm2 = vweird.f32 %v6408_v36 }
 0x1a4   :  { %v3685_v9 = vmul.f32 -1.442695, %v1613_v23  ;;  %3905 = vrcp.f32 %v6431_v57  ;;  %v6446_v26 = vadd.f32 1.0, %v3896_v0  ;;  %v1772_v47 = vadd.f32 %v6388_v63, %v1771_v17  ;;  %vm1925_vm7 = vmor %vm1923_vm0, %vm1924_vm2 }
 0x1a5   :  { %v1921_v6 = vmul.f32 %v6408_v36, %v1920_v39  ;;  %v3898_v18 = vpop.eup %3897  ;;  %3907 = vpow2.f32 %v3675_v20  ;;  %v3674_v51 = vmul.f32 -1.442695, %v1602_v22  ;;  %v1930_v35 = vor.u32 1.1754944e-38, %v1929_v46 }
 0x1a6   :  { %v1754_v8 = vmul.f32 %v6435_v7, %v6374_v45  ;;  %v6460_v29 = vpop.eup %3899  ;;  %v6462_v2 = vadd.f32 1.0, %v3898_v18  ;;  %v1490_v31 = vpop.permute.xlu1 %1489  ;;  %v1776_v40 = vsel %vm6454_vm4, %v6388_v63, %v1772_v47  ;;  %vm1758_vm5 = vweird.f32 %v6374_v45 }
 0x1a7   :  { %v1510_v43 = vpop.permute.xlu2 %1509  ;;  %v1922_v49 = vadd.f32 %v6408_v36, %v1921_v6  ;;  %vm1759_vm6 = vweird.f32 %v6435_v7  ;;  %v3902_v53 = vpop.eup %3901  ;;  %3909 = vpow2.f32 %v3685_v9  ;;  %v1572_v46 = vadd.f32 %v1490_v31, %v8784_v28  ;;  %v8787_v31 = vld [vmem:[#allocation49_spill] sm:$0xff] }
 0x1a8   :  { %v1582_v41 = vadd.f32 %v1510_v43, %v6275_v52  ;;  %v1488_v34 = vpop.permute.xlu0 %1487  ;;  %v1781_v48 = vsel %vm6416_vm15, %v6395_v24, %v1776_v40  ;;  %3911 = vrcp.f32 %v6446_v26  ;;  %v6480_v63 = vadd.f32 1.0, %v3902_v53  ;;  %vm1760_vm10 = vmor %vm1758_vm5, %vm1759_vm6 }
 0x1a9   :  { %v1571_v33 = vadd.f32 %v1488_v34, %v5951_v60  ;;  %2267 = vrot.lane.b32.xlu0 %v1781_v48, %s4218_s21  ;;  %v1926_v52 = vsel %vm1925_vm7, %v6408_v36, %v1922_v49  ;;  %v6485_v56 = vpop.eup %3903  ;;  %3913 = vpow2.f32 %v3674_v51  ;;  %v1606_v24 = vadd.f32 %v5957_v15, %v1572_v46 }
 0x1aa   :  { %v1616_v37 = vadd.f32 %v5957_v15, %v1582_v41  ;;  %v1931_v38 = vsel %vm6439_vm1, %v1930_v35, %v1926_v52  ;;  %v6491_v42 = vpop.eup %3905  ;;  %3915 = vrcp.f32 %v6462_v2  ;;  %v1755_v44 = vsub.f32 1.0, %v1754_v8 }
 0x1ab   :  { %v1605_v60 = vadd.f32 %v5957_v15, %v1571_v33  ;;  %2287 = vrot.lane.b32.xlu1 %v1931_v38, %s4218_s21  ;;  %v1762_v36 = vand.u32 2147483647, %v6374_v45  ;;  %v3908_v27 = vpop.eup %3907  ;;  %v3678_v55 = vmul.f32 -1.442695, %v1606_v24  ;;  %v1764_v23 = vand.u32 2147483648, %v6374_v45 }
 0x1ac   :  { %v3688_v14 = vmul.f32 -1.442695, %v1616_v37  ;;  %v1814_v22 = vmul.f32 %v6460_v29, %v6391_v19  ;;  %3917 = vrcp.f32 %v6480_v63  ;;  %v6501_v17 = vadd.f32 1.0, %v3908_v27 }
 0x1ad   :  { %v3677_v39 = vmul.f32 -1.442695, %v1605_v60  ;;  %v1756_v54 = vmul.f32 %v6435_v7, %v1755_v44  ;;  %v3910_v0 = vpop.eup %3909  ;;  %3919 = vpow2.f32 %v3678_v55  ;;  %vm6504_vm8 = vcmp.eq.f32.partialorder %v1762_v36, 8.507059e+37 }
 0x1ae   :  { %v1765_v9 = vor.u32 1.1754944e-38, %v1764_v23  ;;  %v1815_v47 = vsub.f32 1.0, %v1814_v22  ;;  %v6508_v6 = vpop.eup %3911  ;;  %3921 = vrcp.f32 %v6501_v17  ;;  %v6511_v18 = vadd.f32 1.0, %v3910_v0  ;;  %v1496_v5 = vpop.permute.xlu1 %1495 }
 0x1af   :  { %v1757_v51 = vadd.f32 %v6435_v7, %v1756_v54  ;;  %v1516_v35 = vpop.permute.xlu2 %1515  ;;  %vm1818_vm9 = vweird.f32 %v6391_v19  ;;  %v3914_v8 = vpop.eup %3913  ;;  %3923 = vpow2.f32 %v3688_v14  ;;  %v1575_v43 = vadd.f32 %v1496_v5, %v8787_v31 }
 0x1b0   :  { %v1585_v40 = vadd.f32 %v1516_v35, %v6337_v58  ;;  %v1494_v49 = vpop.permute.xlu0 %1493  ;;  %v1816_v53 = vmul.f32 %v6460_v29, %v1815_v47  ;;  %v6522_v28 = vpop.eup %3915  ;;  %v6524_v46 = vadd.f32 1.0, %v3914_v8  ;;  %vm1819_vm11 = vweird.f32 %v6460_v29 }
 0x1b1   :  { %v1761_v41 = vsel %vm1760_vm10, %v6435_v7, %v1757_v51  ;;  %v1574_v34 = vadd.f32 %v1494_v49, %v6009_v62  ;;  %3925 = vpow2.f32 %v3677_v39  ;;  %v1609_v48 = vadd.f32 %v5957_v15, %v1575_v43  ;;  %vm6542_vm12 = vmor %vm1818_vm9, %vm1819_vm11 }
 0x1b2   :  { %v1766_v45 = vsel %vm6504_vm8, %v1765_v9, %v1761_v41  ;;  %v1619_v58 = vadd.f32 %v5957_v15, %v1585_v40  ;;  %v6533_v33 = vpop.eup %3917  ;;  %3927 = vrcp.f32 %v6511_v18  ;;  %v1817_v62 = vadd.f32 %v6460_v29, %v1816_v53 }
 0x1b3   :  { %2265 = vrot.lane.b32.xlu2 %v1766_v45, %s4218_s21  ;;  %v1608_v7 = vadd.f32 %v5957_v15, %v1574_v34  ;;  %v1822_v52 = vand.u32 2147483647, %v6391_v19  ;;  %v3920_v24 = vpop.eup %3919  ;;  %v3681_v37 = vmul.f32 -1.442695, %v1609_v48  ;;  %v1824_v44 = vand.u32 2147483648, %v6391_v19 }
 0x1b4   :  { %v3691_v38 = vmul.f32 -1.442695, %v1619_v58  ;;  %v1964_v36 = vmul.f32 %v6485_v56, %v6410_v25  ;;  %v6549_v27 = vpop.eup %3921  ;;  %3929 = vrcp.f32 %v6524_v46  ;;  %v6552_v55 = vadd.f32 1.0, %v3920_v24 }
 0x1b5   :  { %v3680_v14 = vmul.f32 -1.442695, %v1608_v7  ;;  %v1821_v23 = vsel %vm6542_vm12, %v6460_v29, %v1817_v62  ;;  %v3924_v22 = vpop.eup %3923  ;;  %3931 = vpow2.f32 %v3681_v37  ;;  %vm1823_vm13 = vcmp.eq.f32.partialorder %v1822_v52, 8.507059e+37 }
 0x1b6   :  { %v1825_v39 = vor.u32 1.1754944e-38, %v1824_v44  ;;  %v1965_v54 = vsub.f32 1.0, %v1964_v36  ;;  %3933 = vrcp.f32 %v6552_v55  ;;  %v6558_v19 = vadd.f32 1.0, %v3924_v22  ;;  %v1502_v8 = vpop.permute.xlu1 %1501 }
 0x1b7   :  { %vm1969_vm14 = vweird.f32 %v6485_v56  ;;  %v1972_v0 = vand.u32 2147483647, %v6410_v25  ;;  %v3926_v20 = vpop.eup %3925  ;;  %3935 = vpow2.f32 %v3691_v38  ;;  %v1974_v29 = vand.u32 2147483648, %v6410_v25  ;;  %v1522_v31 = vpop.permute.xlu2 %1521 }
 0x1b8   :  { %v1826_v9 = vsel %vm1823_vm13, %v1825_v39, %v1821_v23  ;;  %v1966_v47 = vmul.f32 %v6485_v56, %v1965_v54  ;;  %v6564_v51 = vpop.eup %3927  ;;  %3937 = vrcp.f32 %v6558_v19  ;;  %v6567_v5 = vadd.f32 1.0, %v3926_v20  ;;  %v1500_v34 = vpop.permute.xlu0 %1499 }
 0x1b9   :  { %2273 = vrot.lane.b32.xlu0 %v1826_v9, %s4218_s21  ;;  %vm1968_vm15 = vweird.f32 %v6410_v25  ;;  %v1799_v35 = vmul.f32 %v6491_v42, %v6431_v57  ;;  %3939 = vpow2.f32 %v3680_v14  ;;  %vm6574_vm0 = vcmp.eq.f32.partialorder %v1972_v0, 8.507059e+37 }
 0x1ba   :  { %v1967_v43 = vadd.f32 %v6485_v56, %v1966_v47  ;;  %v1975_v49 = vor.u32 1.1754944e-38, %v1974_v29  ;;  %v6578_v53 = vpop.eup %3929  ;;  %3941 = vrcp.f32 %v6567_v5  ;;  %vm1970_vm1 = vmor %vm1968_vm15, %vm1969_vm14  ;;  %vm1803_vm2 = vweird.f32 %v6431_v57 }
 0x1bb   :  { %v1800_v25 = vsub.f32 1.0, %v1799_v35  ;;  %v1807_v41 = vand.u32 2147483647, %v6431_v57  ;;  %v3932_v45 = vpop.eup %3931  ;;  %v1809_v58 = vand.u32 2147483648, %v6431_v57  ;;  %v1578_v7 = vadd.f32 %v1502_v8, %v5899_v11 }
 0x1bc   :  { %v1971_v48 = vsel %vm1970_vm1, %v6485_v56, %v1967_v43  ;;  %v1588_v62 = vadd.f32 %v1522_v31, %v6341_v12  ;;  %v6589_v52 = vpop.eup %3933  ;;  %v6591_v24 = vadd.f32 1.0, %v3932_v45  ;;  %vm1804_vm4 = vweird.f32 %v6491_v42 }
 0x1bd   :  { %v1976_v37 = vsel %vm6574_vm0, %v1975_v49, %v1971_v48  ;;  %v1801_v38 = vmul.f32 %v6491_v42, %v1800_v25  ;;  %v3936_v60 = vpop.eup %3935  ;;  %vm6598_vm5 = vcmp.eq.f32.partialorder %v1807_v41, 8.507059e+37  ;;  %v1612_v11 = vadd.f32 %v5957_v15, %v1578_v7  ;;  %vm1805_vm6 = vmor %vm1803_vm2, %vm1804_vm4 }
 0x1be   :  { %2293 = vrot.lane.b32.xlu1 %v1976_v37, %s4218_s21  ;;  %v1622_v12 = vadd.f32 %v5957_v15, %v1588_v62  ;;  %v1577_v44 = vadd.f32 %v1500_v34, %v6075_v59  ;;  %v6605_v36 = vpop.eup %3937  ;;  %v6607_v14 = vadd.f32 1.0, %v3936_v60  ;;  %v1810_v22 = vor.u32 1.1754944e-38, %v1809_v58  ;;  %v1508_v37 = vpop.permute.xlu1 %1507 }
 0x1bf   :  { %v1802_v23 = vadd.f32 %v6491_v42, %v1801_v38  ;;  %v1859_v39 = vmul.f32 %v6508_v6, %v6446_v26  ;;  %v3940_v54 = vpop.eup %3939  ;;  %3943 = vrcp.f32 %v6591_v24  ;;  %v3684_v0 = vmul.f32 -1.442695, %v1612_v11 }
 0x1c0   :  { %v3694_v20 = vmul.f32 -1.442695, %v1622_v12  ;;  %v1611_v59 = vadd.f32 %v5957_v15, %v1577_v44  ;;  %v6616_v9 = vpop.eup %3941  ;;  %3945 = vrcp.f32 %v6607_v14  ;;  %v6619_v47 = vadd.f32 1.0, %v3940_v54  ;;  %v1506_v38 = vpop.permute.xlu0 %1505 }
 0x1c1   :  { %v1806_v29 = vsel %vm1805_vm6, %v6491_v42, %v1802_v23  ;;  %v1860_v35 = vsub.f32 1.0, %v1859_v39  ;;  %3947 = vpow2.f32 %v3684_v0  ;;  %vm1864_vm7 = vweird.f32 %v6508_v6 }
 0x1c2   :  { %v1811_v8 = vsel %vm6598_vm5, %v1810_v22, %v1806_v29  ;;  %v3683_v31 = vmul.f32 -1.442695, %v1611_v59  ;;  %3949 = vrcp.f32 %v6619_v47  ;;  %v1867_v43 = vand.u32 2147483647, %v6446_v26 }
 0x1c3   :  { %2271 = vrot.lane.b32.xlu2 %v1811_v8, %s4218_s21  ;;  %v1861_v57 = vmul.f32 %v6508_v6, %v1860_v35  ;;  %v1869_v40 = vand.u32 2147483648, %v6446_v26  ;;  %3951 = vpow2.f32 %v3694_v20  ;;  %vm1863_vm8 = vweird.f32 %v6446_v26 }
 0x1c4   :  { %v2009_v42 = vmul.f32 %v6522_v28, %v6462_v2  ;;  %vm2013_vm9 = vweird.f32 %v6462_v2  ;;  %3953 = vpow2.f32 %v3683_v31  ;;  %vm2014_vm10 = vweird.f32 %v6522_v28  ;;  %vm1865_vm11 = vmor %vm1863_vm8, %vm1864_vm7 }
 0x1c5   :  { %v1862_v49 = vadd.f32 %v6508_v6, %v1861_v57  ;;  %v1870_v25 = vor.u32 1.1754944e-38, %v1869_v40  ;;  %v6636_v41 = vpop.eup %3943  ;;  %v2017_v45 = vand.u32 2147483647, %v6462_v2  ;;  %v2019_v26 = vand.u32 2147483648, %v6462_v2  ;;  %vm2015_vm0 = vmor %vm2013_vm9, %vm2014_vm10 }
 0x1c6   :  { %v2010_v34 = vsub.f32 1.0, %v2009_v42  ;;  %v1844_v48 = vmul.f32 %v6533_v33, %v6480_v63  ;;  %v6644_v58 = vpop.eup %3945  ;;  %vm1868_vm12 = vcmp.eq.f32.partialorder %v1867_v43, 8.507059e+37  ;;  %vm1848_vm13 = vweird.f32 %v6480_v63 }
 0x1c7   :  { %v1866_v7 = vsel %vm1865_vm11, %v6508_v6, %v1862_v49  ;;  %v1852_v62 = vand.u32 2147483647, %v6480_v63  ;;  %v3948_v60 = vpop.eup %3947  ;;  %vm6650_vm14 = vcmp.eq.f32.partialorder %v2017_v45, 8.507059e+37  ;;  %vm1849_vm15 = vweird.f32 %v6533_v33 }
 0x1c8   :  { %v1871_v56 = vsel %vm1868_vm12, %v1870_v25, %v1866_v7  ;;  %v2011_v11 = vmul.f32 %v6522_v28, %v2010_v34  ;;  %v6655_v44 = vpop.eup %3949  ;;  %v6657_v6 = vadd.f32 1.0, %v3948_v60  ;;  %v2020_v23 = vor.u32 1.1754944e-38, %v2019_v26  ;;  %vm1850_vm2 = vmor %vm1848_vm13, %vm1849_vm15 }
 0x1c9   :  { %2279 = vrot.lane.b32.xlu0 %v1871_v56, %s4218_s21  ;;  %v1845_v22 = vsub.f32 1.0, %v1844_v48  ;;  %v1854_v39 = vand.u32 2147483648, %v6480_v63  ;;  %v3952_v54 = vpop.eup %3951  ;;  %v1581_v20 = vadd.f32 %v1508_v37, %v5954_v21  ;;  %v1580_v59 = vadd.f32 %v1506_v38, %v6246_v61 }
 0x1ca   :  { %v2012_v0 = vadd.f32 %v6522_v28, %v2011_v11  ;;  %v1904_v29 = vmul.f32 %v6549_v27, %v6501_v17  ;;  %v3954_v35 = vpop.eup %3953  ;;  %3955 = vrcp.f32 %v6657_v6  ;;  %v6667_v8 = vadd.f32 1.0, %v3952_v54 }
 0x1cb   :  { %v1846_v31 = vmul.f32 %v6533_v33, %v1845_v22  ;;  %vm6674_vm1 = vcmp.eq.f32.partialorder %v1852_v62, 8.507059e+37  ;;  %v6678_v21 = vadd.f32 1.0, %v3954_v35  ;;  %v1615_v43 = vadd.f32 %v5957_v15, %v1581_v20  ;;  %v1514_v22 = vpop.permute.xlu1 %1513 }
 0x1cc   :  { %v2016_v61 = vsel %vm2015_vm0, %v6522_v28, %v2012_v0  ;;  %v1614_v40 = vadd.f32 %v5957_v15, %v1580_v59  ;;  %3957 = vrcp.f32 %v6667_v8  ;;  %v1905_v49 = vsub.f32 1.0, %v1904_v29 }
 0x1cd   :  { %v2021_v2 = vsel %vm6650_vm14, %v2020_v23, %v2016_v61  ;;  %v1847_v42 = vadd.f32 %v6533_v33, %v1846_v31  ;;  %3959 = vrcp.f32 %v6678_v21  ;;  %v1855_v28 = vor.u32 1.1754944e-38, %v1854_v39  ;;  %v1512_v39 = vpop.permute.xlu0 %1511 }
 0x1ce   :  { %2299 = vrot.lane.b32.xlu1 %v2021_v2, %s4218_s21  ;;  %v3687_v25 = vmul.f32 -1.442695, %v1615_v43  ;;  %v3686_v34 = vmul.f32 -1.442695, %v1614_v40  ;;  %v1906_v26 = vmul.f32 %v6549_v27, %v1905_v49  ;;  %vm1909_vm4 = vweird.f32 %v6549_v27 }
 0x1cf   :  { %v1851_v45 = vsel %vm1850_vm2, %v6533_v33, %v1847_v42  ;;  %v1912_v48 = vand.u32 2147483647, %v6501_v17  ;;  %v1914_v62 = vand.u32 2147483648, %v6501_v17  ;;  %v2054_v63 = vmul.f32 %v6564_v51, %v6511_v18 }
 0x1d0   :  { %v1856_v7 = vsel %vm6674_vm1, %v1855_v28, %v1851_v45  ;;  %3961 = vpow2.f32 %v3687_v25  ;;  %v6702_v37 = vpop.eup %3955  ;;  %v1389_v33 = vadd.f32 %v6117_v16, %v5936_v3  ;;  %v1907_v38 = vadd.f32 %v6549_v27, %v1906_v26 }
 0x1d1   :  { %2277 = vrot.lane.b32.xlu2 %v1856_v7, %s4218_s21  ;;  %3963 = vpow2.f32 %v3686_v34  ;;  %vm1908_vm5 = vweird.f32 %v6501_v17  ;;  %vm1913_vm7 = vcmp.eq.f32.partialorder %v1912_v48, 8.507059e+37  ;;  %v1915_v60 = vor.u32 1.1754944e-38, %v1914_v62 }
 0x1d2   :  { %vm1910_vm6 = vmor %vm1908_vm5, %vm1909_vm4  ;;  %v2055_v56 = vsub.f32 1.0, %v2054_v63  ;;  %v2062_v11 = vand.u32 2147483647, %v6511_v18  ;;  %v6710_v12 = vpop.eup %3957  ;;  %vm2058_vm8 = vweird.f32 %v6511_v18  ;;  %v2064_v3 = vand.u32 2147483648, %v6511_v18 }
 0x1d3   :  { %v1911_v23 = vsel %vm1910_vm6, %v6549_v27, %v1907_v38  ;;  %v1889_v16 = vmul.f32 %v6578_v53, %v6524_v46  ;;  %v6717_v17 = vpop.eup %3959  ;;  %vm2059_vm9 = vweird.f32 %v6564_v51  ;;  %vm1893_vm10 = vweird.f32 %v6524_v46 }
 0x1d4   :  { %v1916_v54 = vsel %vm1913_vm7, %v1915_v60, %v1911_v23  ;;  %v2056_v0 = vmul.f32 %v6564_v51, %v2055_v56  ;;  %vm6723_vm11 = vcmp.eq.f32.partialorder %v2062_v11, 8.507059e+37  ;;  %v1897_v59 = vand.u32 2147483647, %v6524_v46  ;;  %vm2060_vm12 = vmor %vm2058_vm8, %vm2059_vm9 }
 0x1d5   :  { %2285 = vrot.lane.b32.xlu0 %v1916_v54, %s4218_s21  ;;  %v1890_v20 = vsub.f32 1.0, %v1889_v16  ;;  %v1899_v29 = vand.u32 2147483648, %v6524_v46  ;;  %v1584_v57 = vadd.f32 %v1514_v22, %v6015_v32  ;;  %v1583_v61 = vadd.f32 %v1512_v39, %v1389_v33  ;;  %v1518_v54 = vpop.permute.xlu0 %1517 }
 0x1d6   :  { %v3962_v35 = vpop.eup %3961  ;;  %v2057_v31 = vadd.f32 %v6564_v51, %v2056_v0  ;;  %v1949_v43 = vmul.f32 %v6589_v52, %v6552_v55  ;;  %v2065_v42 = vor.u32 1.1754944e-38, %v2064_v3  ;;  %vm1894_vm13 = vweird.f32 %v6578_v53 }
 0x1d7   :  { %v3964_v40 = vpop.eup %3963  ;;  %v6733_v2 = vadd.f32 1.0, %v3962_v35  ;;  %v1891_v49 = vmul.f32 %v6578_v53, %v1890_v20  ;;  %vm6740_vm14 = vcmp.eq.f32.partialorder %v1897_v59, 8.507059e+37  ;;  %v1618_v32 = vadd.f32 %v5957_v15, %v1584_v57  ;;  %vm1895_vm15 = vmor %vm1893_vm10, %vm1894_vm13 }
 0x1d8   :  { %v2061_v28 = vsel %vm2060_vm12, %v6564_v51, %v2057_v31  ;;  %v1617_v34 = vadd.f32 %v5957_v15, %v1583_v61  ;;  %v1900_v26 = vor.u32 1.1754944e-38, %v1899_v29  ;;  %v1950_v48 = vsub.f32 1.0, %v1949_v43 }
 0x1d9   :  { %v2066_v45 = vsel %vm6723_vm11, %v2065_v42, %v2061_v28  ;;  %v1892_v18 = vadd.f32 %v6578_v53, %v1891_v49  ;;  %3965 = vrcp.f32 %v6733_v2  ;;  %v6750_v7 = vadd.f32 1.0, %v3964_v40 }
 0x1da   :  { %2305 = vrot.lane.b32.xlu1 %v2066_v45, %s4218_s21  ;;  %v3690_v51 = vmul.f32 -1.442695, %v1618_v32  ;;  %v3689_v62 = vmul.f32 -1.442695, %v1617_v34  ;;  %v1951_v33 = vmul.f32 %v6589_v52, %v1950_v48  ;;  %vm1954_vm0 = vweird.f32 %v6589_v52 }
 0x1db   :  { %v1896_v63 = vsel %vm1895_vm15, %v6578_v53, %v1892_v18  ;;  %v1957_v38 = vand.u32 2147483647, %v6552_v55  ;;  %v1959_v56 = vand.u32 2147483648, %v6552_v55  ;;  %v2099_v46 = vmul.f32 %v6605_v36, %v6558_v19 }
 0x1dc   :  { %v1901_v60 = vsel %vm6740_vm14, %v1900_v26, %v1896_v63  ;;  %3967 = vpow2.f32 %v3690_v51  ;;  %v1392_v11 = vadd.f32 %v6172_v30, %v6050_v1  ;;  %v1952_v53 = vadd.f32 %v6589_v52, %v1951_v33  ;;  %v1520_v30 = vpop.permute.xlu1 %1519 }
 0x1dd   :  { %2283 = vrot.lane.b32.xlu2 %v1901_v60, %s4218_s21  ;;  %3969 = vpow2.f32 %v3689_v62  ;;  %vm1953_vm1 = vweird.f32 %v6552_v55  ;;  %vm1958_vm4 = vcmp.eq.f32.partialorder %v1957_v38, 8.507059e+37  ;;  %v1960_v23 = vor.u32 1.1754944e-38, %v1959_v56 }
 0x1de   :  { %3971 = vrcp.f32 %v6750_v7  ;;  %vm1955_vm2 = vmor %vm1953_vm1, %vm1954_vm0  ;;  %v2100_v3 = vsub.f32 1.0, %v2099_v46  ;;  %v2107_v22 = vand.u32 2147483647, %v6558_v19  ;;  %v2109_v39 = vand.u32 2147483648, %v6558_v19 }
 0x1df   :  { %v1956_v16 = vsel %vm1955_vm2, %v6589_v52, %v1952_v53  ;;  %v1934_v1 = vmul.f32 %v6616_v9, %v6567_v5  ;;  %v6775_v0 = vpop.eup %3965  ;;  %vm2103_vm5 = vweird.f32 %v6558_v19  ;;  %vm2104_vm6 = vweird.f32 %v6605_v36 }
 0x1e0   :  { %v1961_v55 = vsel %vm1958_vm4, %v1960_v23, %v1956_v16  ;;  %v2101_v27 = vmul.f32 %v6605_v36, %v2100_v3  ;;  %vm1938_vm7 = vweird.f32 %v6567_v5  ;;  %v1942_v20 = vand.u32 2147483647, %v6567_v5  ;;  %vm2105_vm8 = vmor %vm2103_vm5, %vm2104_vm6  ;;  %v1524_v3 = vpop.permute.xlu0 %1523 }
 0x1e1   :  { %2291 = vrot.lane.b32.xlu0 %v1961_v55, %s4218_s21  ;;  %v1935_v52 = vsub.f32 1.0, %v1934_v1  ;;  %v1944_v59 = vand.u32 2147483648, %v6567_v5  ;;  %v1587_v31 = vadd.f32 %v1520_v30, %v6091_v4  ;;  %v1586_v57 = vadd.f32 %v1518_v54, %v1392_v11 }
 0x1e2   :  { %v3968_v29 = vpop.eup %3967  ;;  %v2102_v35 = vadd.f32 %v6605_v36, %v2101_v27  ;;  %v1994_v19 = vmul.f32 %v6636_v41, %v6591_v24  ;;  %vm2108_vm9 = vcmp.eq.f32.partialorder %v2107_v22, 8.507059e+37  ;;  %v2110_v43 = vor.u32 1.1754944e-38, %v2109_v39 }
 0x1e3   :  { %v3970_v61 = vpop.eup %3969  ;;  %v1936_v40 = vmul.f32 %v6616_v9, %v1935_v52  ;;  %vm1939_vm10 = vweird.f32 %v6616_v9  ;;  %v6792_v49 = vadd.f32 1.0, %v3968_v29  ;;  %v1621_v4 = vadd.f32 %v5957_v15, %v1587_v31 }
 0x1e4   :  { %v6790_v42 = vpop.eup %3971  ;;  %v2106_v28 = vsel %vm2105_vm8, %v6605_v36, %v2102_v35  ;;  %v1620_v25 = vadd.f32 %v5957_v15, %v1586_v57  ;;  %vm1943_vm11 = vcmp.eq.f32.partialorder %v1942_v20, 8.507059e+37  ;;  %v1995_v45 = vsub.f32 1.0, %v1994_v19  ;;  %vm1940_vm12 = vmor %vm1938_vm7, %vm1939_vm10  ;;  %v1526_v23 = vpop.permute.xlu1 %1525 }
 0x1e5   :  { %v2111_v32 = vsel %vm2108_vm9, %v2110_v43, %v2106_v28  ;;  %v1937_v34 = vadd.f32 %v6616_v9, %v1936_v40  ;;  %v6798_v18 = vadd.f32 1.0, %v3970_v61  ;;  %v1945_v26 = vor.u32 1.1754944e-38, %v1944_v59 }
 0x1e6   :  { %2311 = vrot.lane.b32.xlu1 %v2111_v32, %s4218_s21  ;;  %v3693_v48 = vmul.f32 -1.442695, %v1621_v4  ;;  %v3692_v51 = vmul.f32 -1.442695, %v1620_v25  ;;  %v1996_v62 = vmul.f32 %v6636_v41, %v1995_v45  ;;  %vm1999_vm13 = vweird.f32 %v6636_v41 }
 0x1e7   :  { %v1941_v36 = vsel %vm1940_vm12, %v6616_v9, %v1937_v34  ;;  %v2002_v63 = vand.u32 2147483647, %v6591_v24  ;;  %v2004_v38 = vand.u32 2147483648, %v6591_v24  ;;  %v2144_v60 = vmul.f32 %v6644_v58, %v6607_v14 }
 0x1e8   :  { %v1946_v33 = vsel %vm1943_vm11, %v1945_v26, %v1941_v36  ;;  %3973 = vpow2.f32 %v3693_v48  ;;  %v1395_v5 = vadd.f32 %v6227_v50, %v6225_v13  ;;  %v1997_v9 = vadd.f32 %v6636_v41, %v1996_v62  ;;  %v8802_v26 = vld [vmem:[#allocation46_spill] sm:$0xff] }
 0x1e9   :  { %3975 = vrcp.f32 %v6792_v49  ;;  %2289 = vrot.lane.b32.xlu2 %v1946_v33, %s4218_s21  ;;  %vm1998_vm14 = vweird.f32 %v6591_v24  ;;  %vm2003_vm0 = vcmp.eq.f32.partialorder %v2002_v63, 8.507059e+37  ;;  %v2005_v56 = vor.u32 1.1754944e-38, %v2004_v38 }
 0x1ea   :  { %3977 = vrcp.f32 %v6798_v18  ;;  %vm2000_vm15 = vmor %vm1998_vm14, %vm1999_vm13  ;;  %v2145_v46 = vsub.f32 1.0, %v2144_v60  ;;  %v2152_v53 = vand.u32 2147483647, %v6607_v14  ;;  %v2154_v13 = vand.u32 2147483648, %v6607_v14 }
 0x1eb   :  { %v2001_v11 = vsel %vm2000_vm15, %v6636_v41, %v1997_v9  ;;  %v1979_v50 = vmul.f32 %v6655_v44, %v6619_v47  ;;  %3979 = vpow2.f32 %v3692_v51  ;;  %vm2149_vm1 = vweird.f32 %v6644_v58  ;;  %v8804_v9 = vld [vmem:[#allocation15_spill] sm:$0xff] }
 0x1ec   :  { %v2006_v16 = vsel %vm2003_vm0, %v2005_v56, %v2001_v11  ;;  %v2146_v24 = vmul.f32 %v6644_v58, %v2145_v46  ;;  %vm2148_vm2 = vweird.f32 %v6607_v14  ;;  %v1987_v22 = vand.u32 2147483647, %v6619_v47 }
 0x1ed   :  { %2297 = vrot.lane.b32.xlu0 %v2006_v16, %s4218_s21  ;;  %v1980_v41 = vsub.f32 1.0, %v1979_v50  ;;  %v1989_v39 = vand.u32 2147483648, %v6619_v47  ;;  %v1590_v54 = vadd.f32 %v1526_v23, %v6254_v10  ;;  %v1589_v55 = vadd.f32 %v1524_v3, %v1395_v5  ;;  %vm2150_vm4 = vmor %vm2148_vm2, %vm2149_vm1  ;;  %v8803_v5 = vld [vmem:[#allocation41_spill] sm:$0xff] }
 0x1ee   :  { %v3974_v1 = vpop.eup %3973  ;;  %v2147_v30 = vadd.f32 %v6644_v58, %v2146_v24  ;;  %v2039_v27 = vmul.f32 %v6702_v37, %v6657_v6  ;;  %vm2153_vm5 = vcmp.eq.f32.partialorder %v2152_v53, 8.507059e+37  ;;  %v2155_v20 = vor.u32 1.1754944e-38, %v2154_v13 }
 0x1ef   :  { %v6832_v52 = vpop.eup %3975  ;;  %v1981_v14 = vmul.f32 %v6655_v44, %v1980_v41  ;;  %vm1984_vm6 = vweird.f32 %v6655_v44  ;;  %v6838_v29 = vadd.f32 1.0, %v3974_v1  ;;  %v1624_v10 = vadd.f32 %v5957_v15, %v1590_v54 }
 0x1f0   :  { %v6836_v59 = vpop.eup %3977  ;;  %v2151_v35 = vsel %vm2150_vm4, %v6644_v58, %v2147_v30  ;;  %v1623_v31 = vadd.f32 %v5957_v15, %v1589_v55  ;;  %vm1983_vm7 = vweird.f32 %v6619_v47  ;;  %v2040_v61 = vsub.f32 1.0, %v2039_v27 }
 0x1f1   :  { %v2156_v57 = vsel %vm2153_vm5, %v2155_v20, %v2151_v35  ;;  %v1982_v19 = vadd.f32 %v6655_v44, %v1981_v14  ;;  %v3980_v43 = vpop.eup %3979  ;;  %vm1985_vm8 = vmor %vm1983_vm7, %vm1984_vm6  ;;  %vm1988_vm9 = vcmp.eq.f32.partialorder %v1987_v22, 8.507059e+37  ;;  %v1990_v40 = vor.u32 1.1754944e-38, %v1989_v39 }
 0x1f2   :  { %2317 = vrot.lane.b32.xlu1 %v2156_v57, %s4218_s21  ;;  %v3696_v28 = vmul.f32 -1.442695, %v1624_v10  ;;  %v3695_v4 = vmul.f32 -1.442695, %v1623_v31  ;;  %v2041_v25 = vmul.f32 %v6702_v37, %v2040_v61  ;;  %vm2044_vm10 = vweird.f32 %v6702_v37 }
 0x1f3   :  { %v1986_v58 = vsel %vm1985_vm8, %v6655_v44, %v1982_v19  ;;  %v2047_v15 = vand.u32 2147483647, %v6657_v6  ;;  %3981 = vrcp.f32 %v6838_v29  ;;  %v2049_v32 = vand.u32 2147483648, %v6657_v6 }
 0x1f4   :  { %v1991_v47 = vsel %vm1988_vm9, %v1990_v40, %v1986_v58  ;;  %v2189_v34 = vmul.f32 %v6710_v12, %v6667_v8  ;;  %v6854_v45 = vadd.f32 1.0, %v3980_v43  ;;  %3983 = vpow2.f32 %v3696_v28 }
 0x1f5   :  { %2295 = vrot.lane.b32.xlu2 %v1991_v47, %s4218_s21  ;;  %v2042_v44 = vadd.f32 %v6702_v37, %v2041_v25  ;;  %vm2043_vm11 = vweird.f32 %v6657_v6  ;;  %v6860_v48 = vadd.f32 1.0, %v8802_v26  ;;  %3985 = vpow2.f32 %v3695_v4 }
 0x1f6   :  { %vm2045_vm12 = vmor %vm2043_vm11, %vm2044_vm10  ;;  %v2050_v51 = vor.u32 1.1754944e-38, %v2049_v32  ;;  %v2190_v36 = vsub.f32 1.0, %v2189_v34  ;;  %vm2048_vm13 = vcmp.eq.f32.partialorder %v2047_v15, 8.507059e+37  ;;  %v2199_v63 = vand.u32 2147483648, %v6667_v8 }
 0x1f7   :  { %v2046_v62 = vsel %vm2045_vm12, %v6702_v37, %v2042_v44  ;;  %v2024_v33 = vmul.f32 %v6717_v17, %v6678_v21  ;;  %vm2194_vm14 = vweird.f32 %v6710_v12  ;;  %v2197_v60 = vand.u32 2147483647, %v6667_v8 }
 0x1f8   :  { %v2051_v38 = vsel %vm2048_vm13, %v2050_v51, %v2046_v62  ;;  %v2191_v6 = vmul.f32 %v6710_v12, %v2190_v36  ;;  %3987 = vrcp.f32 %v6854_v45  ;;  %vm2193_vm15 = vweird.f32 %v6667_v8  ;;  %v6949_v51 = vld [vmem:[%s8546_s2 + $0x18] sm:$0xff] }
 0x1f9   :  { %2303 = vrot.lane.b32.xlu0 %v2051_v38, %s4218_s21  ;;  %v2025_v37 = vsub.f32 1.0, %v2024_v33  ;;  %v6876_v56 = vmul.f32 %v8804_v9, %v8803_v5  ;;  %v6878_v46 = vpop.eup %3981  ;;  %vm2028_vm0 = vweird.f32 %v6678_v21  ;;  %v2034_v53 = vand.u32 2147483648, %v6678_v21  ;;  %vm2195_vm1 = vmor %vm2193_vm15, %vm2194_vm14 }
 0x1fa   :  { %v2192_v11 = vadd.f32 %v6710_v12, %v2191_v6  ;;  %v2084_v13 = vmul.f32 %v6775_v0, %v6733_v2  ;;  %v3984_v50 = vpop.eup %3983  ;;  %v2200_v23 = vor.u32 1.1754944e-38, %v2199_v63  ;;  %vm2029_vm2 = vweird.f32 %v6717_v17 }
 0x1fb   :  { %v2026_v8 = vmul.f32 %v6717_v17, %v2025_v37  ;;  %v2032_v3 = vand.u32 2147483647, %v6678_v21  ;;  %v3986_v16 = vpop.eup %3985  ;;  %vm2198_vm4 = vcmp.eq.f32.partialorder %v2197_v60, 8.507059e+37  ;;  %v2092_v22 = vand.u32 2147483647, %v6733_v2  ;;  %vm2030_vm6 = vmor %vm2028_vm0, %vm2029_vm2 }
 0x1fc   :  { %v2196_v24 = vsel %vm2195_vm1, %v6710_v12, %v2192_v11  ;;  %v2085_v41 = vsub.f32 1.0, %v2084_v13  ;;  %vm2088_vm5 = vweird.f32 %v6733_v2  ;;  %v2094_v30 = vand.u32 2147483648, %v6733_v2 }
 0x1fd   :  { %v2201_v39 = vsel %vm2198_vm4, %v2200_v23, %v2196_v24  ;;  %v2027_v1 = vadd.f32 %v6717_v17, %v2026_v8  ;;  %v2035_v54 = vor.u32 1.1754944e-38, %v2034_v53  ;;  %vm2089_vm7 = vweird.f32 %v6775_v0 }
 0x1fe   :  { %2323 = vrot.lane.b32.xlu1 %v2201_v39, %s4218_s21  ;;  %v2086_v55 = vmul.f32 %v6775_v0, %v2085_v41  ;;  %v6899_v12 = vstv %s6862_s23  ;;  %v6901_v27 = vpop.eup %3987  ;;  %v6903_v20 = vadd.f32 1.0, %v3984_v50  ;;  %vm2033_vm8 = vcmp.eq.f32.partialorder %v2032_v3, 8.507059e+37  ;;  %vm2090_vm10 = vmor %vm2088_vm5, %vm2089_vm7 }
 0x1ff   :  { %v2031_v14 = vsel %vm2030_vm6, %v6717_v17, %v2027_v1  ;;  %v2069_v35 = vmul.f32 %v6790_v42, %v6750_v7  ;;  %v6908_v10 = vadd.f32 1.0, %v3986_v16  ;;  %vm2093_vm9 = vcmp.eq.f32.partialorder %v2092_v22, 8.507059e+37  ;;  %v6917_v17 = vld [vmem:[%s8546_s2] sm:$0xff] }
 0x200   :  { %v2036_v21 = vsel %vm2033_vm8, %v2035_v54, %v2031_v14  ;;  %v2087_v31 = vadd.f32 %v6775_v0, %v2086_v55  ;;  %v2095_v57 = vor.u32 1.1754944e-38, %v2094_v30  ;;  %v2431_v19 = vmul.f32 %v6917_v17, %v6899_v12 }
 0x201   :  { %2301 = vrot.lane.b32.xlu2 %v2036_v21, %s4218_s21  ;;  %v2070_v61 = vsub.f32 1.0, %v2069_v35  ;;  %v2129_v43 = vmul.f32 %v6832_v52, %v6792_v49  ;;  %v2077_v28 = vand.u32 2147483647, %v6750_v7  ;;  %v2079_v2 = vand.u32 2147483648, %v6750_v7 }
 0x202   :  { %v2091_v40 = vsel %vm2090_vm10, %v6775_v0, %v2087_v31  ;;  %v2137_v4 = vand.u32 2147483647, %v6792_v49  ;;  %3989 = vrcp.f32 %v6903_v20  ;;  %vm2074_vm11 = vweird.f32 %v6790_v42  ;;  %v6967_v13 = vpop.permute.xlu1 %2269 }
 0x203   :  { %v2096_v58 = vsel %vm2093_vm9, %v2095_v57, %v2091_v40  ;;  %v2071_v25 = vmul.f32 %v6790_v42, %v2070_v61  ;;  %3991 = vrcp.f32 %v6908_v10  ;;  %vm2073_vm12 = vweird.f32 %v6750_v7 }
 0x204   :  { %2309 = vrot.lane.b32.xlu0 %v2096_v58, %s4218_s21  ;;  %v2130_v0 = vsub.f32 1.0, %v2129_v43  ;;  %vm2133_vm13 = vweird.f32 %v6792_v49  ;;  %vm2134_vm14 = vweird.f32 %v6832_v52  ;;  %v2139_v47 = vand.u32 2147483648, %v6792_v49  ;;  %vm2075_vm15 = vmor %vm2073_vm12, %vm2074_vm11  ;;  %v7176_v43 = vld [vmem:[%s8546_s2 + $0x40] sm:$0xff] }
 0x205   :  { %v2072_v15 = vadd.f32 %v6790_v42, %v2071_v25  ;;  %v2114_v32 = vmul.f32 %v6836_v59, %v6798_v18  ;;  %vm2078_vm0 = vcmp.eq.f32.partialorder %v2077_v28, 8.507059e+37  ;;  %v2080_v34 = vor.u32 1.1754944e-38, %v2079_v2  ;;  %vm2135_vm4 = vmor %vm2133_vm13, %vm2134_vm14 }
 0x206   :  { %2495 = vrot.lane.b32.xlu1 %v2431_v19, %s4216_s25  ;;  %v2131_v44 = vmul.f32 %v6832_v52, %v2130_v0  ;;  %vm6941_vm1 = vcmp.eq.f32.partialorder %v2137_v4, 8.507059e+37  ;;  %v2434_v36 = vmul.f32 %v6949_v51, %v6899_v12  ;;  %v2174_v63 = vmul.f32 %v6878_v46, %v6838_v29 }
 0x207   :  { %v2076_v26 = vsel %vm2075_vm15, %v6790_v42, %v2072_v15  ;;  %v2115_v62 = vsub.f32 1.0, %v2114_v32  ;;  %vm2119_vm2 = vweird.f32 %v6836_v59  ;;  %v2124_v6 = vand.u32 2147483648, %v6798_v18 }
 0x208   :  { %v2081_v33 = vsel %vm2078_vm0, %v2080_v34, %v2076_v26  ;;  %v2132_v38 = vadd.f32 %v6832_v52, %v2131_v44  ;;  %v6958_v42 = vpop.eup %3989  ;;  %v2140_v60 = vor.u32 1.1754944e-38, %v2139_v47  ;;  %v2122_v11 = vand.u32 2147483647, %v6798_v18 }
 0x209   :  { %2307 = vrot.lane.b32.xlu2 %v2081_v33, %s4218_s21  ;;  %v2116_v37 = vmul.f32 %v6836_v59, %v2115_v62  ;;  %v2175_v53 = vsub.f32 1.0, %v2174_v63  ;;  %v6969_v50 = vpop.eup %3991  ;;  %vm2118_vm5 = vweird.f32 %v6798_v18  ;;  %vm2179_vm6 = vweird.f32 %v6878_v46  ;;  %v7260_v33 = vld [vmem:[%s8546_s2 + $0x68] sm:$0xff] }
 0x20a   :  { %v2136_v23 = vsel %vm2135_vm4, %v6832_v52, %v2132_v38  ;;  %v2159_v49 = vmul.f32 %v6901_v27, %v6854_v45  ;;  %v2184_v24 = vand.u32 2147483648, %v6838_v29  ;;  %vm2120_vm7 = vmor %vm2118_vm5, %vm2119_vm2  ;;  %v2125_v18 = vor.u32 1.1754944e-38, %v2124_v6  ;;  %v2276_v19 = vpop.permute.xlu1 %2275  ;;  %v7068_v6 = vld [vmem:[%s8546_s2 + $0x48] sm:$0xff] }
 0x20b   :  { %v2141_v8 = vsel %vm6941_vm1, %v2140_v60, %v2136_v23  ;;  %v2117_v3 = vadd.f32 %v6836_v59, %v2116_v37  ;;  %v2176_v16 = vmul.f32 %v6878_v46, %v2175_v53  ;;  %v2182_v52 = vand.u32 2147483647, %v6838_v29  ;;  %v7280_v37 = vld [vmem:[%s8546_s2 + $0xd8] sm:$0xff] }
 0x20c   :  { %2315 = vrot.lane.b32.xlu0 %v2141_v8, %s4218_s21  ;;  %v2160_v41 = vsub.f32 1.0, %v2159_v49  ;;  %vm2123_vm8 = vcmp.eq.f32.partialorder %v2122_v11, 8.507059e+37  ;;  %vm2178_vm9 = vweird.f32 %v6838_v29  ;;  %3993 = vrcp.f32 %v6860_v48 }
 0x20d   :  { %v2121_v22 = vsel %vm2120_vm7, %v6836_v59, %v2117_v3  ;;  %v2177_v39 = vadd.f32 %v6878_v46, %v2176_v16  ;;  %vm2180_vm10 = vmor %vm2178_vm9, %vm2179_vm6  ;;  %v2219_v54 = vmul.f32 %v6958_v42, %v6903_v20  ;;  %v2185_v55 = vor.u32 1.1754944e-38, %v2184_v24  ;;  %v2266_v4 = vpop.permute.xlu2 %2265 }
 0x20e   :  { %2501 = vrot.lane.b32.xlu1 %v2434_v36, %s4216_s25  ;;  %v2126_v1 = vsel %vm2123_vm8, %v2125_v18, %v2121_v22  ;;  %v2161_v30 = vmul.f32 %v6901_v27, %v2160_v41  ;;  %vm2164_vm11 = vweird.f32 %v6901_v27  ;;  %v1077_v29 = vsub.f32 1.0, %v6876_v56  ;;  %v7008_v56 = vld [vmem:[%s8546_s2 + $0x30] sm:$0xff] }
 0x20f   :  { %v2181_v59 = vsel %vm2180_vm10, %v6878_v46, %v2177_v39  ;;  %vm2183_vm12 = vcmp.eq.f32.partialorder %v2182_v52, 8.507059e+37  ;;  %v2169_v35 = vand.u32 2147483648, %v6854_v45  ;;  %v2220_v21 = vsub.f32 1.0, %v2219_v54  ;;  %v7106_v18 = vld [vmem:[%s8546_s2 + $0x10] sm:$0xff] }
 0x210   :  { %v2162_v14 = vadd.f32 %v6901_v27, %v2161_v30  ;;  %v2186_v31 = vsel %vm2183_vm12, %v2185_v55, %v2181_v59  ;;  %vm2163_vm13 = vweird.f32 %v6854_v45  ;;  %v2167_v57 = vand.u32 2147483647, %v6854_v45  ;;  %v7116_v30 = vld [vmem:[%s8546_s2 + $0x60] sm:$0xff]  ;;  %v7136_v55 = vld [vmem:[%s8546_s2 + $0x8] sm:$0xff] }
 0x211   :  { %2313 = vrot.lane.b32.xlu2 %v2126_v1, %s4218_s21  ;;  %v2204_v46 = vmul.f32 %v6969_v50, %v6908_v10  ;;  %v2437_v61 = vmul.f32 %v7008_v56, %v6899_v12  ;;  %vm7012_vm14 = vmor %vm2163_vm13, %vm2164_vm11  ;;  %v2221_v40 = vmul.f32 %v6958_v42, %v2220_v21  ;;  %vm2224_vm15 = vweird.f32 %v6958_v42  ;;  %v7152_v21 = vld [vmem:[%s8546_s2 + $0x78] sm:$0xff] }
 0x212   :  { %v2166_v45 = vsel %vm7012_vm14, %v6901_v27, %v2162_v14  ;;  %v2229_v28 = vand.u32 2147483648, %v6903_v20  ;;  %v1078_v58 = vmul.f32 %v8804_v9, %v1077_v29  ;;  %v7023_v25 = vpop.eup %3993  ;;  %v2170_v0 = vor.u32 1.1754944e-38, %v2169_v35  ;;  %v2282_v38 = vpop.permute.xlu1 %2281  ;;  %v7144_v14 = vld [vmem:[%s8546_s2 + $0x28] sm:$0xff] }
 0x213   :  { %v2205_v2 = vsub.f32 1.0, %v2204_v46  ;;  %v2222_v15 = vadd.f32 %v6958_v42, %v2221_v40  ;;  %vm2223_vm0 = vweird.f32 %v6903_v20  ;;  %v2227_v47 = vand.u32 2147483647, %v6903_v20 }
 0x214   :  { %2321 = vrot.lane.b32.xlu0 %v2186_v31, %s4218_s21  ;;  %vm2168_vm1 = vcmp.eq.f32.partialorder %v2167_v57, 8.507059e+37  ;;  %vm7029_vm2 = vmor %vm2223_vm0, %vm2224_vm15  ;;  %vm2361_vm4 = vcmask 15368   ;;  %vm2209_vm5 = vweird.f32 %v6969_v50  ;;  %v2230_v20 = vor.u32 1.1754944e-38, %v2229_v28  ;;  %v7188_v28 = vld [vmem:[%s8546_s2 + $0x90] sm:$0xff] }
 0x215   :  { %v2206_v32 = vmul.f32 %v6969_v50, %v2205_v2  ;;  %v2171_v34 = vsel %vm2168_vm1, %v2170_v0, %v2166_v45  ;;  %v2226_v44 = vsel %vm7029_vm2, %v6958_v42, %v2222_v15  ;;  %2364 = vst.msk [vmem:[%s8547_s3 + $0x10] sm:$0xff] %vm2361_vm4, %v6967_v13  ;;  %v2214_v26 = vand.u32 2147483648, %v6908_v10  ;;  %v7204_v0 = vld [vmem:[%s8546_s2 + $0x58] sm:$0xff] }
 0x216   :  { %2507 = vrot.lane.b32.xlu1 %v2437_v61, %s4216_s25  ;;  %2362 = vst.msk [vmem:[%s8547_s3] sm:$0xff] %vm2361_vm4, %v2266_v4  ;;  %vm2228_vm6 = vcmp.eq.f32.partialorder %v2227_v47, 8.507059e+37  ;;  %vm2208_vm7 = vweird.f32 %v6908_v10  ;;  %v2212_v36 = vand.u32 2147483647, %v6908_v10  ;;  %v1079_v62 = vadd.f32 %v8804_v9, %v1078_v58  ;;  %v7196_v4 = vld [vmem:[%s8546_s2 + $0x38] sm:$0xff]  ;;  %v7216_v47 = vld [vmem:[%s8546_s2 + $0xa8] sm:$0xff] }
 0x217   :  { %v2207_v7 = vadd.f32 %v6969_v50, %v2206_v32  ;;  %2367 = vst.msk [vmem:[%s8547_s3 + $0x28] sm:$0xff] %vm2361_vm4, %v2276_v19  ;;  %v2231_v63 = vsel %vm2228_vm6, %v2230_v20, %v2226_v44  ;;  %vm7058_vm8 = vmor %vm2208_vm7, %vm2209_vm5  ;;  %vm1080_vm9 = vweird.f32 %v8803_v5  ;;  %vm1081_vm10 = vweird.f32 %v8804_v9  ;;  %v7164_v19 = vld [vmem:[%s8546_s2 + $0x20] sm:$0xff]  ;;  %v7236_v20 = vld [vmem:[%s8546_s2 + $0x70] sm:$0xff] }
 0x218   :  { %v1084_v10 = vand.u32 2147483647, %v8803_v5  ;;  %v2440_v42 = vmul.f32 %v7068_v6, %v6899_v12  ;;  %2370 = vst.msk [vmem:[%s8547_s3 + $0x40] sm:$0xff] %vm2361_vm4, %v2282_v38  ;;  %vm7079_vm11 = vmor %vm1080_vm9, %vm1081_vm10  ;;  %v1086_v11 = vand.u32 2147483648, %v8803_v5  ;;  %v1121_v53 = vmul.f32 %v7023_v25, %v6860_v48 }
 0x219   :  { %2319 = vrot.lane.b32.xlu2 %v2171_v34, %s4218_s21  ;;  %v2211_v60 = vsel %vm7058_vm8, %v6969_v50, %v2207_v7  ;;  %v2215_v13 = vor.u32 1.1754944e-38, %v2214_v26  ;;  %v1083_v23 = vsel %vm7079_vm11, %v8804_v9, %v1079_v62  ;;  %vm2213_vm12 = vcmp.eq.f32.partialorder %v2212_v36, 8.507059e+37  ;;  %v7228_v34 = vld [vmem:[%s8546_s2 + $0x50] sm:$0xff]  ;;  %v7248_v36 = vld [vmem:[%s8546_s2 + $0xc0] sm:$0xff] }
 0x21a   :  { %v1087_v50 = vor.u32 1.1754944e-38, %v1086_v11  ;;  %v1122_v49 = vsub.f32 1.0, %v1121_v53  ;;  %vm1085_vm13 = vcmp.eq.f32.partialorder %v1084_v10, 8.507059e+37  ;;  %v1131_v16 = vand.u32 2147483648, %v6860_v48 }
 0x21b   :  { %v2216_v8 = vsel %vm2213_vm12, %v2215_v13, %v2211_v60  ;;  %vm1126_vm14 = vweird.f32 %v7023_v25  ;;  %v1129_v24 = vand.u32 2147483647, %v6860_v48  ;;  %v2433_v52 = vmul.f32 %v7106_v18, %v6899_v12  ;;  %v2268_v39 = vpop.permute.xlu0 %2267  ;;  %v7288_v13 = vld [vmem:[%s8546_s2 + $0x80] sm:$0xff] }
 0x21c   :  { %2327 = vrot.lane.b32.xlu0 %v2231_v63, %s4218_s21  ;;  %v1088_v5 = vsel %vm1085_vm13, %v1087_v50, %v1083_v23  ;;  %v1123_v9 = vmul.f32 %v7023_v25, %v1122_v49  ;;  %vm1125_vm15 = vweird.f32 %v6860_v48  ;;  %v1132_v1 = vor.u32 1.1754944e-38, %v1131_v16  ;;  %2363 = vst.msk [vmem:[%s8547_s3 + $0x8] sm:$0xff] %vm2361_vm4, %v2268_v39  ;;  %v7304_v49 = vld [vmem:[%s8546_s2 + $0xa0] sm:$0xff] }
 0x21d   :  { %v2272_v3 = vpop.permute.xlu2 %2271  ;;  %1164 = vst.msk [vmem:[%s8547_s3 + $0xe0] sm:$0xff] %vm1135_vm3, %v1088_v5  ;;  %v2288_v22 = vpop.permute.xlu1 %2287  ;;  %vm1127_vm0 = vmor %vm1125_vm15, %vm1126_vm14  ;;  %vm1167_vm1 = vcmask 1024   ;;  %v2443_v54 = vmul.f32 %v7116_v30, %v6899_v12  ;;  %vm1130_vm3 = vcmp.eq.f32.partialorder %v1129_v24, 8.507059e+37  ;;  %v2432_v29 = vmul.f32 %v7136_v55, %v6899_v12 }
 0x21e   :  { %2513 = vrot.lane.b32.xlu1 %v2440_v42, %s4216_s25  ;;  %2365 = vst.msk [vmem:[%s8547_s3 + $0x18] sm:$0xff] %vm2361_vm4, %v2272_v3  ;;  %v1124_v41 = vadd.f32 %v7023_v25, %v1123_v9  ;;  %v2436_v35 = vmul.f32 %v7144_v14, %v6899_v12  ;;  %v2446_v31 = vmul.f32 %v7152_v21, %v6899_v12  ;;  %v7268_v42 = vld [vmem:[%s8546_s2 + $0x88] sm:$0xff]  ;;  %v7312_v3 = vld [vmem:[%s8546_s2 + $0xf0] sm:$0xff]  ;;  %vm2393_vm2 = vcmask 9224  }
 0x21f   :  { %2373 = vst.msk [vmem:[%s8547_s3 + $0x58] sm:$0xff] %vm2361_vm4, %v2288_v22  ;;  %v2435_v61 = vmul.f32 %v7164_v19, %v6899_v12  ;;  %v2439_v40 = vmul.f32 %v7176_v43, %v6899_v12  ;;  %v2449_v2 = vmul.f32 %v7188_v28, %v6899_v12  ;;  %v2438_v58 = vmul.f32 %v7196_v4, %v6899_v12  ;;  %v7324_v9 = vld [vmem:[%s8546_s2 + $0x98] sm:$0xff] }
 0x220   :  { %v1128_v48 = vsel %vm1127_vm0, %v7023_v25, %v1124_v41  ;;  %v2442_v15 = vmul.f32 %v7204_v0, %v6899_v12  ;;  %v2452_v27 = vmul.f32 %v7216_v47, %v6899_v12  ;;  %v2441_v44 = vmul.f32 %v7228_v34, %v6899_v12  ;;  %v7334_v41 = vld [vmem:[%s8546_s2 + $0xb8] sm:$0xff] }
 0x221   :  { %2325 = vrot.lane.b32.xlu2 %v2216_v8, %s4218_s21  ;;  %v1133_v59 = vsel %vm1130_vm3, %v1132_v1, %v1128_v48  ;;  %v2445_v7 = vmul.f32 %v7236_v20, %v6899_v12  ;;  %v2455_v62 = vmul.f32 %v7248_v36, %v6899_v12  ;;  %v2444_v38 = vmul.f32 %v7260_v33, %v6899_v12  ;;  %s3699_s21 = sld [smem:[#allocation2 + $0x8]]  ;;  %v7353_v48 = vld [vmem:[%s8546_s2 + $0xb0] sm:$0xff] }
 0x222   :  { %1168 = vst.msk [vmem:[%s8547_s3 + $0xf8] sm:$0x3] %vm1167_vm1, %v1133_v59  ;;  %v2448_v60 = vmul.f32 %v7268_v42, %v6899_v12  ;;  %v2458_v11 = vmul.f32 %v7280_v37, %v6899_v12  ;;  %v2447_v23 = vmul.f32 %v7288_v13, %v6899_v12  ;;  %v2451_v8 = vmul.f32 %v7304_v49, %v6899_v12 }
 0x223   :  { %v2461_v16 = vmul.f32 %v7312_v3, %v6899_v12  ;;  %v2450_v24 = vmul.f32 %v7324_v9, %v6899_v12  ;;  %v2454_v22 = vmul.f32 %v7334_v41, %v6899_v12  ;;  %v2453_v59 = vmul.f32 %v7353_v48, %v6899_v12 }
 0x224   :  { %2499 = vrot.lane.b32.xlu0 %v2433_v52, %s4216_s25 }
 0x226   :  { %2519 = vrot.lane.b32.xlu1 %v2443_v54, %s4216_s25 }
 0x227   :  { %v7329_v52 = vstv %s3699_s21 }
 0x228   :  { %v2626_v1 = vmul.f32 %v7136_v55, %v7329_v52 }
 0x229   :  { %2497 = vrot.lane.b32.xlu2 %v2432_v29, %s4216_s25 }
 0x22b   :  { %v2278_v57 = vpop.permute.xlu2 %2277  ;;  %v2274_v46 = vpop.permute.xlu0 %2273 }
 0x22c   :  { %2505 = vrot.lane.b32.xlu0 %v2436_v35, %s4216_s25  ;;  %2368 = vst.msk [vmem:[%s8547_s3 + $0x30] sm:$0xff] %vm2361_vm4, %v2278_v57  ;;  %v7361_v35 = vld [vmem:[%s8546_s2 + $0xd0] sm:$0xff]  ;;  %v2629_v57 = vmul.f32 %v7164_v19, %v7329_v52 }
 0x22d   :  { %2366 = vst.msk [vmem:[%s8547_s3 + $0x20] sm:$0xff] %vm2361_vm4, %v2274_v46 }
 0x22e   :  { %2525 = vrot.lane.b32.xlu1 %v2446_v31, %s4216_s25  ;;  %8815 = vst [vmem:[#allocation31_spill] sm:$0xff] %v7361_v35  ;;  %v2457_v31 = vmul.f32 %v7361_v35, %v6899_v12 }
 0x230   :  { %v2294_v45 = vpop.permute.xlu1 %2293 }
 0x231   :  { %2503 = vrot.lane.b32.xlu2 %v2435_v61, %s4216_s25  ;;  %2376 = vst.msk [vmem:[%s8547_s3 + $0x70] sm:$0xff] %vm2361_vm4, %v2294_v45 }
 0x234   :  { %2511 = vrot.lane.b32.xlu0 %v2439_v40, %s4216_s25  ;;  %v7380_v40 = vld [vmem:[%s8546_s2 + $0xc8] sm:$0xff] }
 0x235   :  { %v2456_v45 = vmul.f32 %v7380_v40, %v6899_v12 }
 0x236   :  { %2531 = vrot.lane.b32.xlu1 %v2449_v2, %s4216_s25  ;;  %v7392_v2 = vld [vmem:[%s8546_s2 + $0xe8] sm:$0xff] }
 0x237   :  { %v2284_v25 = vpop.permute.xlu2 %2283  ;;  %8816 = vst [vmem:[#allocation11_spill] sm:$0xff] %v7392_v2 }
 0x238   :  { %2371 = vst.msk [vmem:[%s8547_s3 + $0x48] sm:$0xff] %vm2361_vm4, %v2284_v25  ;;  %v2632_v25 = vmul.f32 %v7196_v4, %v7329_v52 }
 0x239   :  { %2509 = vrot.lane.b32.xlu2 %v2438_v58, %s4216_s25  ;;  %v2460_v58 = vmul.f32 %v7392_v2, %v6899_v12 }
 0x23b   :  { %v2280_v32 = vpop.permute.xlu0 %2279 }
 0x23c   :  { %2517 = vrot.lane.b32.xlu0 %v2442_v15, %s4216_s25  ;;  %2369 = vst.msk [vmem:[%s8547_s3 + $0x38] sm:$0xff] %vm2361_vm4, %v2280_v32  ;;  %v7407_v32 = vld [vmem:[%s8546_s2 + $0xe0] sm:$0xff] }
 0x23e   :  { %2537 = vrot.lane.b32.xlu1 %v2452_v27, %s4216_s25 }
 0x240   :  { %v2300_v26 = vpop.permute.xlu1 %2299 }
 0x241   :  { %2515 = vrot.lane.b32.xlu2 %v2441_v44, %s4216_s25  ;;  %2379 = vst.msk [vmem:[%s8547_s3 + $0x88] sm:$0xff] %vm2361_vm4, %v2300_v26  ;;  %v2459_v44 = vmul.f32 %v7407_v32, %v6899_v12  ;;  %v2625_v26 = vmul.f32 %v6917_v17, %v7329_v52 }
 0x243   :  { %v2290_v63 = vpop.permute.xlu2 %2289 }
 0x244   :  { %2523 = vrot.lane.b32.xlu0 %v2445_v7, %s4216_s25  ;;  %2374 = vst.msk [vmem:[%s8547_s3 + $0x60] sm:$0xff] %vm2361_vm4, %v2290_v63 }
 0x246   :  { %2543 = vrot.lane.b32.xlu1 %v2455_v62, %s4216_s25  ;;  %v2635_v62 = vmul.f32 %v7228_v34, %v7329_v52 }
 0x247   :  { %v2286_v10 = vpop.permute.xlu0 %2285 }
 0x248   :  { %2372 = vst.msk [vmem:[%s8547_s3 + $0x50] sm:$0xff] %vm2361_vm4, %v2286_v10 }
 0x249   :  { %2521 = vrot.lane.b32.xlu2 %v2444_v38, %s4216_s25  ;;  %v7433_v38 = vld [vmem:[%s8546_s2 + $0xf8] sm:$0x3] }
 0x24a   :  { %8817 = vst [vmem:[#allocation27_spill] sm:$0xff] %v7433_v38  ;;  %v2462_v10 = vmul.f32 %v7433_v38, %v6899_v12  ;;  %v2627_v12 = vmul.f32 %v7106_v18, %v7329_v52 }
 0x24c   :  { %2529 = vrot.lane.b32.xlu0 %v2448_v60, %s4216_s25  ;;  %v2306_v53 = vpop.permute.xlu1 %2305 }
 0x24d   :  { %2382 = vst.msk [vmem:[%s8547_s3 + $0xa0] sm:$0xff] %vm2361_vm4, %v2306_v53  ;;  %v2628_v53 = vmul.f32 %v6949_v51, %v7329_v52 }
 0x24e   :  { %2549 = vrot.lane.b32.xlu1 %v2458_v11, %s4216_s25 }
 0x24f   :  { %v2296_v50 = vpop.permute.xlu2 %2295 }
 0x250   :  { %2377 = vst.msk [vmem:[%s8547_s3 + $0x78] sm:$0xff] %vm2361_vm4, %v2296_v50 }
 0x251   :  { %2527 = vrot.lane.b32.xlu2 %v2447_v23, %s4216_s25  ;;  %v2638_v23 = vmul.f32 %v7260_v33, %v7329_v52 }
 0x253   :  { %v2292_v5 = vpop.permute.xlu0 %2291 }
 0x254   :  { %2535 = vrot.lane.b32.xlu0 %v2451_v8, %s4216_s25  ;;  %2375 = vst.msk [vmem:[%s8547_s3 + $0x68] sm:$0xff] %vm2361_vm4, %v2292_v5  ;;  %v2631_v5 = vmul.f32 %v7008_v56, %v7329_v52 }
 0x256   :  { %2555 = vrot.lane.b32.xlu1 %v2461_v16, %s4216_s25 }
 0x258   :  { %v2312_v39 = vpop.permute.xlu1 %2311 }
 0x259   :  { %2533 = vrot.lane.b32.xlu2 %v2450_v24, %s4216_s25  ;;  %2385 = vst.msk [vmem:[%s8547_s3 + $0xb8] sm:$0xff] %vm2361_vm4, %v2312_v39  ;;  %v2641_v24 = vmul.f32 %v7288_v13, %v7329_v52  ;;  %v2630_v39 = vmul.f32 %v7144_v14, %v7329_v52 }
 0x25b   :  { %v2302_v54 = vpop.permute.xlu2 %2301 }
 0x25c   :  { %2380 = vst.msk [vmem:[%s8547_s3 + $0x90] sm:$0xff] %vm2361_vm4, %v2302_v54  ;;  %2541 = vrot.lane.b32.xlu0 %v2454_v22, %s4216_s25 }
 0x25e   :  { %2691 = vrot.lane.b32.xlu1 %v2626_v1, %s4217_s29 }
 0x25f   :  { %v2298_v29 = vpop.permute.xlu0 %2297 }
 0x260   :  { %2378 = vst.msk [vmem:[%s8547_s3 + $0x80] sm:$0xff] %vm2361_vm4, %v2298_v29  ;;  %v2644_v29 = vmul.f32 %v7324_v9, %v7329_v52 }
 0x261   :  { %2539 = vrot.lane.b32.xlu2 %v2453_v59, %s4216_s25  ;;  %v2634_v59 = vmul.f32 %v7068_v6, %v7329_v52 }
 0x263   :  { %v2308_v46 = vpop.permute.xlu2 %2307 }
 0x264   :  { %2383 = vst.msk [vmem:[%s8547_s3 + $0xa8] sm:$0xff] %vm2361_vm4, %v2308_v46  ;;  %2547 = vrot.lane.b32.xlu0 %v2457_v31, %s4216_s25  ;;  %v2318_v61 = vpop.permute.xlu1 %2317 }
 0x265   :  { %2388 = vst.msk [vmem:[%s8547_s3 + $0xd0] sm:$0xff] %vm2361_vm4, %v2318_v61 }
 0x266   :  { %2697 = vrot.lane.b32.xlu1 %v2629_v57, %s4217_s29  ;;  %v2633_v57 = vmul.f32 %v7176_v43, %v7329_v52 }
 0x269   :  { %2545 = vrot.lane.b32.xlu2 %v2456_v45, %s4216_s25  ;;  %v2637_v45 = vmul.f32 %v7116_v30, %v7329_v52 }
 0x26b   :  { %v2314_v15 = vpop.permute.xlu2 %2313  ;;  %v2304_v27 = vpop.permute.xlu0 %2303 }
 0x26c   :  { %2386 = vst.msk [vmem:[%s8547_s3 + $0xc0] sm:$0xff] %vm2361_vm4, %v2314_v15  ;;  %2553 = vrot.lane.b32.xlu0 %v2460_v58, %s4216_s25  ;;  %v2647_v58 = vmul.f32 %v7353_v48, %v7329_v52  ;;  %v2636_v15 = vmul.f32 %v7204_v0, %v7329_v52 }
 0x26d   :  { %2381 = vst.msk [vmem:[%s8547_s3 + $0x98] sm:$0xff] %vm2361_vm4, %v2304_v27 }
 0x26e   :  { %2703 = vrot.lane.b32.xlu1 %v2632_v25, %s4217_s29 }
 0x270   :  { %v2324_v7 = vpop.permute.xlu1 %2323 }
 0x271   :  { %2551 = vrot.lane.b32.xlu2 %v2459_v44, %s4216_s25  ;;  %2391 = vst.msk [vmem:[%s8547_s3 + $0xe8] sm:$0xff] %vm2361_vm4, %v2324_v7  ;;  %v2640_v7 = vmul.f32 %v7152_v21, %v7329_v52 }
 0x273   :  { %v2320_v63 = vpop.permute.xlu2 %2319 }
 0x274   :  { %2389 = vst.msk [vmem:[%s8547_s3 + $0xd8] sm:$0xff] %vm2361_vm4, %v2320_v63  ;;  %2689 = vrot.lane.b32.xlu0 %v2625_v26, %s4217_s29  ;;  %v2650_v26 = vmul.f32 %v7380_v40, %v7329_v52  ;;  %v2639_v63 = vmul.f32 %v7236_v20, %v7329_v52 }
 0x276   :  { %2709 = vrot.lane.b32.xlu1 %v2635_v62, %s4217_s29  ;;  %v2310_v60 = vpop.permute.xlu0 %2309 }
 0x277   :  { %2384 = vst.msk [vmem:[%s8547_s3 + $0xb0] sm:$0xff] %vm2361_vm4, %v2310_v60 }
 0x278   :  { %v7442_v11 = vpop.permute.xlu1 %2495 }
 0x279   :  { %2557 = vrot.lane.b32.xlu2 %v2462_v10, %s4216_s25 }
 0x27b   :  { %v2326_v50 = vpop.permute.xlu2 %2325 }
 0x27c   :  { %2392 = vst.msk [vmem:[%s8547_s3 + $0xf0] sm:$0xff] %vm2361_vm4, %v2326_v50  ;;  %2695 = vrot.lane.b32.xlu0 %v2628_v53, %s4217_s29  ;;  %v2643_v53 = vmul.f32 %v7188_v28, %v7329_v52 }
 0x27e   :  { %2715 = vrot.lane.b32.xlu1 %v2638_v23, %s4217_s29  ;;  %v2316_v8 = vpop.permute.xlu0 %2315  ;;  %v2653_v23 = vmul.f32 %v7407_v32, %v7329_v52 }
 0x27f   :  { %2387 = vst.msk [vmem:[%s8547_s3 + $0xc8] sm:$0xff] %vm2361_vm4, %v2316_v8 }
 0x280   :  { %v7461_v16 = vpop.permute.xlu1 %2501 }
 0x281   :  { %2693 = vrot.lane.b32.xlu2 %v2627_v12, %s4217_s29  ;;  %v2642_v12 = vmul.f32 %v7268_v42, %v7329_v52 }
 0x283   :  { %v7468_v22 = vpop.permute.xlu2 %2497 }
 0x284   :  { %2701 = vrot.lane.b32.xlu0 %v2631_v5, %s4217_s29 }
 0x286   :  { %2721 = vrot.lane.b32.xlu1 %v2641_v24, %s4217_s29  ;;  %v2322_v1 = vpop.permute.xlu0 %2321  ;;  %v2646_v24 = vmul.f32 %v7216_v47, %v7329_v52 }
 0x287   :  { %2390 = vst.msk [vmem:[%s8547_s3 + $0xe0] sm:$0xff] %vm2361_vm4, %v2322_v1 }
 0x288   :  { %v7478_v54 = vpop.permute.xlu1 %2507 }
 0x289   :  { %2699 = vrot.lane.b32.xlu2 %v2630_v39, %s4217_s29  ;;  %v2656_v39 = vmul.f32 %v7433_v38, %v7329_v52  ;;  %v7602_v38 = vstv %s3700_s0 }
 0x28b   :  { %v7485_v31 = vpop.permute.xlu2 %2503 }
 0x28c   :  { %2707 = vrot.lane.b32.xlu0 %v2634_v59, %s4217_s29  ;;  %v2645_v59 = vmul.f32 %v7304_v49, %v7329_v52 }
 0x28e   :  { %2727 = vrot.lane.b32.xlu1 %v2644_v29, %s4217_s29  ;;  %v2328_v46 = vpop.permute.xlu0 %2327 }
 0x28f   :  { %2394 = vst.msk [vmem:[%s8547_s3 + $0xf8] sm:$0x3] %vm2393_vm2, %v2328_v46  ;;  %v2649_v46 = vmul.f32 %v7248_v36, %v7329_v52 }
 0x290   :  { %v7494_v61 = vpop.permute.xlu1 %2513 }
 0x291   :  { %2705 = vrot.lane.b32.xlu2 %v2633_v57, %s4217_s29 }
 0x293   :  { %v7501_v25 = vpop.permute.xlu2 %2509 }
 0x294   :  { %2713 = vrot.lane.b32.xlu0 %v2637_v45, %s4217_s29 }
 0x296   :  { %2733 = vrot.lane.b32.xlu1 %v2647_v58, %s4217_s29  ;;  %v7507_v27 = vpop.permute.xlu0 %2499  ;;  %v2648_v58 = vmul.f32 %v7334_v41, %v7329_v52 }
 0x298   :  { %v7509_v44 = vpop.permute.xlu1 %2519 }
 0x299   :  { %2711 = vrot.lane.b32.xlu2 %v2636_v15, %s4217_s29 }
 0x29b   :  { %v7516_v62 = vpop.permute.xlu2 %2515 }
 0x29c   :  { %2719 = vrot.lane.b32.xlu0 %v2640_v7, %s4217_s29 }
 0x29e   :  { %2739 = vrot.lane.b32.xlu1 %v2650_v26, %s4217_s29  ;;  %v7522_v10 = vpop.permute.xlu0 %2505  ;;  %v2652_v26 = vmul.f32 %v7280_v37, %v7329_v52 }
 0x2a0   :  { %v7524_v60 = vpop.permute.xlu1 %2525 }
 0x2a1   :  { %2717 = vrot.lane.b32.xlu2 %v2639_v63, %s4217_s29 }
 0x2a3   :  { %v7531_v50 = vpop.permute.xlu2 %2521 }
 0x2a4   :  { %2725 = vrot.lane.b32.xlu0 %v2643_v53, %s4217_s29  ;;  %v2651_v53 = vmul.f32 %v7361_v35, %v7329_v52 }
 0x2a6   :  { %2745 = vrot.lane.b32.xlu1 %v2653_v23, %s4217_s29  ;;  %v7537_v8 = vpop.permute.xlu0 %2511 }
 0x2a8   :  { %v7539_v5 = vpop.permute.xlu1 %2531 }
 0x2a9   :  { %2723 = vrot.lane.b32.xlu2 %v2642_v12, %s4217_s29 }
 0x2ab   :  { %v7546_v1 = vpop.permute.xlu2 %2527 }
 0x2ac   :  { %2731 = vrot.lane.b32.xlu0 %v2646_v24, %s4217_s29  ;;  %v2655_v24 = vmul.f32 %v7312_v3, %v7329_v52 }
 0x2ae   :  { %2751 = vrot.lane.b32.xlu1 %v2656_v39, %s4217_s29  ;;  %v7552_v29 = vpop.permute.xlu0 %2517 }
 0x2b0   :  { %v7554_v57 = vpop.permute.xlu1 %2537 }
 0x2b1   :  { %2729 = vrot.lane.b32.xlu2 %v2645_v59, %s4217_s29  ;;  %v2654_v59 = vmul.f32 %v7392_v2, %v7329_v52 }
 0x2b3   :  { %v7559_v45 = vpop.permute.xlu2 %2533 }
 0x2b4   :  { %2737 = vrot.lane.b32.xlu0 %v2649_v46, %s4217_s29 }
 0x2b6   :  { %v7564_v15 = vpop.permute.xlu0 %2523 }
 0x2b8   :  { %v7566_v7 = vpop.permute.xlu1 %2543 }
 0x2b9   :  { %2735 = vrot.lane.b32.xlu2 %v2648_v58, %s4217_s29 }
 0x2bb   :  { %v7571_v63 = vpop.permute.xlu2 %2539 }
 0x2bc   :  { %2743 = vrot.lane.b32.xlu0 %v2652_v26, %s4217_s29  ;;  %v7593_v26 = vstv %s3697_s22 }
 0x2be   :  { %v7576_v23 = vpop.permute.xlu0 %2529 }
 0x2c0   :  { %v7578_v12 = vpop.permute.xlu1 %2549 }
 0x2c1   :  { %2741 = vrot.lane.b32.xlu2 %v2651_v53, %s4217_s29  ;;  %v2398_v53 = vmul.f32 %v7136_v55, %v7593_v26 }
 0x2c3   :  { %v7583_v39 = vpop.permute.xlu2 %2545 }
 0x2c4   :  { %8818 = vst [vmem:[#allocation12_spill] sm:$0xff] %v7583_v39  ;;  %2749 = vrot.lane.b32.xlu0 %v2655_v24, %s4217_s29  ;;  %v2592_v24 = vadd.f32 %v7468_v22, %v2398_v53  ;;  %v2403_v22 = vmul.f32 %v7008_v56, %v7593_v26  ;;  %v2406_v53 = vmul.f32 %v7068_v6, %v7593_v26 }
 0x2c6   :  { %v7588_v46 = vpop.permute.xlu0 %2535 }
 0x2c7   :  { %8819 = vst [vmem:[#allocation17_spill] sm:$0xff] %v7588_v46  ;;  %v2397_v46 = vmul.f32 %v6917_v17, %v7593_v26 }
 0x2c8   :  { %v7590_v58 = vpop.permute.xlu1 %2555 }
 0x2c9   :  { %8820 = vst [vmem:[#allocation14_spill] sm:$0xff] %v7590_v58  ;;  %2747 = vrot.lane.b32.xlu2 %v2654_v59, %s4217_s29  ;;  %v2400_v59 = vmul.f32 %v6949_v51, %v7593_v26  ;;  %v2401_v58 = vmul.f32 %v7164_v19, %v7593_v26  ;;  %v2409_v51 = vmul.f32 %v7116_v30, %v7593_v26  ;;  %s4219_s29 = smov 2  }
 0x2ca   :  { %v2407_v19 = vmul.f32 %v7228_v34, %v7593_v26  ;;  %v2410_v30 = vmul.f32 %v7260_v33, %v7593_v26  ;;  %v2415_v34 = vmul.f32 %v7188_v28, %v7593_v26  ;;  %v2416_v28 = vmul.f32 %v7324_v9, %v7593_v26 }
 0x2cb   :  { %v7597_v35 = vpop.permute.xlu2 %2551  ;;  %v7631_v6 = vadd.f32 %v7461_v16, %v2400_v59  ;;  %v7646_v59 = vadd.f32 %v7494_v61, %v2406_v53  ;;  %v7659_v61 = vadd.f32 %v7509_v44, %v2409_v51  ;;  %v2411_v9 = vmul.f32 %v7236_v20, %v7593_v26 }
 0x2cc   :  { %8821 = vst [vmem:[#allocation16_spill] sm:$0xff] %v7597_v35 }
 0x2ce   :  { %v7599_v39 = vpop.permute.xlu0 %2541 }
 0x2d0   :  { %v2692_v52 = vpop.permute.xlu1 %2691 }
 0x2d1   :  { %v2786_v2 = vadd.f32 %v2692_v52, %v2592_v24  ;;  %v2404_v24 = vmul.f32 %v7196_v4, %v7593_v26  ;;  %v7620_v52 = vadd.f32 %v7442_v11, %v2397_v46  ;;  %v2595_v4 = vadd.f32 %v7485_v31, %v2401_v58 }
 0x2d2   :  { %v2412_v11 = vmul.f32 %v7152_v21, %v7593_v26  ;;  %v7637_v46 = vadd.f32 %v7478_v54, %v2403_v22  ;;  %v2413_v21 = vmul.f32 %v7288_v13, %v7593_v26  ;;  %v2405_v54 = vmul.f32 %v7176_v43, %v7593_v26 }
 0x2d3   :  { %v2820_v55 = vadd.f32 %v7602_v38, %v2786_v2  ;;  %v7611_v35 = vpop.permute.xlu2 %2557  ;;  %v2399_v2 = vmul.f32 %v7106_v18, %v7593_v26  ;;  %v2402_v18 = vmul.f32 %v7144_v14, %v7593_v26  ;;  %v2598_v58 = vadd.f32 %v7501_v25, %v2404_v24 }
 0x2d4   :  { %v2418_v14 = vmul.f32 %v7216_v47, %v7593_v26  ;;  %v2408_v13 = vmul.f32 %v7204_v0, %v7593_v26  ;;  %v2421_v43 = vmul.f32 %v7248_v36, %v7593_v26  ;;  %v2419_v47 = vmul.f32 %v7353_v48, %v7593_v26 }
 0x2d5   :  { %v3702_v17 = vmul.f32 -1.442695, %v2820_v55  ;;  %v2593_v33 = vadd.f32 %v7507_v27, %v2399_v2  ;;  %v2601_v27 = vadd.f32 %v7516_v62, %v2407_v19  ;;  %v7672_v53 = vadd.f32 %v7524_v60, %v2412_v11 }
 0x2d6   :  { %v7628_v56 = vpop.permute.xlu0 %2547  ;;  %v2596_v0 = vadd.f32 %v7522_v10, %v2402_v18  ;;  %v2424_v36 = vmul.f32 %v7280_v37, %v7593_v26  ;;  %v2422_v48 = vmul.f32 %v7380_v40, %v7593_v26  ;;  %v7688_v60 = vadd.f32 %v7539_v5, %v2415_v34 }
 0x2d7   :  { %3995 = vpow2.f32 %v3702_v17  ;;  %v7678_v17 = vadd.f32 %v7531_v50, %v2410_v30  ;;  %v2599_v10 = vadd.f32 %v7537_v8, %v2405_v54  ;;  %v2414_v37 = vmul.f32 %v7268_v42, %v7593_v26  ;;  %v8824_v54 = vld [vmem:[#allocation14_spill] sm:$0xff] }
 0x2d8   :  { %v2698_v16 = vpop.permute.xlu1 %2697  ;;  %v2427_v50 = vmul.f32 %v7312_v3, %v7593_v26  ;;  %v2425_v40 = vmul.f32 %v7407_v32, %v7593_v26  ;;  %v7702_v5 = vadd.f32 %v7552_v29, %v2408_v13  ;;  %v2417_v42 = vmul.f32 %v7304_v49, %v7593_v26  ;;  %v8827_v13 = vld [vmem:[#allocation31_spill] sm:$0xff] }
 0x2d9   :  { %v2789_v31 = vadd.f32 %v2698_v16, %v2595_v4  ;;  %v7699_v4 = vadd.f32 %v7546_v1, %v2413_v21  ;;  %v7707_v11 = vadd.f32 %v7554_v57, %v2418_v14  ;;  %v7710_v3 = vadd.f32 %v7559_v45, %v2416_v28  ;;  %v8826_v14 = vld [vmem:[#allocation16_spill] sm:$0xff] }
 0x2da   :  { %v7713_v32 = vadd.f32 %v7564_v15, %v2411_v9  ;;  %v7716_v1 = vadd.f32 %v7566_v7, %v2421_v43  ;;  %v7719_v29 = vadd.f32 %v7571_v63, %v2419_v47  ;;  %v2420_v49 = vmul.f32 %v7334_v41, %v7593_v26  ;;  %v8822_v15 = vld [vmem:[#allocation27_spill] sm:$0xff]  ;;  %v8823_v63 = vld [vmem:[#allocation12_spill] sm:$0xff] }
 0x2db   :  { %v2823_v55 = vadd.f32 %v7602_v38, %v2789_v31  ;;  %v2694_v25 = vpop.permute.xlu2 %2693  ;;  %v7725_v18 = vadd.f32 %v7578_v12, %v2424_v36  ;;  %v7728_v45 = vadd.f32 %v7576_v23, %v2414_v37  ;;  %v7732_v34 = vmul.f32 %v8822_v15, %v7593_v26  ;;  %v8825_v31 = vld [vmem:[#allocation17_spill] sm:$0xff] }
 0x2dc   :  { %v2787_v22 = vadd.f32 %v2694_v25, %v2593_v33  ;;  %v7735_v21 = vadd.f32 %v8823_v63, %v2422_v48  ;;  %v7738_v41 = vadd.f32 %v8824_v54, %v2427_v50  ;;  %v7744_v23 = vadd.f32 %v8826_v14, %v2425_v40 }
 0x2dd   :  { %v3996_v44 = vpop.eup %3995  ;;  %v3705_v24 = vmul.f32 -1.442695, %v2823_v55  ;;  %v7750_v43 = vmul.f32 %v8827_v13, %v7593_v26  ;;  %v7754_v47 = vadd.f32 %v7599_v39, %v2420_v49 }
 0x2de   :  { %v7682_v62 = vadd.f32 1.0, %v3996_v44  ;;  %v2821_v20 = vadd.f32 %v7602_v38, %v2787_v22  ;;  %v7685_v51 = vpop.permute.xlu0 %2553 }
 0x2df   :  { %3997 = vpow2.f32 %v3705_v24 }
 0x2e0   :  { %3999 = vrcp.f32 %v7682_v62  ;;  %v3703_v19 = vmul.f32 -1.442695, %v2821_v20  ;;  %v2704_v2 = vpop.permute.xlu1 %2703  ;;  %v3003_v24 = vand.u32 2147483647, %v7682_v62  ;;  %v3005_v48 = vand.u32 2147483648, %v7682_v62 }
 0x2e1   :  { %v2792_v8 = vadd.f32 %v2704_v2, %v2598_v58  ;;  %v7741_v58 = vadd.f32 %v8825_v31, %v2417_v42  ;;  %vm2999_vm4 = vweird.f32 %v7682_v62 }
 0x2e2   :  { %4001 = vpow2.f32 %v3703_v19  ;;  %vm7771_vm6 = vcmp.eq.f32.partialorder %v3003_v24, 8.507059e+37 }
 0x2e3   :  { %v2826_v30 = vadd.f32 %v7602_v38, %v2792_v8  ;;  %v2700_v57 = vpop.permute.xlu2 %2699 }
 0x2e4   :  { %v2790_v7 = vadd.f32 %v2700_v57, %v2596_v0 }
 0x2e5   :  { %v3998_v16 = vpop.eup %3997  ;;  %v3708_v12 = vmul.f32 -1.442695, %v2826_v30 }
 0x2e6   :  { %v4000_v33 = vpop.eup %3999  ;;  %v7746_v28 = vadd.f32 1.0, %v3998_v16  ;;  %v2824_v55 = vadd.f32 %v7602_v38, %v2790_v7  ;;  %v2690_v25 = vpop.permute.xlu0 %2689  ;;  %v3006_v16 = vor.u32 1.1754944e-38, %v3005_v48 }
 0x2e7   :  { %4003 = vpow2.f32 %v3708_v12  ;;  %v2785_v9 = vadd.f32 %v2690_v25, %v7620_v52  ;;  %v2995_v22 = vmul.f32 %v4000_v33, %v7682_v62  ;;  %v8828_v52 = vld [vmem:[#allocation11_spill] sm:$0xff]  ;;  %vm3000_vm5 = vweird.f32 %v4000_v33 }
 0x2e8   :  { %v4002_v44 = vpop.eup %4001  ;;  %4005 = vrcp.f32 %v7746_v28  ;;  %v3706_v0 = vmul.f32 -1.442695, %v2824_v55  ;;  %v2710_v36 = vpop.permute.xlu1 %2709  ;;  %v7766_v40 = vmul.f32 %v8828_v52, %v7593_v26  ;;  %v3048_v30 = vand.u32 2147483647, %v7746_v28  ;;  %vm3001_vm7 = vmor %vm2999_vm4, %vm3000_vm5 }
 0x2e9   :  { %v7761_v20 = vadd.f32 1.0, %v4002_v44  ;;  %v2795_v37 = vadd.f32 %v2710_v36, %v2601_v27  ;;  %v2819_v39 = vadd.f32 %v7602_v38, %v2785_v9  ;;  %v2996_v50 = vsub.f32 1.0, %v2995_v22 }
 0x2ea   :  { %4007 = vpow2.f32 %v3706_v0  ;;  %v3050_v26 = vand.u32 2147483648, %v7746_v28  ;;  %vm3044_vm8 = vweird.f32 %v7746_v28  ;;  %vm7786_vm9 = vcmp.eq.f32.partialorder %v3048_v30, 8.507059e+37 }
 0x2eb   :  { %4009 = vrcp.f32 %v7761_v20  ;;  %v2829_v19 = vadd.f32 %v7602_v38, %v2795_v37  ;;  %v2706_v2 = vpop.permute.xlu2 %2705  ;;  %v3701_v42 = vmul.f32 -1.442695, %v2819_v39  ;;  %v2997_v8 = vmul.f32 %v4000_v33, %v2996_v50 }
 0x2ec   :  { %v2793_v49 = vadd.f32 %v2706_v2, %v2599_v10  ;;  %v3051_v10 = vor.u32 1.1754944e-38, %v3050_v26  ;;  %vm3014_vm11 = vweird.f32 %v7761_v20  ;;  %v3018_v37 = vand.u32 2147483647, %v7761_v20 }
 0x2ed   :  { %v4004_v57 = vpop.eup %4003  ;;  %v3711_v15 = vmul.f32 -1.442695, %v2829_v19  ;;  %4011 = vpow2.f32 %v3701_v42  ;;  %v2998_v7 = vadd.f32 %v4000_v33, %v2997_v8 }
 0x2ee   :  { %v4006_v63 = vpop.eup %4005  ;;  %v7777_v54 = vadd.f32 1.0, %v4004_v57  ;;  %v2827_v31 = vadd.f32 %v7602_v38, %v2793_v49  ;;  %v2696_v12 = vpop.permute.xlu0 %2695  ;;  %vm7806_vm13 = vcmp.eq.f32.partialorder %v3018_v37, 8.507059e+37  ;;  %v3020_v57 = vand.u32 2147483648, %v7761_v20 }
 0x2ef   :  { %4013 = vpow2.f32 %v3711_v15  ;;  %v2788_v14 = vadd.f32 %v2696_v12, %v7631_v6  ;;  %v3002_v13 = vsel %vm3001_vm7, %v4000_v33, %v2998_v7  ;;  %v3040_v55 = vmul.f32 %v4006_v63, %v7746_v28 }
 0x2f0   :  { %v4008_v9 = vpop.eup %4007  ;;  %4015 = vrcp.f32 %v7777_v54  ;;  %v3709_v22 = vmul.f32 -1.442695, %v2827_v31  ;;  %v2716_v44 = vpop.permute.xlu1 %2715  ;;  %v3007_v62 = vsel %vm7771_vm6, %v3006_v16, %v3002_v13  ;;  %vm3045_vm10 = vweird.f32 %v4006_v63 }
 0x2f1   :  { %v4010_v0 = vpop.eup %4009  ;;  %v7794_v6 = vadd.f32 1.0, %v4008_v9  ;;  %v2798_v33 = vadd.f32 %v2716_v44, %v7678_v17  ;;  %v2822_v36 = vadd.f32 %v7602_v38, %v2788_v14  ;;  %3493 = vrot.lane.b32.xlu0 %v3007_v62, %s4219_s29  ;;  %v3041_v24 = vsub.f32 1.0, %v3040_v55  ;;  %vm3046_vm14 = vmor %vm3044_vm8, %vm3045_vm10 }
 0x2f2   :  { %4017 = vpow2.f32 %v3709_v22  ;;  %v3010_v48 = vmul.f32 %v4010_v0, %v7761_v20  ;;  %vm3015_vm12 = vweird.f32 %v4010_v0  ;;  %v3021_v13 = vor.u32 1.1754944e-38, %v3020_v57 }
 0x2f3   :  { %v4012_v39 = vpop.eup %4011  ;;  %4019 = vrcp.f32 %v7794_v6  ;;  %v2832_v50 = vadd.f32 %v7602_v38, %v2798_v33  ;;  %v2712_v52 = vpop.permute.xlu2 %2711  ;;  %v3704_v19 = vmul.f32 -1.442695, %v2822_v36  ;;  %v3042_v17 = vmul.f32 %v4006_v63, %v3041_v24  ;;  %vm3016_vm15 = vmor %vm3014_vm11, %vm3015_vm12 }
 0x2f4   :  { %v7803_v2 = vadd.f32 1.0, %v4012_v39  ;;  %v2796_v42 = vadd.f32 %v2712_v52, %v7702_v5  ;;  %v3011_v8 = vsub.f32 1.0, %v3010_v48  ;;  %vm3089_vm0 = vweird.f32 %v7777_v54 }
 0x2f5   :  { %v4014_v27 = vpop.eup %4013  ;;  %v3714_v30 = vmul.f32 -1.442695, %v2832_v50  ;;  %4021 = vpow2.f32 %v3704_v19  ;;  %v3043_v26 = vadd.f32 %v4006_v63, %v3042_v17  ;;  %v3093_v52 = vand.u32 2147483647, %v7777_v54 }
 0x2f6   :  { %v7811_v15 = vpop.eup %4015  ;;  %v7813_v7 = vadd.f32 1.0, %v4014_v27  ;;  %4023 = vrcp.f32 %v7803_v2  ;;  %v2830_v16 = vadd.f32 %v7602_v38, %v2796_v42  ;;  %v2702_v5 = vpop.permute.xlu0 %2701  ;;  %v3012_v31 = vmul.f32 %v4010_v0, %v3011_v8 }
 0x2f7   :  { %4025 = vpow2.f32 %v3714_v30  ;;  %v2791_v12 = vadd.f32 %v2702_v5, %v7637_v46  ;;  %v3047_v14 = vsel %vm3046_vm14, %v4006_v63, %v3043_v26  ;;  %v3085_v46 = vmul.f32 %v7811_v15, %v7777_v54 }
 0x2f8   :  { %v4018_v55 = vpop.eup %4017  ;;  %4027 = vrcp.f32 %v7813_v7  ;;  %v3712_v9 = vmul.f32 -1.442695, %v2830_v16  ;;  %v2722_v22 = vpop.permute.xlu1 %2721  ;;  %v3052_v44 = vsel %vm7786_vm9, %v3051_v10, %v3047_v14  ;;  %v3013_v62 = vadd.f32 %v4010_v0, %v3012_v31 }
 0x2f9   :  { %v7824_v33 = vpop.eup %4019  ;;  %v7826_v36 = vadd.f32 1.0, %v4018_v55  ;;  %v2801_v28 = vadd.f32 %v2722_v22, %v7699_v4  ;;  %v2825_v24 = vadd.f32 %v7602_v38, %v2791_v12  ;;  %3499 = vrot.lane.b32.xlu0 %v3052_v44, %s4219_s29  ;;  %vm3090_vm1 = vweird.f32 %v7811_v15 }
 0x2fa   :  { %4029 = vpow2.f32 %v3712_v9  ;;  %v3017_v63 = vsel %vm3016_vm15, %v4010_v0, %v3013_v62  ;;  %v3086_v50 = vsub.f32 1.0, %v3085_v46  ;;  %v3095_v42 = vand.u32 2147483648, %v7777_v54  ;;  %vm3091_vm2 = vmor %vm3089_vm0, %vm3090_vm1 }
 0x2fb   :  { %v4022_v10 = vpop.eup %4021  ;;  %4031 = vrcp.f32 %v7826_v36  ;;  %v2835_v4 = vadd.f32 %v7602_v38, %v2801_v28  ;;  %v2718_v25 = vpop.permute.xlu2 %2717  ;;  %v3707_v48 = vmul.f32 -1.442695, %v2825_v24  ;;  %v3022_v20 = vsel %vm7806_vm13, %v3021_v13, %v3017_v63 }
 0x2fc   :  { %v7842_v37 = vpop.eup %4023  ;;  %v7844_v39 = vadd.f32 1.0, %v4022_v10  ;;  %v2799_v0 = vadd.f32 %v2718_v25, %v7713_v32  ;;  %3495 = vrot.lane.b32.xlu1 %v3022_v20, %s4219_s29  ;;  %v3055_v8 = vmul.f32 %v7824_v33, %v7794_v6  ;;  %v3087_v26 = vmul.f32 %v7811_v15, %v3086_v50 }
 0x2fd   :  { %v4026_v19 = vpop.eup %4025  ;;  %v3717_v17 = vmul.f32 -1.442695, %v2835_v4  ;;  %4033 = vpow2.f32 %v3707_v48  ;;  %vm7860_vm3 = vcmp.eq.f32.partialorder %v3093_v52, 8.507059e+37  ;;  %v3096_v5 = vor.u32 1.1754944e-38, %v3095_v42 }
 0x2fe   :  { %v7852_v49 = vpop.eup %4027  ;;  %v7854_v27 = vadd.f32 1.0, %v4026_v19  ;;  %4035 = vrcp.f32 %v7844_v39  ;;  %v2833_v32 = vadd.f32 %v7602_v38, %v2799_v0  ;;  %v2708_v30 = vpop.permute.xlu0 %2707  ;;  %v3088_v13 = vadd.f32 %v7811_v15, %v3087_v26 }
 0x2ff   :  { %4037 = vpow2.f32 %v3717_v17  ;;  %v2794_v57 = vadd.f32 %v2708_v30, %v7646_v59  ;;  %v3056_v55 = vsub.f32 1.0, %v3055_v8  ;;  %vm3059_vm4 = vweird.f32 %v7794_v6 }
 0x300   :  { %v4030_v31 = vpop.eup %4029  ;;  %4039 = vrcp.f32 %v7854_v27  ;;  %v3715_v12 = vmul.f32 -1.442695, %v2833_v32  ;;  %v2728_v14 = vpop.permute.xlu1 %2727  ;;  %v3092_v62 = vsel %vm3091_vm2, %v7811_v15, %v3088_v13  ;;  %vm3060_vm5 = vweird.f32 %v7824_v33 }
 0x301   :  { %v7866_v9 = vpop.eup %4031  ;;  %v7868_v22 = vadd.f32 1.0, %v4030_v31  ;;  %v2804_v44 = vadd.f32 %v2728_v14, %v7710_v3  ;;  %v2828_v59 = vadd.f32 %v7602_v38, %v2794_v57  ;;  %v3057_v28 = vmul.f32 %v7824_v33, %v3056_v55  ;;  %vm7896_vm6 = vmor %vm3059_vm4, %vm3060_vm5 }
 0x302   :  { %4041 = vpow2.f32 %v3715_v12  ;;  %v3097_v54 = vsel %vm7860_vm3, %v3096_v5, %v3092_v62  ;;  %v3063_v48 = vand.u32 2147483647, %v7794_v6  ;;  %v3065_v52 = vand.u32 2147483648, %v7794_v6 }
 0x303   :  { %v4034_v24 = vpop.eup %4033  ;;  %4043 = vrcp.f32 %v7868_v22  ;;  %v2838_v3 = vadd.f32 %v7602_v38, %v2804_v44  ;;  %v2724_v46 = vpop.permute.xlu2 %2723  ;;  %v3710_v63 = vmul.f32 -1.442695, %v2828_v59  ;;  %3505 = vrot.lane.b32.xlu0 %v3097_v54, %s4219_s29  ;;  %v3058_v25 = vadd.f32 %v7824_v33, %v3057_v28 }
 0x304   :  { %v7884_v10 = vpop.eup %4035  ;;  %v7886_v4 = vadd.f32 1.0, %v4034_v24  ;;  %v2802_v15 = vadd.f32 %v2724_v46, %v7728_v45  ;;  %v3130_v45 = vmul.f32 %v7852_v49, %v7813_v7  ;;  %vm3064_vm7 = vcmp.eq.f32.partialorder %v3063_v48, 8.507059e+37 }
 0x305   :  { %v4038_v20 = vpop.eup %4037  ;;  %v3720_v0 = vmul.f32 -1.442695, %v2838_v3  ;;  %4045 = vpow2.f32 %v3710_v63  ;;  %v3062_v8 = vsel %vm7896_vm6, %v7824_v33, %v3058_v25  ;;  %v3066_v30 = vor.u32 1.1754944e-38, %v3065_v52 }
 0x306   :  { %v7903_v19 = vpop.eup %4039  ;;  %v7905_v17 = vadd.f32 1.0, %v4038_v20  ;;  %4047 = vrcp.f32 %v7886_v4  ;;  %v2836_v42 = vadd.f32 %v7602_v38, %v2802_v15  ;;  %v2714_v32 = vpop.permute.xlu0 %2713  ;;  %v3131_v5 = vsub.f32 1.0, %v3130_v45 }
 0x307   :  { %4049 = vpow2.f32 %v3720_v0  ;;  %v2797_v6 = vadd.f32 %v2714_v32, %v7659_v61  ;;  %vm3134_vm8 = vweird.f32 %v7813_v7  ;;  %v3067_v14 = vsel %vm3064_vm7, %v3066_v30, %v3062_v8 }
 0x308   :  { %v4042_v26 = vpop.eup %4041  ;;  %4051 = vrcp.f32 %v7905_v17  ;;  %v3718_v57 = vmul.f32 -1.442695, %v2836_v42  ;;  %v2734_v16 = vpop.permute.xlu1 %2733  ;;  %3501 = vrot.lane.b32.xlu1 %v3067_v14, %s4219_s29  ;;  %v3132_v61 = vmul.f32 %v7852_v49, %v3131_v5  ;;  %vm3135_vm9 = vweird.f32 %v7852_v49 }
 0x309   :  { %v7915_v31 = vpop.eup %4043  ;;  %v7917_v12 = vadd.f32 1.0, %v4042_v26  ;;  %v2807_v33 = vadd.f32 %v2734_v16, %v7719_v29  ;;  %v2831_v13 = vadd.f32 %v7602_v38, %v2797_v6  ;;  %v3138_v55 = vand.u32 2147483647, %v7813_v7  ;;  %vm3136_vm11 = vmor %vm3134_vm8, %vm3135_vm9 }
 0x30a   :  { %4053 = vpow2.f32 %v3718_v57  ;;  %v3140_v29 = vand.u32 2147483648, %v7813_v7  ;;  %v3133_v63 = vadd.f32 %v7852_v49, %v3132_v61  ;;  %v3100_v48 = vmul.f32 %v7866_v9, %v7826_v36 }
 0x30b   :  { %v4046_v44 = vpop.eup %4045  ;;  %4055 = vrcp.f32 %v7917_v12  ;;  %v2841_v59 = vadd.f32 %v7602_v38, %v2807_v33  ;;  %v2730_v62 = vpop.permute.xlu2 %2729  ;;  %v3713_v28 = vmul.f32 -1.442695, %v2831_v13  ;;  %vm3139_vm10 = vcmp.eq.f32.partialorder %v3138_v55, 8.507059e+37 }
 0x30c   :  { %v7928_v24 = vpop.eup %4047  ;;  %v7930_v3 = vadd.f32 1.0, %v4046_v44  ;;  %v2805_v46 = vadd.f32 %v2730_v62, %v7741_v58  ;;  %v3141_v25 = vor.u32 1.1754944e-38, %v3140_v29  ;;  %v3137_v50 = vsel %vm3136_vm11, %v7852_v49, %v3133_v63 }
 0x30d   :  { %v4050_v54 = vpop.eup %4049  ;;  %v3723_v15 = vmul.f32 -1.442695, %v2841_v59  ;;  %4057 = vpow2.f32 %v3713_v28  ;;  %v7949_v52 = vadd.f32 %v7611_v35, %v7732_v34  ;;  %v3101_v45 = vsub.f32 1.0, %v3100_v48 }
 0x30e   :  { %v7940_v20 = vpop.eup %4051  ;;  %v7942_v0 = vadd.f32 1.0, %v4050_v54  ;;  %4059 = vrcp.f32 %v7930_v3  ;;  %v2839_v58 = vadd.f32 %v7602_v38, %v2805_v46  ;;  %v3142_v7 = vsel %vm3139_vm10, %v3141_v25, %v3137_v50  ;;  %v2720_v57 = vpop.permute.xlu0 %2719 }
 0x30f   :  { %4061 = vpow2.f32 %v3723_v15  ;;  %v7953_v8 = vadd.f32 %v7628_v56, %v7750_v43  ;;  %3511 = vrot.lane.b32.xlu0 %v3142_v7, %s4219_s29  ;;  %v3108_v30 = vand.u32 2147483647, %v7826_v36  ;;  %v3102_v35 = vmul.f32 %v7866_v9, %v3101_v45 }
 0x310   :  { %v4054_v42 = vpop.eup %4053  ;;  %4063 = vrcp.f32 %v7942_v0  ;;  %v3721_v32 = vmul.f32 -1.442695, %v2839_v58  ;;  %vm3105_vm12 = vweird.f32 %v7866_v9  ;;  %v3110_v34 = vand.u32 2147483648, %v7826_v36  ;;  %v2740_v56 = vpop.permute.xlu1 %2739 }
 0x311   :  { %v7958_v49 = vpop.eup %4055  ;;  %v2980_v6 = vmul.f32 %v7842_v37, %v7803_v2  ;;  %v7965_v43 = vadd.f32 1.0, %v4054_v42  ;;  %vm3104_vm13 = vweird.f32 %v7826_v36  ;;  %vm7968_vm14 = vcmp.eq.f32.partialorder %v3108_v30, 8.507059e+37 }
 0x312   :  { %4065 = vpow2.f32 %v3721_v32  ;;  %v3103_v5 = vadd.f32 %v7866_v9, %v3102_v35  ;;  %v3111_v14 = vor.u32 1.1754944e-38, %v3110_v34  ;;  %vm2985_vm15 = vweird.f32 %v7842_v37  ;;  %vm3106_vm0 = vmor %vm3104_vm13, %vm3105_vm12 }
 0x313   :  { %v4058_v16 = vpop.eup %4057  ;;  %v2981_v33 = vsub.f32 1.0, %v2980_v6  ;;  %v2736_v13 = vpop.permute.xlu2 %2735  ;;  %v2988_v36 = vand.u32 2147483647, %v7803_v2  ;;  %v2990_v44 = vand.u32 2147483648, %v7803_v2  ;;  %v2810_v59 = vadd.f32 %v2740_v56, %v7735_v21 }
 0x314   :  { %v7974_v61 = vpop.eup %4059  ;;  %v7976_v55 = vadd.f32 1.0, %v4058_v16  ;;  %v3107_v28 = vsel %vm3106_vm0, %v7866_v9, %v3103_v5  ;;  %v2808_v46 = vadd.f32 %v2736_v13, %v7754_v47  ;;  %v2800_v63 = vadd.f32 %v2720_v57, %v7672_v53 }
 0x315   :  { %v4062_v62 = vpop.eup %4061  ;;  %v2982_v29 = vmul.f32 %v7842_v37, %v2981_v33  ;;  %4067 = vrcp.f32 %v7965_v43  ;;  %v3112_v25 = vsel %vm7968_vm14, %v3111_v14, %v3107_v28  ;;  %vm2984_vm1 = vweird.f32 %v7803_v2 }
 0x316   :  { %v7987_v54 = vpop.eup %4063  ;;  %v7990_v15 = vadd.f32 1.0, %v4062_v62  ;;  %4069 = vrcp.f32 %v7976_v55  ;;  %3507 = vrot.lane.b32.xlu1 %v3112_v25, %s4219_s29  ;;  %v2844_v47 = vadd.f32 %v7602_v38, %v2810_v59  ;;  %v2842_v53 = vadd.f32 %v7602_v38, %v2808_v46  ;;  %vm2986_vm3 = vmor %vm2984_vm1, %vm2985_vm15  ;;  %v2726_v13 = vpop.permute.xlu0 %2725 }
 0x317   :  { %v2983_v21 = vadd.f32 %v7842_v37, %v2982_v29  ;;  %vm2989_vm2 = vcmp.eq.f32.partialorder %v2988_v36, 8.507059e+37  ;;  %v2991_v48 = vor.u32 1.1754944e-38, %v2990_v44  ;;  %v2834_v58 = vadd.f32 %v7602_v38, %v2800_v63 }
 0x318   :  { %v4066_v9 = vpop.eup %4065  ;;  %v3175_v2 = vmul.f32 %v7903_v19, %v7854_v27  ;;  %v3726_v45 = vmul.f32 -1.442695, %v2844_v47  ;;  %v3724_v42 = vmul.f32 -1.442695, %v2842_v53  ;;  %4071 = vrcp.f32 %v7990_v15  ;;  %v2746_v59 = vpop.permute.xlu1 %2745 }
 0x319   :  { %v8005_v50 = vadd.f32 1.0, %v4066_v9  ;;  %v2987_v7 = vsel %vm2986_vm3, %v7842_v37, %v2983_v21  ;;  %v3716_v30 = vmul.f32 -1.442695, %v2834_v58  ;;  %v3183_v34 = vand.u32 2147483647, %v7854_v27 }
 0x31a   :  { %v2992_v32 = vsel %vm2989_vm2, %v2991_v48, %v2987_v7  ;;  %v3176_v35 = vsub.f32 1.0, %v3175_v2  ;;  %v3185_v6 = vand.u32 2147483648, %v7854_v27  ;;  %v3145_v56 = vmul.f32 %v7915_v31, %v7868_v22 }
 0x31b   :  { %4073 = vrcp.f32 %v8005_v50  ;;  %3491 = vrot.lane.b32.xlu2 %v2992_v32, %s4219_s29  ;;  %v8015_v26 = vpop.eup %4067  ;;  %vm3179_vm4 = vweird.f32 %v7854_v27  ;;  %vm3180_vm5 = vweird.f32 %v7903_v19  ;;  %vm3149_vm6 = vweird.f32 %v7868_v22  ;;  %v2742_v62 = vpop.permute.xlu2 %2741 }
 0x31c   :  { %4075 = vpow2.f32 %v3726_v45  ;;  %v3177_v37 = vmul.f32 %v7903_v19, %v3176_v35  ;;  %v8020_v57 = vpop.eup %4069  ;;  %v3146_v16 = vsub.f32 1.0, %v3145_v56  ;;  %vm3150_vm7 = vweird.f32 %v7915_v31  ;;  %vm3181_vm8 = vmor %vm3179_vm4, %vm3180_vm5 }
 0x31d   :  { %4077 = vpow2.f32 %v3724_v42  ;;  %v3153_v14 = vand.u32 2147483647, %v7868_v22  ;;  %v3155_v33 = vand.u32 2147483648, %v7868_v22  ;;  %vm3184_vm9 = vcmp.eq.f32.partialorder %v3183_v34, 8.507059e+37  ;;  %vm3151_vm13 = vmor %vm3149_vm6, %vm3150_vm7 }
 0x31e   :  { %4079 = vpow2.f32 %v3716_v30  ;;  %v3178_v5 = vadd.f32 %v7903_v19, %v3177_v37  ;;  %v3186_v27 = vor.u32 1.1754944e-38, %v3185_v6  ;;  %v3147_v36 = vmul.f32 %v7915_v31, %v3146_v16  ;;  %v8030_v28 = vpop.eup %4071 }
 0x31f   :  { %v3025_v44 = vmul.f32 %v7884_v10, %v7844_v39  ;;  %vm8033_vm10 = vcmp.eq.f32.partialorder %v3153_v14, 8.507059e+37  ;;  %vm3029_vm11 = vweird.f32 %v7844_v39  ;;  %vm3030_vm12 = vweird.f32 %v7884_v10 }
 0x320   :  { %v3182_v29 = vsel %vm3181_vm8, %v7903_v19, %v3178_v5  ;;  %v3148_v21 = vadd.f32 %v7915_v31, %v3147_v36  ;;  %v3035_v53 = vand.u32 2147483648, %v7844_v39  ;;  %v3156_v19 = vor.u32 1.1754944e-38, %v3155_v33  ;;  %vm3031_vm14 = vmor %vm3029_vm11, %vm3030_vm12 }
 0x321   :  { %v8039_v63 = vpop.eup %4073  ;;  %v3187_v25 = vsel %vm3184_vm9, %v3186_v27, %v3182_v29  ;;  %v3026_v47 = vsub.f32 1.0, %v3025_v44  ;;  %v2813_v48 = vadd.f32 %v2746_v59, %v7744_v23  ;;  %v2811_v58 = vadd.f32 %v2742_v62, %v7953_v8 }
 0x322   :  { %v4076_v9 = vpop.eup %4075  ;;  %3517 = vrot.lane.b32.xlu0 %v3187_v25, %s4219_s29  ;;  %v2803_v2 = vadd.f32 %v2726_v13, %v7688_v60  ;;  %v3152_v42 = vsel %vm3151_vm13, %v7915_v31, %v3148_v21  ;;  %v3033_v30 = vand.u32 2147483647, %v7844_v39  ;;  %v3036_v31 = vor.u32 1.1754944e-38, %v3035_v53 }
 0x323   :  { %v4078_v7 = vpop.eup %4077  ;;  %v8051_v45 = vadd.f32 1.0, %v4076_v9  ;;  %v3027_v32 = vmul.f32 %v7884_v10, %v3026_v47  ;;  %v3157_v22 = vsel %vm8033_vm10, %v3156_v19, %v3152_v42  ;;  %v2847_v23 = vadd.f32 %v7602_v38, %v2813_v48  ;;  %v2752_v19 = vpop.permute.xlu1 %2751 }
 0x324   :  { %v4080_v35 = vpop.eup %4079  ;;  %v8056_v34 = vadd.f32 1.0, %v4078_v7  ;;  %v2845_v8 = vadd.f32 %v7602_v38, %v2811_v58  ;;  %3513 = vrot.lane.b32.xlu1 %v3157_v22, %s4219_s29  ;;  %v2837_v6 = vadd.f32 %v7602_v38, %v2803_v2  ;;  %v3220_v5 = vmul.f32 %v7940_v20, %v7905_v17  ;;  %v2748_v42 = vpop.permute.xlu2 %2747 }
 0x325   :  { %4081 = vrcp.f32 %v8051_v45  ;;  %v3028_v60 = vadd.f32 %v7884_v10, %v3027_v32  ;;  %v8066_v56 = vadd.f32 1.0, %v4080_v35  ;;  %v3729_v37 = vmul.f32 -1.442695, %v2847_v23 }
 0x326   :  { %v3727_v16 = vmul.f32 -1.442695, %v2845_v8  ;;  %4083 = vrcp.f32 %v8056_v34  ;;  %vm3034_vm15 = vcmp.eq.f32.partialorder %v3033_v30, 8.507059e+37  ;;  %v3719_v33 = vmul.f32 -1.442695, %v2837_v6  ;;  %v2732_v6 = vpop.permute.xlu0 %2731 }
 0x327   :  { %v3032_v14 = vsel %vm3031_vm14, %v7884_v10, %v3028_v60  ;;  %v2620_v13 = vadd.f32 %v7685_v51, %v7766_v40  ;;  %4085 = vpow2.f32 %v3729_v37  ;;  %v3221_v36 = vsub.f32 1.0, %v3220_v5 }
 0x328   :  { %v3037_v27 = vsel %vm3034_vm15, %v3036_v31, %v3032_v14  ;;  %4087 = vpow2.f32 %v3727_v16  ;;  %v3228_v39 = vand.u32 2147483647, %v7905_v17  ;;  %v3230_v44 = vand.u32 2147483648, %v7905_v17 }
 0x329   :  { %3497 = vrot.lane.b32.xlu2 %v3037_v27, %s4219_s29  ;;  %v3190_v59 = vmul.f32 %v7958_v49, %v7917_v12  ;;  %4089 = vrcp.f32 %v8066_v56  ;;  %v3222_v10 = vmul.f32 %v7940_v20, %v3221_v36  ;;  %vm3224_vm0 = vweird.f32 %v7905_v17 }
 0x32a   :  { %vm3225_vm1 = vweird.f32 %v7940_v20  ;;  %4091 = vpow2.f32 %v3719_v33  ;;  %vm3194_vm3 = vweird.f32 %v7917_v12  ;;  %vm3195_vm2 = vweird.f32 %v7958_v49 }
 0x32b   :  { %v8087_v51 = vpop.eup %4081  ;;  %v3191_v40 = vsub.f32 1.0, %v3190_v59  ;;  %v3223_v62 = vadd.f32 %v7940_v20, %v3222_v10  ;;  %vm8092_vm4 = vcmp.eq.f32.partialorder %v3228_v39, 8.507059e+37  ;;  %v3200_v46 = vand.u32 2147483648, %v7917_v12  ;;  %vm3226_vm5 = vmor %vm3224_vm0, %vm3225_vm1 }
 0x32c   :  { %v3070_v17 = vmul.f32 %v7928_v24, %v7886_v4  ;;  %v8099_v25 = vpop.eup %4083  ;;  %v3231_v21 = vor.u32 1.1754944e-38, %v3230_v44  ;;  %v3198_v53 = vand.u32 2147483647, %v7917_v12  ;;  %v3078_v9 = vand.u32 2147483647, %v7886_v4  ;;  %vm3196_vm8 = vmor %vm3194_vm3, %vm3195_vm2 }
 0x32d   :  { %v3192_v47 = vmul.f32 %v7958_v49, %v3191_v40  ;;  %v4086_v48 = vpop.eup %4085  ;;  %v3227_v58 = vsel %vm3226_vm5, %v7940_v20, %v3223_v62  ;;  %vm3074_vm6 = vweird.f32 %v7886_v4  ;;  %v3080_v7 = vand.u32 2147483648, %v7886_v4 }
 0x32e   :  { %v3071_v2 = vsub.f32 1.0, %v3070_v17  ;;  %v4088_v32 = vpop.eup %4087  ;;  %v8107_v30 = vadd.f32 1.0, %v4086_v48  ;;  %v3232_v35 = vsel %vm8092_vm4, %v3231_v21, %v3227_v58  ;;  %vm3075_vm7 = vweird.f32 %v7928_v24 }
 0x32f   :  { %v3193_v22 = vadd.f32 %v7958_v49, %v3192_v47  ;;  %v8113_v23 = vpop.eup %4089  ;;  %v8115_v8 = vadd.f32 1.0, %v4088_v32  ;;  %3523 = vrot.lane.b32.xlu0 %v3232_v35, %s4219_s29  ;;  %v3201_v20 = vor.u32 1.1754944e-38, %v3200_v46  ;;  %v2816_v31 = vadd.f32 %v2752_v19, %v7949_v52  ;;  %vm3076_vm11 = vmor %vm3074_vm6, %vm3075_vm7 }
 0x330   :  { %v3072_v60 = vmul.f32 %v7928_v24, %v3071_v2  ;;  %v4092_v37 = vpop.eup %4091  ;;  %vm3199_vm9 = vcmp.eq.f32.partialorder %v3198_v53, 8.507059e+37  ;;  %vm8125_vm10 = vcmp.eq.f32.partialorder %v3078_v9, 8.507059e+37  ;;  %v2814_v14 = vadd.f32 %v2748_v42, %v2620_v13 }
 0x331   :  { %v3197_v16 = vsel %vm3196_vm8, %v7958_v49, %v3193_v22  ;;  %v3081_v12 = vor.u32 1.1754944e-38, %v3080_v7  ;;  %v2850_v36 = vadd.f32 %v7602_v38, %v2816_v31  ;;  %4093 = vrcp.f32 %v8107_v30  ;;  %v2738_v7 = vpop.permute.xlu0 %2737 }
 0x332   :  { %v3202_v33 = vsel %vm3199_vm9, %v3201_v20, %v3197_v16  ;;  %v3073_v27 = vadd.f32 %v7928_v24, %v3072_v60  ;;  %v2848_v52 = vadd.f32 %v7602_v38, %v2814_v14  ;;  %v2806_v49 = vadd.f32 %v2732_v6, %v7707_v11 }
 0x333   :  { %3519 = vrot.lane.b32.xlu1 %v3202_v33, %s4219_s29  ;;  %v3265_v13 = vmul.f32 %v7987_v54, %v7942_v0  ;;  %4095 = vrcp.f32 %v8115_v8  ;;  %v8142_v39 = vadd.f32 1.0, %v4092_v37  ;;  %v3732_v59 = vmul.f32 -1.442695, %v2850_v36 }
 0x334   :  { %v3077_v44 = vsel %vm3076_vm11, %v7928_v24, %v3073_v27  ;;  %v3730_v40 = vmul.f32 -1.442695, %v2848_v52  ;;  %v2840_v4 = vadd.f32 %v7602_v38, %v2806_v49  ;;  %vm3270_vm12 = vweird.f32 %v7987_v54 }
 0x335   :  { %v3082_v10 = vsel %vm8125_vm10, %v3081_v12, %v3077_v44  ;;  %v3266_v62 = vsub.f32 1.0, %v3265_v13  ;;  %4097 = vpow2.f32 %v3732_v59  ;;  %v3275_v11 = vand.u32 2147483648, %v7942_v0 }
 0x336   :  { %3503 = vrot.lane.b32.xlu2 %v3082_v10, %s4219_s29  ;;  %v3235_v29 = vmul.f32 %v8015_v26, %v7965_v43  ;;  %4099 = vpow2.f32 %v3730_v40  ;;  %v3722_v24 = vmul.f32 -1.442695, %v2840_v4  ;;  %v3273_v17 = vand.u32 2147483647, %v7942_v0 }
 0x337   :  { %v3267_v46 = vmul.f32 %v7987_v54, %v3266_v62  ;;  %4101 = vrcp.f32 %v8142_v39  ;;  %vm3269_vm13 = vweird.f32 %v7942_v0  ;;  %vm3239_vm14 = vweird.f32 %v7965_v43  ;;  %v8158_v47 = vpop.eup %4093 }
 0x338   :  { %v3236_v21 = vsub.f32 1.0, %v3235_v29  ;;  %4103 = vpow2.f32 %v3722_v24  ;;  %v3276_v9 = vor.u32 1.1754944e-38, %v3275_v11  ;;  %v3245_v19 = vand.u32 2147483648, %v7965_v43  ;;  %vm3271_vm15 = vmor %vm3269_vm13, %vm3270_vm12 }
 0x339   :  { %v3268_v53 = vadd.f32 %v7987_v54, %v3267_v46  ;;  %v8162_v48 = vpop.eup %4095  ;;  %vm3240_vm0 = vweird.f32 %v8015_v26  ;;  %v3243_v0 = vand.u32 2147483647, %v7965_v43  ;;  %v3115_v2 = vmul.f32 %v7974_v61, %v7930_v3 }
 0x33a   :  { %v3237_v58 = vmul.f32 %v8015_v26, %v3236_v21  ;;  %vm3274_vm1 = vcmp.eq.f32.partialorder %v3273_v17, 8.507059e+37  ;;  %vm3119_vm3 = vweird.f32 %v7930_v3  ;;  %v3123_v32 = vand.u32 2147483647, %v7930_v3  ;;  %vm3241_vm2 = vmor %vm3239_vm14, %vm3240_vm0 }
 0x33b   :  { %v3272_v42 = vsel %vm3271_vm15, %v7987_v54, %v3268_v53  ;;  %v4098_v35 = vpop.eup %4097  ;;  %v3116_v60 = vsub.f32 1.0, %v3115_v2  ;;  %v3125_v31 = vand.u32 2147483648, %v7930_v3  ;;  %v3246_v54 = vor.u32 1.1754944e-38, %v3245_v19 }
 0x33c   :  { %v3277_v22 = vsel %vm3274_vm1, %v3276_v9, %v3272_v42  ;;  %v3238_v20 = vadd.f32 %v8015_v26, %v3237_v58  ;;  %v4100_v6 = vpop.eup %4099  ;;  %v8176_v37 = vadd.f32 1.0, %v4098_v35  ;;  %v2809_v16 = vadd.f32 %v2738_v7, %v7716_v1  ;;  %v2744_v9 = vpop.permute.xlu0 %2743 }
 0x33d   :  { %3529 = vrot.lane.b32.xlu0 %v3277_v22, %s4219_s29  ;;  %v3310_v5 = vmul.f32 %v8030_v28, %v7990_v15  ;;  %v8186_v14 = vpop.eup %4101  ;;  %vm3244_vm4 = vcmp.eq.f32.partialorder %v3243_v0, 8.507059e+37  ;;  %v3117_v27 = vmul.f32 %v7974_v61, %v3116_v60  ;;  %vm3120_vm5 = vweird.f32 %v7974_v61 }
 0x33e   :  { %v3242_v33 = vsel %vm3241_vm2, %v8015_v26, %v3238_v20  ;;  %v4104_v12 = vpop.eup %4103  ;;  %vm8191_vm6 = vcmp.eq.f32.partialorder %v3123_v32, 8.507059e+37  ;;  %v2843_v1 = vadd.f32 %v7602_v38, %v2809_v16  ;;  %4105 = vrcp.f32 %v8176_v37  ;;  %vm3121_vm7 = vmor %vm3119_vm3, %vm3120_vm5 }
 0x33f   :  { %v3247_v36 = vsel %vm3244_vm4, %v3246_v54, %v3242_v33  ;;  %v3311_v52 = vsub.f32 1.0, %v3310_v5  ;;  %v8197_v49 = vadd.f32 1.0, %v4100_v6  ;;  %v3118_v26 = vadd.f32 %v7974_v61, %v3117_v27 }
 0x340   :  { %3525 = vrot.lane.b32.xlu1 %v3247_v36, %s4219_s29  ;;  %v3126_v13 = vor.u32 1.1754944e-38, %v3125_v31  ;;  %v3725_v44 = vmul.f32 -1.442695, %v2843_v1  ;;  %vm3315_vm8 = vweird.f32 %v8030_v28  ;;  %v3318_v10 = vand.u32 2147483647, %v7990_v15 }
 0x341   :  { %v3312_v59 = vmul.f32 %v8030_v28, %v3311_v52  ;;  %v8206_v40 = vadd.f32 1.0, %v4104_v12  ;;  %v3122_v4 = vsel %vm3121_vm7, %v7974_v61, %v3118_v26  ;;  %v3320_v62 = vand.u32 2147483648, %v7990_v15 }
 0x342   :  { %v3280_v11 = vmul.f32 %v8039_v63, %v8005_v50  ;;  %v3127_v3 = vsel %vm8191_vm6, %v3126_v13, %v3122_v4  ;;  %4107 = vpow2.f32 %v3725_v44  ;;  %vm3314_vm9 = vweird.f32 %v7990_v15 }
 0x343   :  { %v3313_v29 = vadd.f32 %v8030_v28, %v3312_v59  ;;  %4109 = vrcp.f32 %v8197_v49  ;;  %3509 = vrot.lane.b32.xlu2 %v3127_v3, %s4219_s29  ;;  %vm3316_vm10 = vmor %vm3314_vm9, %vm3315_vm8  ;;  %vm3319_vm11 = vcmp.eq.f32.partialorder %v3318_v10, 8.507059e+37  ;;  %v3321_v61 = vor.u32 1.1754944e-38, %v3320_v62 }
 0x344   :  { %v3281_v24 = vsub.f32 1.0, %v3280_v11  ;;  %v3288_v17 = vand.u32 2147483647, %v8005_v50  ;;  %v3290_v21 = vand.u32 2147483648, %v8005_v50  ;;  %v3160_v53 = vmul.f32 %v8020_v57, %v7976_v55  ;;  %v8223_v19 = vpop.eup %4105 }
 0x345   :  { %v3317_v46 = vsel %vm3316_vm10, %v8030_v28, %v3313_v29  ;;  %4111 = vrcp.f32 %v8206_v40  ;;  %vm3285_vm12 = vweird.f32 %v8039_v63  ;;  %vm3284_vm13 = vweird.f32 %v8005_v50 }
 0x346   :  { %v3322_v15 = vsel %vm3319_vm11, %v3321_v61, %v3317_v46  ;;  %v3282_v58 = vmul.f32 %v8039_v63, %v3281_v24  ;;  %v3161_v28 = vsub.f32 1.0, %v3160_v53  ;;  %vm3164_vm14 = vweird.f32 %v7976_v55  ;;  %vm3286_vm15 = vmor %vm3284_vm13, %vm3285_vm12 }
 0x347   :  { %3535 = vrot.lane.b32.xlu0 %v3322_v15, %s4219_s29  ;;  %v3168_v0 = vand.u32 2147483647, %v7976_v55  ;;  %v3170_v7 = vand.u32 2147483648, %v7976_v55  ;;  %v2812_v42 = vadd.f32 %v2744_v9, %v7725_v18  ;;  %v3355_v32 = vmul.f32 %v8087_v51, %v8051_v45 }
 0x348   :  { %v3283_v2 = vadd.f32 %v8039_v63, %v3282_v58  ;;  %v4108_v35 = vpop.eup %4107  ;;  %vm3289_vm0 = vcmp.eq.f32.partialorder %v3288_v17, 8.507059e+37  ;;  %v3291_v22 = vor.u32 1.1754944e-38, %v3290_v21  ;;  %v3162_v50 = vmul.f32 %v8020_v57, %v3161_v28 }
 0x349   :  { %vm3165_vm1 = vweird.f32 %v8020_v57  ;;  %v8239_v20 = vpop.eup %4109  ;;  %v8241_v60 = vadd.f32 1.0, %v4108_v35  ;;  %vm8244_vm3 = vcmp.eq.f32.partialorder %v3168_v0, 8.507059e+37  ;;  %v2846_v18 = vadd.f32 %v7602_v38, %v2812_v42 }
 0x34a   :  { %v3287_v31 = vsel %vm3286_vm15, %v8039_v63, %v3283_v2  ;;  %v3163_v16 = vadd.f32 %v8020_v57, %v3162_v50  ;;  %v3356_v5 = vsub.f32 1.0, %v3355_v32  ;;  %v3363_v33 = vand.u32 2147483647, %v8051_v45  ;;  %vm3166_vm2 = vmor %vm3164_vm14, %vm3165_vm1 }
 0x34b   :  { %v3292_v54 = vsel %vm3289_vm0, %v3291_v22, %v3287_v31  ;;  %v8251_v27 = vpop.eup %4111  ;;  %v3171_v63 = vor.u32 1.1754944e-38, %v3170_v7  ;;  %v3728_v12 = vmul.f32 -1.442695, %v2846_v18  ;;  %v3365_v36 = vand.u32 2147483648, %v8051_v45 }
 0x34c   :  { %3531 = vrot.lane.b32.xlu1 %v3292_v54, %s4219_s29  ;;  %v3325_v43 = vmul.f32 %v8099_v25, %v8056_v34  ;;  %4113 = vrcp.f32 %v8241_v60  ;;  %v3167_v1 = vsel %vm3166_vm2, %v8020_v57, %v3163_v16  ;;  %v3357_v52 = vmul.f32 %v8087_v51, %v3356_v5 }
 0x34d   :  { %vm3360_vm4 = vweird.f32 %v8087_v51  ;;  %v3172_v26 = vsel %vm8244_vm3, %v3171_v63, %v3167_v1  ;;  %4115 = vpow2.f32 %v3728_v12  ;;  %vm3359_vm5 = vweird.f32 %v8051_v45  ;;  %v2750_v45 = vpop.permute.xlu0 %2749 }
 0x34e   :  { %v3326_v55 = vsub.f32 1.0, %v3325_v43  ;;  %3515 = vrot.lane.b32.xlu2 %v3172_v26, %s4219_s29  ;;  %v3358_v13 = vadd.f32 %v8087_v51, %v3357_v52  ;;  %vm3364_vm6 = vcmp.eq.f32.partialorder %v3363_v33, 8.507059e+37  ;;  %v3366_v44 = vor.u32 1.1754944e-38, %v3365_v36  ;;  %vm3361_vm7 = vmor %vm3359_vm5, %vm3360_vm4 }
 0x34f   :  { %v3335_v59 = vand.u32 2147483648, %v8056_v34  ;;  %vm3330_vm8 = vweird.f32 %v8099_v25  ;;  %v3333_v10 = vand.u32 2147483647, %v8056_v34  ;;  %v3205_v4 = vmul.f32 %v8113_v23, %v8066_v56 }
 0x350   :  { %v3327_v57 = vmul.f32 %v8099_v25, %v3326_v55  ;;  %v3362_v62 = vsel %vm3361_vm7, %v8087_v51, %v3358_v13  ;;  %vm3329_vm9 = vweird.f32 %v8056_v34  ;;  %vm3209_vm10 = vweird.f32 %v8066_v56 }
 0x351   :  { %v3213_v11 = vand.u32 2147483647, %v8066_v56  ;;  %v3367_v3 = vsel %vm3364_vm6, %v3366_v44, %v3362_v62  ;;  %v3206_v61 = vsub.f32 1.0, %v3205_v4  ;;  %v3215_v24 = vand.u32 2147483648, %v8066_v56  ;;  %vm3331_vm11 = vmor %vm3329_vm9, %vm3330_vm8 }
 0x352   :  { %v3328_v29 = vadd.f32 %v8099_v25, %v3327_v57  ;;  %v8280_v46 = vpop.eup %4113  ;;  %3541 = vrot.lane.b32.xlu0 %v3367_v3, %s4219_s29  ;;  %v3336_v17 = vor.u32 1.1754944e-38, %v3335_v59  ;;  %vm3210_vm12 = vweird.f32 %v8113_v23  ;;  %v2815_v34 = vadd.f32 %v2750_v45, %v7738_v41 }
 0x353   :  { %v3400_v51 = vmul.f32 %v8158_v47, %v8107_v30  ;;  %v4116_v21 = vpop.eup %4115  ;;  %vm3334_vm13 = vcmp.eq.f32.partialorder %v3333_v10, 8.507059e+37  ;;  %v3207_v9 = vmul.f32 %v8113_v23, %v3206_v61  ;;  %vm8289_vm14 = vcmp.eq.f32.partialorder %v3213_v11, 8.507059e+37  ;;  %vm3211_vm0 = vmor %vm3209_vm10, %vm3210_vm12 }
 0x354   :  { %v3332_v53 = vsel %vm3331_vm11, %v8099_v25, %v3328_v29  ;;  %v3216_v28 = vor.u32 1.1754944e-38, %v3215_v24  ;;  %v2849_v0 = vadd.f32 %v7602_v38, %v2815_v34  ;;  %vm3405_vm15 = vweird.f32 %v8158_v47 }
 0x355   :  { %v3337_v58 = vsel %vm3334_vm13, %v3336_v17, %v3332_v53  ;;  %v3401_v2 = vsub.f32 1.0, %v3400_v51  ;;  %v3208_v41 = vadd.f32 %v8113_v23, %v3207_v9  ;;  %v3410_v25 = vand.u32 2147483648, %v8107_v30 }
 0x356   :  { %3537 = vrot.lane.b32.xlu1 %v3337_v58, %s4219_s29  ;;  %v3370_v7 = vmul.f32 %v8162_v48, %v8115_v8  ;;  %v8300_v42 = vadd.f32 1.0, %v4116_v21  ;;  %v3731_v38 = vmul.f32 -1.442695, %v2849_v0  ;;  %v3408_v35 = vand.u32 2147483647, %v8107_v30 }
 0x357   :  { %v3402_v32 = vmul.f32 %v8158_v47, %v3401_v2  ;;  %v3212_v22 = vsel %vm3211_vm0, %v8113_v23, %v3208_v41  ;;  %vm3404_vm1 = vweird.f32 %v8107_v30  ;;  %v3411_v50 = vor.u32 1.1754944e-38, %v3410_v25 }
 0x358   :  { %v3371_v31 = vsub.f32 1.0, %v3370_v7  ;;  %v3217_v6 = vsel %vm8289_vm14, %v3216_v28, %v3212_v22  ;;  %4117 = vpow2.f32 %v3731_v38  ;;  %vm3375_vm3 = vweird.f32 %v8162_v48  ;;  %vm3406_vm2 = vmor %vm3404_vm1, %vm3405_vm15 }
 0x359   :  { %v3403_v18 = vadd.f32 %v8158_v47, %v3402_v32  ;;  %3521 = vrot.lane.b32.xlu2 %v3217_v6, %s4219_s29  ;;  %v3378_v23 = vand.u32 2147483647, %v8115_v8  ;;  %v3380_v30 = vand.u32 2147483648, %v8115_v8  ;;  %v3250_v54 = vmul.f32 %v8186_v14, %v8142_v39 }
 0x35a   :  { %v3372_v56 = vmul.f32 %v8162_v48, %v3371_v31  ;;  %4119 = vrcp.f32 %v8300_v42  ;;  %vm3409_vm4 = vcmp.eq.f32.partialorder %v3408_v35, 8.507059e+37  ;;  %vm3374_vm5 = vweird.f32 %v8115_v8 }
 0x35b   :  { %v3407_v16 = vsel %vm3406_vm2, %v8158_v47, %v3403_v18  ;;  %v3258_v63 = vand.u32 2147483647, %v8142_v39  ;;  %vm3376_vm6 = vmor %vm3374_vm5, %vm3375_vm3  ;;  %v3381_v12 = vor.u32 1.1754944e-38, %v3380_v30  ;;  %v3251_v36 = vsub.f32 1.0, %v3250_v54 }
 0x35c   :  { %v3412_v5 = vsel %vm3409_vm4, %v3411_v50, %v3407_v16  ;;  %v3373_v33 = vadd.f32 %v8162_v48, %v3372_v56  ;;  %vm3254_vm7 = vweird.f32 %v8142_v39  ;;  %v3445_v47 = vmul.f32 %v8223_v19, %v8176_v37 }
 0x35d   :  { %3547 = vrot.lane.b32.xlu0 %v3412_v5, %s4219_s29  ;;  %vm3379_vm8 = vcmp.eq.f32.partialorder %v3378_v23, 8.507059e+37  ;;  %v3260_v1 = vand.u32 2147483648, %v8142_v39  ;;  %v3453_v8 = vand.u32 2147483647, %v8176_v37  ;;  %v3252_v55 = vmul.f32 %v8186_v14, %v3251_v36 }
 0x35e   :  { %v3377_v43 = vsel %vm3376_vm6, %v8162_v48, %v3373_v33  ;;  %v4118_v52 = vpop.eup %4117  ;;  %vm3255_vm9 = vweird.f32 %v8186_v14  ;;  %v3446_v13 = vsub.f32 1.0, %v3445_v47  ;;  %vm8339_vm10 = vcmp.eq.f32.partialorder %v3258_v63, 8.507059e+37 }
 0x35f   :  { %v3382_v26 = vsel %vm3379_vm8, %v3381_v12, %v3377_v43  ;;  %vm3449_vm11 = vweird.f32 %v8176_v37  ;;  %v3455_v48 = vand.u32 2147483648, %v8176_v37  ;;  %v3415_v59 = vmul.f32 %v8239_v20, %v8197_v49  ;;  %vm3256_vm13 = vmor %vm3254_vm7, %vm3255_vm9 }
 0x360   :  { %3543 = vrot.lane.b32.xlu1 %v3382_v26, %s4219_s29  ;;  %v8347_v57 = vpop.eup %4119  ;;  %v8349_v10 = vadd.f32 1.0, %v4118_v52  ;;  %v3253_v4 = vadd.f32 %v8186_v14, %v3252_v55  ;;  %v3447_v45 = vmul.f32 %v8223_v19, %v3446_v13  ;;  %vm3450_vm12 = vweird.f32 %v8223_v19 }
 0x361   :  { %v3261_v62 = vor.u32 1.1754944e-38, %v3260_v1  ;;  %vm8356_vm14 = vcmp.eq.f32.partialorder %v3453_v8, 8.507059e+37  ;;  %v3416_v3 = vsub.f32 1.0, %v3415_v59  ;;  %vm3420_vm15 = vweird.f32 %v8239_v20  ;;  %vm3451_vm0 = vmor %vm3449_vm11, %vm3450_vm12 }
 0x362   :  { %v3257_v29 = vsel %vm3256_vm13, %v8186_v14, %v3253_v4  ;;  %v3448_v61 = vadd.f32 %v8223_v19, %v3447_v45  ;;  %v3425_v24 = vand.u32 2147483648, %v8197_v49  ;;  %v3295_v17 = vmul.f32 %v8251_v27, %v8206_v40 }
 0x363   :  { %v3262_v39 = vsel %vm8339_vm10, %v3261_v62, %v3257_v29  ;;  %v3456_v34 = vor.u32 1.1754944e-38, %v3455_v48  ;;  %v3417_v51 = vmul.f32 %v8239_v20, %v3416_v3  ;;  %v3423_v21 = vand.u32 2147483647, %v8197_v49  ;;  %v3494_v9 = vpop.permute.xlu0 %3493 }
 0x364   :  { %4121 = vrcp.f32 %v8349_v10  ;;  %3527 = vrot.lane.b32.xlu2 %v3262_v39, %s4219_s29  ;;  %v3452_v14 = vsel %vm3451_vm0, %v8223_v19, %v3448_v61  ;;  %vm3419_vm1 = vweird.f32 %v8197_v49  ;;  %v3296_v53 = vsub.f32 1.0, %v3295_v17 }
 0x365   :  { %v3457_v15 = vsel %vm8356_vm14, %v3456_v34, %v3452_v14  ;;  %v3418_v37 = vadd.f32 %v8239_v20, %v3417_v51  ;;  %v3426_v58 = vor.u32 1.1754944e-38, %v3425_v24  ;;  %v3305_v28 = vand.u32 2147483648, %v8206_v40  ;;  %vm3421_vm3 = vmor %vm3419_vm1, %vm3420_vm15 }
 0x366   :  { %3553 = vrot.lane.b32.xlu0 %v3457_v15, %s4219_s29  ;;  %v3297_v0 = vmul.f32 %v8251_v27, %v3296_v53  ;;  %vm3300_vm2 = vweird.f32 %v8251_v27  ;;  %v3303_v49 = vand.u32 2147483647, %v8206_v40  ;;  %v3340_v19 = vmul.f32 %v8280_v46, %v8241_v60 }
 0x367   :  { %v3422_v2 = vsel %vm3421_vm3, %v8239_v20, %v3418_v37  ;;  %vm3424_vm4 = vcmp.eq.f32.partialorder %v3423_v21, 8.507059e+37  ;;  %vm3299_vm5 = vweird.f32 %v8206_v40  ;;  %v3306_v38 = vor.u32 1.1754944e-38, %v3305_v28 }
 0x368   :  { %v3427_v41 = vsel %vm3424_vm4, %v3426_v58, %v3422_v2  ;;  %v3298_v25 = vadd.f32 %v8251_v27, %v3297_v0  ;;  %v3341_v7 = vsub.f32 1.0, %v3340_v19  ;;  %vm3301_vm6 = vmor %vm3299_vm5, %vm3300_vm2  ;;  %v3385_v32 = vmul.f32 %v8347_v57, %v8300_v42 }
 0x369   :  { %3549 = vrot.lane.b32.xlu1 %v3427_v41, %s4219_s29  ;;  %vm3304_vm7 = vcmp.eq.f32.partialorder %v3303_v49, 8.507059e+37  ;;  %vm3345_vm8 = vweird.f32 %v8280_v46  ;;  %v3350_v31 = vand.u32 2147483648, %v8241_v60  ;;  %vm3344_vm9 = vweird.f32 %v8241_v60 }
 0x36a   :  { %v4122_v35 = vpop.eup %4121  ;;  %v3302_v22 = vsel %vm3301_vm6, %v8251_v27, %v3298_v25  ;;  %v3342_v20 = vmul.f32 %v8280_v46, %v3341_v7  ;;  %v3386_v40 = vsub.f32 1.0, %v3385_v32  ;;  %v3348_v18 = vand.u32 2147483647, %v8241_v60  ;;  %vm3346_vm10 = vmor %vm3344_vm9, %vm3345_vm8 }
 0x36b   :  { %v3307_v50 = vsel %vm3304_vm7, %v3306_v38, %v3302_v22  ;;  %v3500_v56 = vpop.permute.xlu0 %3499  ;;  %v3430_v54 = vmul.f32 %v4122_v35, %v8349_v10  ;;  %vm3587_vm11 = vcmask 23568   ;;  %v3351_v16 = vor.u32 1.1754944e-38, %v3350_v31 }
 0x36c   :  { %3533 = vrot.lane.b32.xlu2 %v3307_v50, %s4219_s29  ;;  %v3343_v6 = vadd.f32 %v8280_v46, %v3342_v20  ;;  %v3387_v30 = vmul.f32 %v8347_v57, %v3386_v40  ;;  %3589 = vst.msk [vmem:[%s8547_s3 + $0x8] sm:$0xff] %vm3587_vm11, %v3494_v9  ;;  %vm3349_vm12 = vcmp.eq.f32.partialorder %v3348_v18, 8.507059e+37  ;;  %vm3390_vm13 = vweird.f32 %v8347_v57 }
 0x36d   :  { %3592 = vst.msk [vmem:[%s8547_s3 + $0x20] sm:$0xff] %vm3587_vm11, %v3500_v56  ;;  %v3431_v5 = vsub.f32 1.0, %v3430_v54  ;;  %v3395_v33 = vand.u32 2147483648, %v8300_v42  ;;  %vm3389_vm14 = vweird.f32 %v8300_v42  ;;  %v3393_v63 = vand.u32 2147483647, %v8300_v42 }
 0x36e   :  { %v3496_v27 = vpop.permute.xlu1 %3495  ;;  %v3347_v23 = vsel %vm3346_vm10, %v8280_v46, %v3343_v6  ;;  %v3388_v46 = vadd.f32 %v8347_v57, %v3387_v30  ;;  %vm3391_vm15 = vmor %vm3389_vm14, %vm3390_vm13  ;;  %vm3435_vm1 = vweird.f32 %v4122_v35  ;;  %v3440_v52 = vand.u32 2147483648, %v8349_v10 }
 0x36f   :  { %3590 = vst.msk [vmem:[%s8547_s3 + $0x10] sm:$0xff] %vm3587_vm11, %v3496_v27  ;;  %v3352_v60 = vsel %vm3349_vm12, %v3351_v16, %v3347_v23  ;;  %v3432_v43 = vmul.f32 %v4122_v35, %v3431_v5  ;;  %v3396_v1 = vor.u32 1.1754944e-38, %v3395_v33  ;;  %vm3394_vm0 = vcmp.eq.f32.partialorder %v3393_v63, 8.507059e+37 }
 0x370   :  { %v3392_v47 = vsel %vm3391_vm15, %v8347_v57, %v3388_v46  ;;  %vm3434_vm3 = vweird.f32 %v8349_v10  ;;  %v3438_v55 = vand.u32 2147483647, %v8349_v10  ;;  %v3441_v44 = vor.u32 1.1754944e-38, %v3440_v52 }
 0x371   :  { %v3397_v8 = vsel %vm3394_vm0, %v3396_v1, %v3392_v47  ;;  %v3433_v42 = vadd.f32 %v4122_v35, %v3432_v43  ;;  %vm3436_vm2 = vmor %vm3434_vm3, %vm3435_vm1  ;;  %vm3619_vm5 = vcmask 17424  }
 0x372   :  { %vm3439_vm4 = vcmp.eq.f32.partialorder %v3438_v55, 8.507059e+37 }
 0x373   :  { %v3437_v13 = vsel %vm3436_vm2, %v4122_v35, %v3433_v42 }
 0x374   :  { %3539 = vrot.lane.b32.xlu2 %v3352_v60, %s4219_s29  ;;  %v3442_v48 = vsel %vm3439_vm4, %v3441_v44, %v3437_v13 }
 0x375   :  { %v3492_v12 = vpop.permute.xlu2 %3491  ;;  %v3506_v36 = vpop.permute.xlu0 %3505 }
 0x376   :  { %3588 = vst.msk [vmem:[%s8547_s3] sm:$0xff] %vm3587_vm11, %v3492_v12 }
 0x377   :  { %3595 = vst.msk [vmem:[%s8547_s3 + $0x38] sm:$0xff] %vm3587_vm11, %v3506_v36 }
 0x37a   :  { %v3502_v26 = vpop.permute.xlu1 %3501 }
 0x37b   :  { %3593 = vst.msk [vmem:[%s8547_s3 + $0x28] sm:$0xff] %vm3587_vm11, %v3502_v26 }
 0x37c   :  { %3545 = vrot.lane.b32.xlu2 %v3397_v8, %s4219_s29 }
 0x381   :  { %v3512_v59 = vpop.permute.xlu0 %3511 }
 0x382   :  { %3598 = vst.msk [vmem:[%s8547_s3 + $0x50] sm:$0xff] %vm3587_vm11, %v3512_v59 }
 0x383   :  { %v3498_v57 = vpop.permute.xlu2 %3497 }
 0x384   :  { %3591 = vst.msk [vmem:[%s8547_s3 + $0x18] sm:$0xff] %vm3587_vm11, %v3498_v57  ;;  %3551 = vrot.lane.b32.xlu2 %v3442_v48, %s4219_s29 }
 0x388   :  { %v3508_v10 = vpop.permute.xlu1 %3507 }
 0x389   :  { %3596 = vst.msk [vmem:[%s8547_s3 + $0x40] sm:$0xff] %vm3587_vm11, %v3508_v10 }
 0x390   :  { %v3504_v4 = vpop.permute.xlu2 %3503 }
 0x391   :  { %3594 = vst.msk [vmem:[%s8547_s3 + $0x30] sm:$0xff] %vm3587_vm11, %v3504_v4 }
 0x394   :  { %v3518_v45 = vpop.permute.xlu0 %3517 }
 0x395   :  { %3601 = vst.msk [vmem:[%s8547_s3 + $0x68] sm:$0xff] %vm3587_vm11, %v3518_v45 }
 0x396   :  { %v3514_v62 = vpop.permute.xlu1 %3513 }
 0x397   :  { %3599 = vst.msk [vmem:[%s8547_s3 + $0x58] sm:$0xff] %vm3587_vm11, %v3514_v62 }
 0x39d   :  { %v3510_v11 = vpop.permute.xlu2 %3509 }
 0x39e   :  { %3597 = vst.msk [vmem:[%s8547_s3 + $0x48] sm:$0xff] %vm3587_vm11, %v3510_v11 }
 0x3a1   :  { %v3524_v3 = vpop.permute.xlu0 %3523 }
 0x3a2   :  { %3604 = vst.msk [vmem:[%s8547_s3 + $0x80] sm:$0xff] %vm3587_vm11, %v3524_v3 }
 0x3a5   :  { %v3520_v29 = vpop.permute.xlu1 %3519 }
 0x3a6   :  { %3602 = vst.msk [vmem:[%s8547_s3 + $0x70] sm:$0xff] %vm3587_vm11, %v3520_v29 }
 0x3a8   :  { %v3516_v61 = vpop.permute.xlu2 %3515 }
 0x3a9   :  { %3600 = vst.msk [vmem:[%s8547_s3 + $0x60] sm:$0xff] %vm3587_vm11, %v3516_v61 }
 0x3af   :  { %v3530_v24 = vpop.permute.xlu0 %3529 }
 0x3b0   :  { %3607 = vst.msk [vmem:[%s8547_s3 + $0x98] sm:$0xff] %vm3587_vm11, %v3530_v24 }
 0x3b2   :  { %v3526_v17 = vpop.permute.xlu1 %3525 }
 0x3b3   :  { %3605 = vst.msk [vmem:[%s8547_s3 + $0x88] sm:$0xff] %vm3587_vm11, %v3526_v17  ;;  %v3522_v39 = vpop.permute.xlu2 %3521 }
 0x3b4   :  { %3603 = vst.msk [vmem:[%s8547_s3 + $0x78] sm:$0xff] %vm3587_vm11, %v3522_v39 }
 0x3b9   :  { %v3536_v34 = vpop.permute.xlu0 %3535 }
 0x3ba   :  { %3610 = vst.msk [vmem:[%s8547_s3 + $0xb0] sm:$0xff] %vm3587_vm11, %v3536_v34 }
 0x3be   :  { %v3532_v51 = vpop.permute.xlu1 %3531  ;;  %v3528_v21 = vpop.permute.xlu2 %3527 }
 0x3bf   :  { %3608 = vst.msk [vmem:[%s8547_s3 + $0xa0] sm:$0xff] %vm3587_vm11, %v3532_v51 }
 0x3c0   :  { %3606 = vst.msk [vmem:[%s8547_s3 + $0x90] sm:$0xff] %vm3587_vm11, %v3528_v21 }
 0x3c4   :  { %v3542_v14 = vpop.permute.xlu0 %3541 }
 0x3c5   :  { %3613 = vst.msk [vmem:[%s8547_s3 + $0xc8] sm:$0xff] %vm3587_vm11, %v3542_v14 }
 0x3c6   :  { %v3534_v53 = vpop.permute.xlu2 %3533 }
 0x3c7   :  { %3609 = vst.msk [vmem:[%s8547_s3 + $0xa8] sm:$0xff] %vm3587_vm11, %v3534_v53 }
 0x3c8   :  { %v3538_v9 = vpop.permute.xlu1 %3537 }
 0x3c9   :  { %3611 = vst.msk [vmem:[%s8547_s3 + $0xb8] sm:$0xff] %vm3587_vm11, %v3538_v9 }
 0x3ce   :  { %v3540_v15 = vpop.permute.xlu2 %3539 }
 0x3cf   :  { %v3548_v37 = vpop.permute.xlu0 %3547  ;;  %3612 = vst.msk [vmem:[%s8547_s3 + $0xc0] sm:$0xff] %vm3587_vm11, %v3540_v15 }
 0x3d0   :  { %3616 = vst.msk [vmem:[%s8547_s3 + $0xe0] sm:$0xff] %vm3587_vm11, %v3548_v37 }
 0x3d2   :  { %v3544_v58 = vpop.permute.xlu1 %3543 }
 0x3d3   :  { %3614 = vst.msk [vmem:[%s8547_s3 + $0xd0] sm:$0xff] %vm3587_vm11, %v3544_v58 }
 0x3d6   :  { %v3546_v28 = vpop.permute.xlu2 %3545 }
 0x3d7   :  { %3615 = vst.msk [vmem:[%s8547_s3 + $0xd8] sm:$0xff] %vm3587_vm11, %v3546_v28 }
 0x3d8   :  { %v3554_v0 = vpop.permute.xlu0 %3553 }
 0x3d9   :  { %3620 = vst.msk [vmem:[%s8547_s3 + $0xf8] sm:$0x3] %vm3619_vm5, %v3554_v0 }
 0x3db   :  { %v3550_v49 = vpop.permute.xlu1 %3549 }
 0x3dc   :  { %3617 = vst.msk [vmem:[%s8547_s3 + $0xe8] sm:$0xff] %vm3587_vm11, %v3550_v49 }
 0x3de   :  { %v3552_v19 = vpop.permute.xlu2 %3551 }
 0x3df   :  { %3618 = vst.msk [vmem:[%s8547_s3 + $0xf0] sm:$0xff] %vm3587_vm11, %v3552_v19 }
 0x3e0   :  { %3625 = vsyncpa [#allocation3], 1 }
 0x3e1   :  { %3626 = vsyncpa [#allocation5], 1 }

</bundles_post_ra>
